<compile_context>
chip_gen: v6e
topology: v6e:2x2x1
jax: 0.10.0
libtpu: 0.0.40
codegen_flags: <defaults>
</compile_context>

<pallas_src>
import jax
import jax.numpy as jnp
from jax.experimental import pallas as pl
from jax.experimental.pallas import tpu as pltpu


def _round_up(x, m):
    return (x + m - 1) // m * m


def _pad_to(x, shape):
    return jnp.pad(x, [(0, t - s) for s, t in zip(x.shape, shape)])


def _final_seq_len(S):
    # Static trace of the pyramid lengths: conv_region -> S-2, then each
    # block maps L -> floor((L-2)/2) + 1 (pad_b + maxpool(3, stride 2)).
    L = S - 2
    while L > 2:
        L = (L - 2) // 2 + 1
    return L


def dpcnn_kernel(emb_ref, wr_ref, br_ref, wc_ref, bc_ref, wf_ref, bf_ref,
                 out_ref, buf_ref):
    # emb_ref block: (TB, S, E) bf16 for the current batch tile.
    TB, S, _ = emb_ref.shape
    FP = wc_ref.shape[-1]
    f32 = jnp.float32
    zrow = jnp.zeros((1, FP), f32)

    def conv_pad(u, L):
        # relu'd u: (L, FP) f32 -> zero-pad 1 row top & bottom -> 3-tap conv.
        # Scratch-based padding (no concatenate-with-zeros materialization).
        buf_ref[0:1, :] = zrow
        buf_ref[1:L + 1, :] = u
        buf_ref[L + 1:L + 2, :] = zrow
        # im2col: one (L, 3*FP) @ (3*FP, FP) matmul instead of 3 K=FP matmuls.
        lhs = jnp.concatenate(
            [buf_ref[0:L, :], buf_ref[1:L + 1, :], buf_ref[2:L + 2, :]],
            axis=-1).astype(jnp.bfloat16)
        r = jnp.dot(lhs, wc_ref[...], preferred_element_type=f32)
        return r + bc_ref[...]

    def maxpool3s2(u, L):
        # nn.ZeroPad2d((0,0,0,1)) + nn.MaxPool2d((3,1), stride=2) on seq axis.
        P = (L - 2) // 2 + 1
        buf_ref[0:L, :] = u
        buf_ref[L:L + 1, :] = zrow
        px = jnp.maximum(
            jnp.maximum(buf_ref[pl.ds(0, P, stride=2), :],
                        buf_ref[pl.ds(1, P, stride=2), :]),
            buf_ref[pl.ds(2, P, stride=2), :])
        return px, P

    feats = []
    for b in range(TB):                       # unrolled batch-tile loop
        x = emb_ref[b]                        # (S, E) bf16
        Lo = S - 2
        # conv_region: kernel (3, E), valid padding -> seq S - 2.
        lhs0 = jnp.concatenate([x[0:Lo], x[1:Lo + 1], x[2:Lo + 2]], axis=-1)
        h = jnp.dot(lhs0, wr_ref[...], preferred_element_type=f32)
        h = h + br_ref[...]
        # Two plain conv passes (relu(pad(x)) == pad(relu(x)) since relu(0)=0).
        h = conv_pad(jnp.maximum(h, 0.0), Lo)
        h = conv_pad(jnp.maximum(h, 0.0), Lo)

        # Pyramid blocks; shapes are static so this unrolls at trace time
        # exactly like the PyTorch `while x.size()[2] > 2` loop.
        L = Lo
        while L > 2:
            px, L = maxpool3s2(h, L)
            y = conv_pad(jnp.maximum(px, 0.0), L)
            y = conv_pad(jnp.maximum(y, 0.0), L)
            h = y + px
        feats.append(h)                       # (1, FP): final seq length is 1

    # Batched fully-connected layer + single lane-dense store.
    feat = feats[0] if TB == 1 else jnp.concatenate(feats, axis=0)   # (TB, FP)
    logits = jnp.dot(feat.astype(jnp.bfloat16), wf_ref[...],
                     preferred_element_type=f32) + bf_ref[...]
    out_ref[...] = logits


def dpcnn_forward(ids, params, *, batch_tile=8):
    B, S = ids.shape
    if S < 3 or _final_seq_len(S) != 1:
        raise ValueError(
            f"sequence length {S} does not collapse to 1 in the DPCNN "
            "pyramid; the reference model's squeeze()+Linear requires this")

    # Embedding gather is glue (stays outside the kernel); bf16 table halves
    # the dominant HBM->VMEM stream.
    emb = jnp.take(params["embedding"].astype(jnp.bfloat16), ids, axis=0)
    E = emb.shape[-1]
    F = params["w_conv"].shape[-1]
    C = params["w_fc"].shape[-1]
    FP = _round_up(F, 128)          # lane-pad filters
    CP = _round_up(C, 128)          # lane-dense logits (real C sliced below)

    # Fuse the 3 conv taps along the contraction axis and lane-pad channels.
    # Zero-padded channels stay exactly zero through the whole network.
    wr = _pad_to(params["w_region"], (3, E, FP)).reshape(3 * E, FP)
    wc = _pad_to(params["w_conv"], (3, FP, FP)).reshape(3 * FP, FP)
    wf = _pad_to(params["w_fc"], (FP, CP))
    br = _pad_to(params["b_region"].reshape(1, -1), (1, FP))
    bc = _pad_to(params["b_conv"].reshape(1, -1), (1, FP))
    bf = _pad_to(params["b_fc"].reshape(1, -1), (1, CP))

    # Batch tile: several examples per grid step to amortize per-step overhead.
    if B >= batch_tile:
        TB = batch_tile                   # multiple of 8 -> valid sublane block
        BP = _round_up(B, TB)
    else:
        TB, BP = B, B                     # single grid step
    if BP != B:
        emb = jnp.pad(emb, ((0, BP - B), (0, 0), (0, 0)))

    buf_rows = max(_round_up(S, 8), 8)    # padded-activation scratch rows

    out = pl.pallas_call(
        dpcnn_kernel,
        out_shape=jax.ShapeDtypeStruct((BP, CP), jnp.float32),
        grid_spec=pltpu.PrefetchScalarGridSpec(
            num_scalar_prefetch=0,
            grid=(BP // TB,),
            in_specs=[
                pl.BlockSpec((TB, S, E), lambda b: (b, 0, 0)),   # embeddings
                pl.BlockSpec((3 * E, FP), lambda b: (0, 0)),     # region conv W
                pl.BlockSpec((1, FP), lambda b: (0, 0)),         # region conv b
                pl.BlockSpec((3 * FP, FP), lambda b: (0, 0)),    # conv W
                pl.BlockSpec((1, FP), lambda b: (0, 0)),         # conv b
                pl.BlockSpec((FP, CP), lambda b: (0, 0)),        # fc W
                pl.BlockSpec((1, CP), lambda b: (0, 0)),         # fc b
            ],
            out_specs=pl.BlockSpec((TB, CP), lambda b: (b, 0)),
            scratch_shapes=[pltpu.VMEM((buf_rows, FP), jnp.float32)],
        ),
        compiler_params=pltpu.CompilerParams(
            dimension_semantics=("parallel",),
            vmem_limit_bytes=32 * 1024 * 1024),
    )(emb,
      wr.astype(jnp.bfloat16), br.astype(jnp.float32),
      wc.astype(jnp.bfloat16), bc.astype(jnp.float32),
      wf.astype(jnp.bfloat16), bf.astype(jnp.float32))
    return out[:B, :C]                                   # (B, class_size)


def init_params(key, *, num_words, embedding_dim, num_filters, class_size):
    k = jax.random.split(key, 7)
    E, F, C = embedding_dim, num_filters, class_size
    # PyTorch layouts:
    #   conv_region.weight [F, 1, 3, E] -> (3, E, F) so out = sum_k x[t+k] @ Wk
    #   conv.weight        [F, F, 3, 1] -> (3, F, F)
    #   fc.weight          [C, F]       -> (F, C)
    return {
        "embedding": jax.random.normal(k[0], (num_words, E), jnp.float32) * 0.1,
        "w_region": jax.random.normal(k[1], (3, E, F), jnp.float32) * 0.05,
        "b_region": jax.random.normal(k[2], (1, F), jnp.float32) * 0.05,
        "w_conv": jax.random.normal(k[3], (3, F, F), jnp.float32) * 0.05,
        "b_conv": jax.random.normal(k[4], (1, F), jnp.float32) * 0.05,
        "w_fc": jax.random.normal(k[5], (F, C), jnp.float32) * 0.05,
        "b_fc": jax.random.normal(k[6], (1, C), jnp.float32) * 0.05,
    }


if __name__ == "__main__":
    B, S = 2, 16            # batch, sequence length (16 -> 14 -> 7 -> 3 -> 1)
    num_words = 50
    embedding_dim = 32
    num_filters = 64        # logical DPCNN width (lane-padded to 128 inside)
    class_size = 5          # logical classes (lane-padded to 128 inside)

    key = jax.random.PRNGKey(0)
    kp, ki = jax.random.split(key)
    params = init_params(kp, num_words=num_words, embedding_dim=embedding_dim,
                         num_filters=num_filters, class_size=class_size)
    content_chars = jax.random.randint(ki, (B, S), 0, num_words, jnp.int32)

    logits = jax.jit(dpcnn_forward)(content_chars, params)
    logits = jax.block_until_ready(logits)

    assert logits.shape == (B, class_size), logits.shape
    assert bool(jnp.all(jnp.isfinite(logits)))
    print("KERNEL_OK")
</pallas_src>

<mosaic_0001>
module attributes {stable_mosaic.version = 11 : i64} {
  func.func @dpcnn_kernel(%arg0: i32, %arg1: memref<2x16x32xbf16, #tpu.memory_space<vmem>>, %arg2: memref<96x128xbf16, #tpu.memory_space<vmem>>, %arg3: memref<1x128xf32, #tpu.memory_space<vmem>>, %arg4: memref<384x128xbf16, #tpu.memory_space<vmem>>, %arg5: memref<1x128xf32, #tpu.memory_space<vmem>>, %arg6: memref<128x128xbf16, #tpu.memory_space<vmem>>, %arg7: memref<1x128xf32, #tpu.memory_space<vmem>>, %arg8: memref<2x128xf32, #tpu.memory_space<vmem>>, %arg9: memref<16x128xf32, #tpu.memory_space<vmem>>) attributes {dimension_semantics = [#tpu.dimension_semantics<parallel>], iteration_bounds = array<i64: 1>, scalar_prefetch = 0 : i64, scratch_operands = 1 : i64, tpu.core_type = #tpu.core_type<tc>, window_params = [{transform_indices = @transform_0, window_bounds = array<i64: 2, 16, 32>}, {pipeline_mode = #tpu.pipeline_mode<synchronous>, transform_indices = @transform_1, window_bounds = array<i64: 96, 128>}, {pipeline_mode = #tpu.pipeline_mode<synchronous>, transform_indices = @transform_2, window_bounds = array<i64: 1, 128>}, {pipeline_mode = #tpu.pipeline_mode<synchronous>, transform_indices = @transform_3, window_bounds = array<i64: 384, 128>}, {pipeline_mode = #tpu.pipeline_mode<synchronous>, transform_indices = @transform_4, window_bounds = array<i64: 1, 128>}, {pipeline_mode = #tpu.pipeline_mode<synchronous>, transform_indices = @transform_5, window_bounds = array<i64: 128, 128>}, {pipeline_mode = #tpu.pipeline_mode<synchronous>, transform_indices = @transform_6, window_bounds = array<i64: 1, 128>}, {transform_indices = @transform_7, window_bounds = array<i64: 2, 128>}]} {
    %cst = arith.constant 0.000000e+00 : f32
    %0 = vector.broadcast %cst : f32 to vector<1x128xf32>
    %c0 = arith.constant 0 : index
    %c0_0 = arith.constant 0 : index
    %c0_1 = arith.constant 0 : index
    %1 = vector.load %arg1[%c0, %c0_0, %c0_1] : memref<2x16x32xbf16, #tpu.memory_space<vmem>>, vector<1x16x32xbf16>
    %2 = vector.shape_cast %1 : vector<1x16x32xbf16> to vector<16x32xbf16>
    %3 = vector.extract_strided_slice %2 {offsets = [0, 0], sizes = [14, 32], strides = [1, 1]} : vector<16x32xbf16> to vector<14x32xbf16>
    %4 = vector.extract_strided_slice %2 {offsets = [1, 0], sizes = [14, 32], strides = [1, 1]} : vector<16x32xbf16> to vector<14x32xbf16>
    %5 = vector.extract_strided_slice %2 {offsets = [2, 0], sizes = [14, 32], strides = [1, 1]} : vector<16x32xbf16> to vector<14x32xbf16>
    %6 = tpu.concatenate %3, %4, %5 in 1 : vector<14x32xbf16>, vector<14x32xbf16>, vector<14x32xbf16> -> vector<14x96xbf16>
    %c0_2 = arith.constant 0 : index
    %c0_3 = arith.constant 0 : index
    %7 = vector.load %arg2[%c0_2, %c0_3] : memref<96x128xbf16, #tpu.memory_space<vmem>>, vector<96x128xbf16>
    %cst_4 = arith.constant dense<0.000000e+00> : vector<14x128xf32>
    %8 = tpu.matmul %6, %7, %cst_4 {dimension_numbers = #tpu.dot_dimension_numbers<[1], [0], [0], [1], [0, 0, 1, 1], [], []>} : vector<14x96xbf16>, vector<96x128xbf16>, vector<14x128xf32> -> vector<14x128xf32>
    %c0_5 = arith.constant 0 : index
    %c0_6 = arith.constant 0 : index
    %9 = vector.load %arg3[%c0_5, %c0_6] : memref<1x128xf32, #tpu.memory_space<vmem>>, vector<1x128xf32>
    %10 = vector.broadcast %9 : vector<1x128xf32> to vector<14x128xf32>
    %11 = arith.addf %8, %10 : vector<14x128xf32>
    %cst_7 = arith.constant 0.000000e+00 : f32
    %12 = vector.broadcast %cst_7 : f32 to vector<14x128xf32>
    %13 = arith.maximumf %11, %12 : vector<14x128xf32>
    %c0_8 = arith.constant 0 : index
    %c0_9 = arith.constant 0 : index
    %14 = vector.load %arg9[%c0_8, %c0_9] : memref<16x128xf32, #tpu.memory_space<vmem>>, vector<1x128xf32>
    tpu.vector_store %arg9[%c0_8, %c0_9], %0 {strides = array<i32>} : memref<16x128xf32, #tpu.memory_space<vmem>>, vector<1x128xf32>,
    %c1 = arith.constant 1 : index
    %c0_10 = arith.constant 0 : index
    %15 = vector.load %arg9[%c1, %c0_10] : memref<16x128xf32, #tpu.memory_space<vmem>>, vector<14x128xf32>
    tpu.vector_store %arg9[%c1, %c0_10], %13 {strides = array<i32>} : memref<16x128xf32, #tpu.memory_space<vmem>>, vector<14x128xf32>,
    %c15 = arith.constant 15 : index
    %c0_11 = arith.constant 0 : index
    %16 = vector.load %arg9[%c15, %c0_11] : memref<16x128xf32, #tpu.memory_space<vmem>>, vector<1x128xf32>
    tpu.vector_store %arg9[%c15, %c0_11], %0 {strides = array<i32>} : memref<16x128xf32, #tpu.memory_space<vmem>>, vector<1x128xf32>,
    %c0_12 = arith.constant 0 : index
    %c0_13 = arith.constant 0 : index
    %17 = vector.load %arg9[%c0_12, %c0_13] : memref<16x128xf32, #tpu.memory_space<vmem>>, vector<14x128xf32>
    %c1_14 = arith.constant 1 : index
    %c0_15 = arith.constant 0 : index
    %18 = vector.load %arg9[%c1_14, %c0_15] : memref<16x128xf32, #tpu.memory_space<vmem>>, vector<14x128xf32>
    %c2 = arith.constant 2 : index
    %c0_16 = arith.constant 0 : index
    %19 = vector.load %arg9[%c2, %c0_16] : memref<16x128xf32, #tpu.memory_space<vmem>>, vector<14x128xf32>
    %20 = tpu.concatenate %17, %18, %19 in 1 : vector<14x128xf32>, vector<14x128xf32>, vector<14x128xf32> -> vector<14x384xf32>
    %21 = arith.truncf %20 : vector<14x384xf32> to vector<14x384xbf16>
    %c0_17 = arith.constant 0 : index
    %c0_18 = arith.constant 0 : index
    %22 = vector.load %arg4[%c0_17, %c0_18] : memref<384x128xbf16, #tpu.memory_space<vmem>>, vector<384x128xbf16>
    %cst_19 = arith.constant dense<0.000000e+00> : vector<14x128xf32>
    %23 = tpu.matmul %21, %22, %cst_19 {dimension_numbers = #tpu.dot_dimension_numbers<[1], [0], [0], [1], [0, 0, 1, 1], [], []>} : vector<14x384xbf16>, vector<384x128xbf16>, vector<14x128xf32> -> vector<14x128xf32>
    %c0_20 = arith.constant 0 : index
    %c0_21 = arith.constant 0 : index
    %24 = vector.load %arg5[%c0_20, %c0_21] : memref<1x128xf32, #tpu.memory_space<vmem>>, vector<1x128xf32>
    %25 = vector.broadcast %24 : vector<1x128xf32> to vector<14x128xf32>
    %26 = arith.addf %23, %25 : vector<14x128xf32>
    %cst_22 = arith.constant 0.000000e+00 : f32
    %27 = vector.broadcast %cst_22 : f32 to vector<14x128xf32>
    %28 = arith.maximumf %26, %27 : vector<14x128xf32>
    %c0_23 = arith.constant 0 : index
    %c0_24 = arith.constant 0 : index
    %29 = vector.load %arg9[%c0_23, %c0_24] : memref<16x128xf32, #tpu.memory_space<vmem>>, vector<1x128xf32>
    tpu.vector_store %arg9[%c0_23, %c0_24], %0 {strides = array<i32>} : memref<16x128xf32, #tpu.memory_space<vmem>>, vector<1x128xf32>,
    %c1_25 = arith.constant 1 : index
    %c0_26 = arith.constant 0 : index
    %30 = vector.load %arg9[%c1_25, %c0_26] : memref<16x128xf32, #tpu.memory_space<vmem>>, vector<14x128xf32>
    tpu.vector_store %arg9[%c1_25, %c0_26], %28 {strides = array<i32>} : memref<16x128xf32, #tpu.memory_space<vmem>>, vector<14x128xf32>,
    %c15_27 = arith.constant 15 : index
    %c0_28 = arith.constant 0 : index
    %31 = vector.load %arg9[%c15_27, %c0_28] : memref<16x128xf32, #tpu.memory_space<vmem>>, vector<1x128xf32>
    tpu.vector_store %arg9[%c15_27, %c0_28], %0 {strides = array<i32>} : memref<16x128xf32, #tpu.memory_space<vmem>>, vector<1x128xf32>,
    %c0_29 = arith.constant 0 : index
    %c0_30 = arith.constant 0 : index
    %32 = vector.load %arg9[%c0_29, %c0_30] : memref<16x128xf32, #tpu.memory_space<vmem>>, vector<14x128xf32>
    %c1_31 = arith.constant 1 : index
    %c0_32 = arith.constant 0 : index
    %33 = vector.load %arg9[%c1_31, %c0_32] : memref<16x128xf32, #tpu.memory_space<vmem>>, vector<14x128xf32>
    %c2_33 = arith.constant 2 : index
    %c0_34 = arith.constant 0 : index
    %34 = vector.load %arg9[%c2_33, %c0_34] : memref<16x128xf32, #tpu.memory_space<vmem>>, vector<14x128xf32>
    %35 = tpu.concatenate %32, %33, %34 in 1 : vector<14x128xf32>, vector<14x128xf32>, vector<14x128xf32> -> vector<14x384xf32>
    %36 = arith.truncf %35 : vector<14x384xf32> to vector<14x384xbf16>
    %c0_35 = arith.constant 0 : index
    %c0_36 = arith.constant 0 : index
    %37 = vector.load %arg4[%c0_35, %c0_36] : memref<384x128xbf16, #tpu.memory_space<vmem>>, vector<384x128xbf16>
    %cst_37 = arith.constant dense<0.000000e+00> : vector<14x128xf32>
    %38 = tpu.matmul %36, %37, %cst_37 {dimension_numbers = #tpu.dot_dimension_numbers<[1], [0], [0], [1], [0, 0, 1, 1], [], []>} : vector<14x384xbf16>, vector<384x128xbf16>, vector<14x128xf32> -> vector<14x128xf32>
    %c0_38 = arith.constant 0 : index
    %c0_39 = arith.constant 0 : index
    %39 = vector.load %arg5[%c0_38, %c0_39] : memref<1x128xf32, #tpu.memory_space<vmem>>, vector<1x128xf32>
    %40 = vector.broadcast %39 : vector<1x128xf32> to vector<14x128xf32>
    %41 = arith.addf %38, %40 : vector<14x128xf32>
    %c0_40 = arith.constant 0 : index
    %c0_41 = arith.constant 0 : index
    %42 = vector.load %arg9[%c0_40, %c0_41] : memref<16x128xf32, #tpu.memory_space<vmem>>, vector<14x128xf32>
    tpu.vector_store %arg9[%c0_40, %c0_41], %41 {strides = array<i32>} : memref<16x128xf32, #tpu.memory_space<vmem>>, vector<14x128xf32>,
    %c14 = arith.constant 14 : index
    %c0_42 = arith.constant 0 : index
    %43 = vector.load %arg9[%c14, %c0_42] : memref<16x128xf32, #tpu.memory_space<vmem>>, vector<1x128xf32>
    tpu.vector_store %arg9[%c14, %c0_42], %0 {strides = array<i32>} : memref<16x128xf32, #tpu.memory_space<vmem>>, vector<1x128xf32>,
    %c0_43 = arith.constant 0 : index
    %c0_44 = arith.constant 0 : index
    %44 = tpu.strided_load %arg9[%c0_43, %c0_44] {strides = array<i32: 2, 1>} : memref<16x128xf32, #tpu.memory_space<vmem>>, vector<7x128xf32>
    %c1_45 = arith.constant 1 : index
    %c0_46 = arith.constant 0 : index
    %45 = tpu.strided_load %arg9[%c1_45, %c0_46] {strides = array<i32: 2, 1>} : memref<16x128xf32, #tpu.memory_space<vmem>>, vector<7x128xf32>
    %46 = arith.maximumf %44, %45 : vector<7x128xf32>
    %c2_47 = arith.constant 2 : index
    %c0_48 = arith.constant 0 : index
    %47 = tpu.strided_load %arg9[%c2_47, %c0_48] {strides = array<i32: 2, 1>} : memref<16x128xf32, #tpu.memory_space<vmem>>, vector<7x128xf32>
    %48 = arith.maximumf %46, %47 : vector<7x128xf32>
    %cst_49 = arith.constant 0.000000e+00 : f32
    %49 = vector.broadcast %cst_49 : f32 to vector<7x128xf32>
    %50 = arith.maximumf %48, %49 : vector<7x128xf32>
    %c0_50 = arith.constant 0 : index
    %c0_51 = arith.constant 0 : index
    %51 = vector.load %arg9[%c0_50, %c0_51] : memref<16x128xf32, #tpu.memory_space<vmem>>, vector<1x128xf32>
    tpu.vector_store %arg9[%c0_50, %c0_51], %0 {strides = array<i32>} : memref<16x128xf32, #tpu.memory_space<vmem>>, vector<1x128xf32>,
    %c1_52 = arith.constant 1 : index
    %c0_53 = arith.constant 0 : index
    %52 = vector.load %arg9[%c1_52, %c0_53] : memref<16x128xf32, #tpu.memory_space<vmem>>, vector<7x128xf32>
    tpu.vector_store %arg9[%c1_52, %c0_53], %50 {strides = array<i32>} : memref<16x128xf32, #tpu.memory_space<vmem>>, vector<7x128xf32>,
    %c8 = arith.constant 8 : index
    %c0_54 = arith.constant 0 : index
    %53 = vector.load %arg9[%c8, %c0_54] : memref<16x128xf32, #tpu.memory_space<vmem>>, vector<1x128xf32>
    tpu.vector_store %arg9[%c8, %c0_54], %0 {strides = array<i32>} : memref<16x128xf32, #tpu.memory_space<vmem>>, vector<1x128xf32>,
    %c0_55 = arith.constant 0 : index
    %c0_56 = arith.constant 0 : index
    %54 = vector.load %arg9[%c0_55, %c0_56] : memref<16x128xf32, #tpu.memory_space<vmem>>, vector<7x128xf32>
    %c1_57 = arith.constant 1 : index
    %c0_58 = arith.constant 0 : index
    %55 = vector.load %arg9[%c1_57, %c0_58] : memref<16x128xf32, #tpu.memory_space<vmem>>, vector<7x128xf32>
    %c2_59 = arith.constant 2 : index
    %c0_60 = arith.constant 0 : index
    %56 = vector.load %arg9[%c2_59, %c0_60] : memref<16x128xf32, #tpu.memory_space<vmem>>, vector<7x128xf32>
    %57 = tpu.concatenate %54, %55, %56 in 1 : vector<7x128xf32>, vector<7x128xf32>, vector<7x128xf32> -> vector<7x384xf32>
    %58 = arith.truncf %57 : vector<7x384xf32> to vector<7x384xbf16>
    %c0_61 = arith.constant 0 : index
    %c0_62 = arith.constant 0 : index
    %59 = vector.load %arg4[%c0_61, %c0_62] : memref<384x128xbf16, #tpu.memory_space<vmem>>, vector<384x128xbf16>
    %cst_63 = arith.constant dense<0.000000e+00> : vector<7x128xf32>
    %60 = tpu.matmul %58, %59, %cst_63 {dimension_numbers = #tpu.dot_dimension_numbers<[1], [0], [0], [1], [0, 0, 1, 1], [], []>} : vector<7x384xbf16>, vector<384x128xbf16>, vector<7x128xf32> -> vector<7x128xf32>
    %c0_64 = arith.constant 0 : index
    %c0_65 = arith.constant 0 : index
    %61 = vector.load %arg5[%c0_64, %c0_65] : memref<1x128xf32, #tpu.memory_space<vmem>>, vector<1x128xf32>
    %62 = vector.broadcast %61 : vector<1x128xf32> to vector<7x128xf32>
    %63 = arith.addf %60, %62 : vector<7x128xf32>
    %cst_66 = arith.constant 0.000000e+00 : f32
    %64 = vector.broadcast %cst_66 : f32 to vector<7x128xf32>
    %65 = arith.maximumf %63, %64 : vector<7x128xf32>
    %c0_67 = arith.constant 0 : index
    %c0_68 = arith.constant 0 : index
    %66 = vector.load %arg9[%c0_67, %c0_68] : memref<16x128xf32, #tpu.memory_space<vmem>>, vector<1x128xf32>
    tpu.vector_store %arg9[%c0_67, %c0_68], %0 {strides = array<i32>} : memref<16x128xf32, #tpu.memory_space<vmem>>, vector<1x128xf32>,
    %c1_69 = arith.constant 1 : index
    %c0_70 = arith.constant 0 : index
    %67 = vector.load %arg9[%c1_69, %c0_70] : memref<16x128xf32, #tpu.memory_space<vmem>>, vector<7x128xf32>
    tpu.vector_store %arg9[%c1_69, %c0_70], %65 {strides = array<i32>} : memref<16x128xf32, #tpu.memory_space<vmem>>, vector<7x128xf32>,
    %c8_71 = arith.constant 8 : index
    %c0_72 = arith.constant 0 : index
    %68 = vector.load %arg9[%c8_71, %c0_72] : memref<16x128xf32, #tpu.memory_space<vmem>>, vector<1x128xf32>
    tpu.vector_store %arg9[%c8_71, %c0_72], %0 {strides = array<i32>} : memref<16x128xf32, #tpu.memory_space<vmem>>, vector<1x128xf32>,
    %c0_73 = arith.constant 0 : index
    %c0_74 = arith.constant 0 : index
    %69 = vector.load %arg9[%c0_73, %c0_74] : memref<16x128xf32, #tpu.memory_space<vmem>>, vector<7x128xf32>
    %c1_75 = arith.constant 1 : index
    %c0_76 = arith.constant 0 : index
    %70 = vector.load %arg9[%c1_75, %c0_76] : memref<16x128xf32, #tpu.memory_space<vmem>>, vector<7x128xf32>
    %c2_77 = arith.constant 2 : index
    %c0_78 = arith.constant 0 : index
    %71 = vector.load %arg9[%c2_77, %c0_78] : memref<16x128xf32, #tpu.memory_space<vmem>>, vector<7x128xf32>
    %72 = tpu.concatenate %69, %70, %71 in 1 : vector<7x128xf32>, vector<7x128xf32>, vector<7x128xf32> -> vector<7x384xf32>
    %73 = arith.truncf %72 : vector<7x384xf32> to vector<7x384xbf16>
    %c0_79 = arith.constant 0 : index
    %c0_80 = arith.constant 0 : index
    %74 = vector.load %arg4[%c0_79, %c0_80] : memref<384x128xbf16, #tpu.memory_space<vmem>>, vector<384x128xbf16>
    %cst_81 = arith.constant dense<0.000000e+00> : vector<7x128xf32>
    %75 = tpu.matmul %73, %74, %cst_81 {dimension_numbers = #tpu.dot_dimension_numbers<[1], [0], [0], [1], [0, 0, 1, 1], [], []>} : vector<7x384xbf16>, vector<384x128xbf16>, vector<7x128xf32> -> vector<7x128xf32>
    %c0_82 = arith.constant 0 : index
    %c0_83 = arith.constant 0 : index
    %76 = vector.load %arg5[%c0_82, %c0_83] : memref<1x128xf32, #tpu.memory_space<vmem>>, vector<1x128xf32>
    %77 = vector.broadcast %76 : vector<1x128xf32> to vector<7x128xf32>
    %78 = arith.addf %75, %77 : vector<7x128xf32>
    %79 = arith.addf %78, %48 : vector<7x128xf32>
    %c0_84 = arith.constant 0 : index
    %c0_85 = arith.constant 0 : index
    %80 = vector.load %arg9[%c0_84, %c0_85] : memref<16x128xf32, #tpu.memory_space<vmem>>, vector<7x128xf32>
    tpu.vector_store %arg9[%c0_84, %c0_85], %79 {strides = array<i32>} : memref<16x128xf32, #tpu.memory_space<vmem>>, vector<7x128xf32>,
    %c7 = arith.constant 7 : index
    %c0_86 = arith.constant 0 : index
    %81 = vector.load %arg9[%c7, %c0_86] : memref<16x128xf32, #tpu.memory_space<vmem>>, vector<1x128xf32>
    tpu.vector_store %arg9[%c7, %c0_86], %0 {strides = array<i32>} : memref<16x128xf32, #tpu.memory_space<vmem>>, vector<1x128xf32>,
    %c0_87 = arith.constant 0 : index
    %c0_88 = arith.constant 0 : index
    %82 = tpu.strided_load %arg9[%c0_87, %c0_88] {strides = array<i32: 2, 1>} : memref<16x128xf32, #tpu.memory_space<vmem>>, vector<3x128xf32>
    %c1_89 = arith.constant 1 : index
    %c0_90 = arith.constant 0 : index
    %83 = tpu.strided_load %arg9[%c1_89, %c0_90] {strides = array<i32: 2, 1>} : memref<16x128xf32, #tpu.memory_space<vmem>>, vector<3x128xf32>
    %84 = arith.maximumf %82, %83 : vector<3x128xf32>
    %c2_91 = arith.constant 2 : index
    %c0_92 = arith.constant 0 : index
    %85 = tpu.strided_load %arg9[%c2_91, %c0_92] {strides = array<i32: 2, 1>} : memref<16x128xf32, #tpu.memory_space<vmem>>, vector<3x128xf32>
    %86 = arith.maximumf %84, %85 : vector<3x128xf32>
    %cst_93 = arith.constant 0.000000e+00 : f32
    %87 = vector.broadcast %cst_93 : f32 to vector<3x128xf32>
    %88 = arith.maximumf %86, %87 : vector<3x128xf32>
    %c0_94 = arith.constant 0 : index
    %c0_95 = arith.constant 0 : index
    %89 = vector.load %arg9[%c0_94, %c0_95] : memref<16x128xf32, #tpu.memory_space<vmem>>, vector<1x128xf32>
    tpu.vector_store %arg9[%c0_94, %c0_95], %0 {strides = array<i32>} : memref<16x128xf32, #tpu.memory_space<vmem>>, vector<1x128xf32>,
    %c1_96 = arith.constant 1 : index
    %c0_97 = arith.constant 0 : index
    %90 = vector.load %arg9[%c1_96, %c0_97] : memref<16x128xf32, #tpu.memory_space<vmem>>, vector<3x128xf32>
    tpu.vector_store %arg9[%c1_96, %c0_97], %88 {strides = array<i32>} : memref<16x128xf32, #tpu.memory_space<vmem>>, vector<3x128xf32>,
    %c4 = arith.constant 4 : index
    %c0_98 = arith.constant 0 : index
    %91 = vector.load %arg9[%c4, %c0_98] : memref<16x128xf32, #tpu.memory_space<vmem>>, vector<1x128xf32>
    tpu.vector_store %arg9[%c4, %c0_98], %0 {strides = array<i32>} : memref<16x128xf32, #tpu.memory_space<vmem>>, vector<1x128xf32>,
    %c0_99 = arith.constant 0 : index
    %c0_100 = arith.constant 0 : index
    %92 = vector.load %arg9[%c0_99, %c0_100] : memref<16x128xf32, #tpu.memory_space<vmem>>, vector<3x128xf32>
    %c1_101 = arith.constant 1 : index
    %c0_102 = arith.constant 0 : index
    %93 = vector.load %arg9[%c1_101, %c0_102] : memref<16x128xf32, #tpu.memory_space<vmem>>, vector<3x128xf32>
    %c2_103 = arith.constant 2 : index
    %c0_104 = arith.constant 0 : index
    %94 = vector.load %arg9[%c2_103, %c0_104] : memref<16x128xf32, #tpu.memory_space<vmem>>, vector<3x128xf32>
    %95 = tpu.concatenate %92, %93, %94 in 1 : vector<3x128xf32>, vector<3x128xf32>, vector<3x128xf32> -> vector<3x384xf32>
    %96 = arith.truncf %95 : vector<3x384xf32> to vector<3x384xbf16>
    %c0_105 = arith.constant 0 : index
    %c0_106 = arith.constant 0 : index
    %97 = vector.load %arg4[%c0_105, %c0_106] : memref<384x128xbf16, #tpu.memory_space<vmem>>, vector<384x128xbf16>
    %cst_107 = arith.constant dense<0.000000e+00> : vector<3x128xf32>
    %98 = tpu.matmul %96, %97, %cst_107 {dimension_numbers = #tpu.dot_dimension_numbers<[1], [0], [0], [1], [0, 0, 1, 1], [], []>} : vector<3x384xbf16>, vector<384x128xbf16>, vector<3x128xf32> -> vector<3x128xf32>
    %c0_108 = arith.constant 0 : index
    %c0_109 = arith.constant 0 : index
    %99 = vector.load %arg5[%c0_108, %c0_109] : memref<1x128xf32, #tpu.memory_space<vmem>>, vector<1x128xf32>
    %100 = vector.broadcast %99 : vector<1x128xf32> to vector<3x128xf32>
    %101 = arith.addf %98, %100 : vector<3x128xf32>
    %cst_110 = arith.constant 0.000000e+00 : f32
    %102 = vector.broadcast %cst_110 : f32 to vector<3x128xf32>
    %103 = arith.maximumf %101, %102 : vector<3x128xf32>
    %c0_111 = arith.constant 0 : index
    %c0_112 = arith.constant 0 : index
    %104 = vector.load %arg9[%c0_111, %c0_112] : memref<16x128xf32, #tpu.memory_space<vmem>>, vector<1x128xf32>
    tpu.vector_store %arg9[%c0_111, %c0_112], %0 {strides = array<i32>} : memref<16x128xf32, #tpu.memory_space<vmem>>, vector<1x128xf32>,
    %c1_113 = arith.constant 1 : index
    %c0_114 = arith.constant 0 : index
    %105 = vector.load %arg9[%c1_113, %c0_114] : memref<16x128xf32, #tpu.memory_space<vmem>>, vector<3x128xf32>
    tpu.vector_store %arg9[%c1_113, %c0_114], %103 {strides = array<i32>} : memref<16x128xf32, #tpu.memory_space<vmem>>, vector<3x128xf32>,
    %c4_115 = arith.constant 4 : index
    %c0_116 = arith.constant 0 : index
    %106 = vector.load %arg9[%c4_115, %c0_116] : memref<16x128xf32, #tpu.memory_space<vmem>>, vector<1x128xf32>
    tpu.vector_store %arg9[%c4_115, %c0_116], %0 {strides = array<i32>} : memref<16x128xf32, #tpu.memory_space<vmem>>, vector<1x128xf32>,
    %c0_117 = arith.constant 0 : index
    %c0_118 = arith.constant 0 : index
    %107 = vector.load %arg9[%c0_117, %c0_118] : memref<16x128xf32, #tpu.memory_space<vmem>>, vector<3x128xf32>
    %c1_119 = arith.constant 1 : index
    %c0_120 = arith.constant 0 : index
    %108 = vector.load %arg9[%c1_119, %c0_120] : memref<16x128xf32, #tpu.memory_space<vmem>>, vector<3x128xf32>
    %c2_121 = arith.constant 2 : index
    %c0_122 = arith.constant 0 : index
    %109 = vector.load %arg9[%c2_121, %c0_122] : memref<16x128xf32, #tpu.memory_space<vmem>>, vector<3x128xf32>
    %110 = tpu.concatenate %107, %108, %109 in 1 : vector<3x128xf32>, vector<3x128xf32>, vector<3x128xf32> -> vector<3x384xf32>
    %111 = arith.truncf %110 : vector<3x384xf32> to vector<3x384xbf16>
    %c0_123 = arith.constant 0 : index
    %c0_124 = arith.constant 0 : index
    %112 = vector.load %arg4[%c0_123, %c0_124] : memref<384x128xbf16, #tpu.memory_space<vmem>>, vector<384x128xbf16>
    %cst_125 = arith.constant dense<0.000000e+00> : vector<3x128xf32>
    %113 = tpu.matmul %111, %112, %cst_125 {dimension_numbers = #tpu.dot_dimension_numbers<[1], [0], [0], [1], [0, 0, 1, 1], [], []>} : vector<3x384xbf16>, vector<384x128xbf16>, vector<3x128xf32> -> vector<3x128xf32>
    %c0_126 = arith.constant 0 : index
    %c0_127 = arith.constant 0 : index
    %114 = vector.load %arg5[%c0_126, %c0_127] : memref<1x128xf32, #tpu.memory_space<vmem>>, vector<1x128xf32>
    %115 = vector.broadcast %114 : vector<1x128xf32> to vector<3x128xf32>
    %116 = arith.addf %113, %115 : vector<3x128xf32>
    %117 = arith.addf %116, %86 : vector<3x128xf32>
    %c0_128 = arith.constant 0 : index
    %c0_129 = arith.constant 0 : index
    %118 = vector.load %arg9[%c0_128, %c0_129] : memref<16x128xf32, #tpu.memory_space<vmem>>, vector<3x128xf32>
    tpu.vector_store %arg9[%c0_128, %c0_129], %117 {strides = array<i32>} : memref<16x128xf32, #tpu.memory_space<vmem>>, vector<3x128xf32>,
    %c3 = arith.constant 3 : index
    %c0_130 = arith.constant 0 : index
    %119 = vector.load %arg9[%c3, %c0_130] : memref<16x128xf32, #tpu.memory_space<vmem>>, vector<1x128xf32>
    tpu.vector_store %arg9[%c3, %c0_130], %0 {strides = array<i32>} : memref<16x128xf32, #tpu.memory_space<vmem>>, vector<1x128xf32>,
    %c0_131 = arith.constant 0 : index
    %c0_132 = arith.constant 0 : index
    %120 = tpu.strided_load %arg9[%c0_131, %c0_132] {strides = array<i32: 2, 1>} : memref<16x128xf32, #tpu.memory_space<vmem>>, vector<1x128xf32>
    %c1_133 = arith.constant 1 : index
    %c0_134 = arith.constant 0 : index
    %121 = tpu.strided_load %arg9[%c1_133, %c0_134] {strides = array<i32: 2, 1>} : memref<16x128xf32, #tpu.memory_space<vmem>>, vector<1x128xf32>
    %122 = arith.maximumf %120, %121 : vector<1x128xf32>
    %c2_135 = arith.constant 2 : index
    %c0_136 = arith.constant 0 : index
    %123 = tpu.strided_load %arg9[%c2_135, %c0_136] {strides = array<i32: 2, 1>} : memref<16x128xf32, #tpu.memory_space<vmem>>, vector<1x128xf32>
    %124 = arith.maximumf %122, %123 : vector<1x128xf32>
    %cst_137 = arith.constant 0.000000e+00 : f32
    %125 = vector.broadcast %cst_137 : f32 to vector<1x128xf32>
    %126 = arith.maximumf %124, %125 : vector<1x128xf32>
    %c0_138 = arith.constant 0 : index
    %c0_139 = arith.constant 0 : index
    %127 = vector.load %arg9[%c0_138, %c0_139] : memref<16x128xf32, #tpu.memory_space<vmem>>, vector<1x128xf32>
    tpu.vector_store %arg9[%c0_138, %c0_139], %0 {strides = array<i32>} : memref<16x128xf32, #tpu.memory_space<vmem>>, vector<1x128xf32>,
    %c1_140 = arith.constant 1 : index
    %c0_141 = arith.constant 0 : index
    %128 = vector.load %arg9[%c1_140, %c0_141] : memref<16x128xf32, #tpu.memory_space<vmem>>, vector<1x128xf32>
    tpu.vector_store %arg9[%c1_140, %c0_141], %126 {strides = array<i32>} : memref<16x128xf32, #tpu.memory_space<vmem>>, vector<1x128xf32>,
    %c2_142 = arith.constant 2 : index
    %c0_143 = arith.constant 0 : index
    %129 = vector.load %arg9[%c2_142, %c0_143] : memref<16x128xf32, #tpu.memory_space<vmem>>, vector<1x128xf32>
    tpu.vector_store %arg9[%c2_142, %c0_143], %0 {strides = array<i32>} : memref<16x128xf32, #tpu.memory_space<vmem>>, vector<1x128xf32>,
    %c0_144 = arith.constant 0 : index
    %c0_145 = arith.constant 0 : index
    %130 = vector.load %arg9[%c0_144, %c0_145] : memref<16x128xf32, #tpu.memory_space<vmem>>, vector<1x128xf32>
    %c1_146 = arith.constant 1 : index
    %c0_147 = arith.constant 0 : index
    %131 = vector.load %arg9[%c1_146, %c0_147] : memref<16x128xf32, #tpu.memory_space<vmem>>, vector<1x128xf32>
    %c2_148 = arith.constant 2 : index
    %c0_149 = arith.constant 0 : index
    %132 = vector.load %arg9[%c2_148, %c0_149] : memref<16x128xf32, #tpu.memory_space<vmem>>, vector<1x128xf32>
    %133 = tpu.concatenate %130, %131, %132 in 1 : vector<1x128xf32>, vector<1x128xf32>, vector<1x128xf32> -> vector<1x384xf32>
    %134 = arith.truncf %133 : vector<1x384xf32> to vector<1x384xbf16>
    %c0_150 = arith.constant 0 : index
    %c0_151 = arith.constant 0 : index
    %135 = vector.load %arg4[%c0_150, %c0_151] : memref<384x128xbf16, #tpu.memory_space<vmem>>, vector<384x128xbf16>
    %cst_152 = arith.constant dense<0.000000e+00> : vector<1x128xf32>
    %136 = tpu.matmul %134, %135, %cst_152 {dimension_numbers = #tpu.dot_dimension_numbers<[1], [0], [0], [1], [0, 0, 1, 1], [], []>} : vector<1x384xbf16>, vector<384x128xbf16>, vector<1x128xf32> -> vector<1x128xf32>
    %c0_153 = arith.constant 0 : index
    %c0_154 = arith.constant 0 : index
    %137 = vector.load %arg5[%c0_153, %c0_154] : memref<1x128xf32, #tpu.memory_space<vmem>>, vector<1x128xf32>
    %138 = arith.addf %136, %137 : vector<1x128xf32>
    %cst_155 = arith.constant 0.000000e+00 : f32
    %139 = vector.broadcast %cst_155 : f32 to vector<1x128xf32>
    %140 = arith.maximumf %138, %139 : vector<1x128xf32>
    %c0_156 = arith.constant 0 : index
    %c0_157 = arith.constant 0 : index
    %141 = vector.load %arg9[%c0_156, %c0_157] : memref<16x128xf32, #tpu.memory_space<vmem>>, vector<1x128xf32>
    tpu.vector_store %arg9[%c0_156, %c0_157], %0 {strides = array<i32>} : memref<16x128xf32, #tpu.memory_space<vmem>>, vector<1x128xf32>,
    %c1_158 = arith.constant 1 : index
    %c0_159 = arith.constant 0 : index
    %142 = vector.load %arg9[%c1_158, %c0_159] : memref<16x128xf32, #tpu.memory_space<vmem>>, vector<1x128xf32>
    tpu.vector_store %arg9[%c1_158, %c0_159], %140 {strides = array<i32>} : memref<16x128xf32, #tpu.memory_space<vmem>>, vector<1x128xf32>,
    %c2_160 = arith.constant 2 : index
    %c0_161 = arith.constant 0 : index
    %143 = vector.load %arg9[%c2_160, %c0_161] : memref<16x128xf32, #tpu.memory_space<vmem>>, vector<1x128xf32>
    tpu.vector_store %arg9[%c2_160, %c0_161], %0 {strides = array<i32>} : memref<16x128xf32, #tpu.memory_space<vmem>>, vector<1x128xf32>,
    %c0_162 = arith.constant 0 : index
    %c0_163 = arith.constant 0 : index
    %144 = vector.load %arg9[%c0_162, %c0_163] : memref<16x128xf32, #tpu.memory_space<vmem>>, vector<1x128xf32>
    %c1_164 = arith.constant 1 : index
    %c0_165 = arith.constant 0 : index
    %145 = vector.load %arg9[%c1_164, %c0_165] : memref<16x128xf32, #tpu.memory_space<vmem>>, vector<1x128xf32>
    %c2_166 = arith.constant 2 : index
    %c0_167 = arith.constant 0 : index
    %146 = vector.load %arg9[%c2_166, %c0_167] : memref<16x128xf32, #tpu.memory_space<vmem>>, vector<1x128xf32>
    %147 = tpu.concatenate %144, %145, %146 in 1 : vector<1x128xf32>, vector<1x128xf32>, vector<1x128xf32> -> vector<1x384xf32>
    %148 = arith.truncf %147 : vector<1x384xf32> to vector<1x384xbf16>
    %c0_168 = arith.constant 0 : index
    %c0_169 = arith.constant 0 : index
    %149 = vector.load %arg4[%c0_168, %c0_169] : memref<384x128xbf16, #tpu.memory_space<vmem>>, vector<384x128xbf16>
    %cst_170 = arith.constant dense<0.000000e+00> : vector<1x128xf32>
    %150 = tpu.matmul %148, %149, %cst_170 {dimension_numbers = #tpu.dot_dimension_numbers<[1], [0], [0], [1], [0, 0, 1, 1], [], []>} : vector<1x384xbf16>, vector<384x128xbf16>, vector<1x128xf32> -> vector<1x128xf32>
    %c0_171 = arith.constant 0 : index
    %c0_172 = arith.constant 0 : index
    %151 = vector.load %arg5[%c0_171, %c0_172] : memref<1x128xf32, #tpu.memory_space<vmem>>, vector<1x128xf32>
    %152 = arith.addf %150, %151 : vector<1x128xf32>
    %153 = arith.addf %152, %124 : vector<1x128xf32>
    %c1_173 = arith.constant 1 : index
    %c0_174 = arith.constant 0 : index
    %c0_175 = arith.constant 0 : index
    %154 = vector.load %arg1[%c1_173, %c0_174, %c0_175] : memref<2x16x32xbf16, #tpu.memory_space<vmem>>, vector<1x16x32xbf16>
    %155 = vector.shape_cast %154 : vector<1x16x32xbf16> to vector<16x32xbf16>
    %156 = vector.extract_strided_slice %155 {offsets = [0, 0], sizes = [14, 32], strides = [1, 1]} : vector<16x32xbf16> to vector<14x32xbf16>
    %157 = vector.extract_strided_slice %155 {offsets = [1, 0], sizes = [14, 32], strides = [1, 1]} : vector<16x32xbf16> to vector<14x32xbf16>
    %158 = vector.extract_strided_slice %155 {offsets = [2, 0], sizes = [14, 32], strides = [1, 1]} : vector<16x32xbf16> to vector<14x32xbf16>
    %159 = tpu.concatenate %156, %157, %158 in 1 : vector<14x32xbf16>, vector<14x32xbf16>, vector<14x32xbf16> -> vector<14x96xbf16>
    %c0_176 = arith.constant 0 : index
    %c0_177 = arith.constant 0 : index
    %160 = vector.load %arg2[%c0_176, %c0_177] : memref<96x128xbf16, #tpu.memory_space<vmem>>, vector<96x128xbf16>
    %cst_178 = arith.constant dense<0.000000e+00> : vector<14x128xf32>
    %161 = tpu.matmul %159, %160, %cst_178 {dimension_numbers = #tpu.dot_dimension_numbers<[1], [0], [0], [1], [0, 0, 1, 1], [], []>} : vector<14x96xbf16>, vector<96x128xbf16>, vector<14x128xf32> -> vector<14x128xf32>
    %c0_179 = arith.constant 0 : index
    %c0_180 = arith.constant 0 : index
    %162 = vector.load %arg3[%c0_179, %c0_180] : memref<1x128xf32, #tpu.memory_space<vmem>>, vector<1x128xf32>
    %163 = vector.broadcast %162 : vector<1x128xf32> to vector<14x128xf32>
    %164 = arith.addf %161, %163 : vector<14x128xf32>
    %cst_181 = arith.constant 0.000000e+00 : f32
    %165 = vector.broadcast %cst_181 : f32 to vector<14x128xf32>
    %166 = arith.maximumf %164, %165 : vector<14x128xf32>
    %c0_182 = arith.constant 0 : index
    %c0_183 = arith.constant 0 : index
    %167 = vector.load %arg9[%c0_182, %c0_183] : memref<16x128xf32, #tpu.memory_space<vmem>>, vector<1x128xf32>
    tpu.vector_store %arg9[%c0_182, %c0_183], %0 {strides = array<i32>} : memref<16x128xf32, #tpu.memory_space<vmem>>, vector<1x128xf32>,
    %c1_184 = arith.constant 1 : index
    %c0_185 = arith.constant 0 : index
    %168 = vector.load %arg9[%c1_184, %c0_185] : memref<16x128xf32, #tpu.memory_space<vmem>>, vector<14x128xf32>
    tpu.vector_store %arg9[%c1_184, %c0_185], %166 {strides = array<i32>} : memref<16x128xf32, #tpu.memory_space<vmem>>, vector<14x128xf32>,
    %c15_186 = arith.constant 15 : index
    %c0_187 = arith.constant 0 : index
    %169 = vector.load %arg9[%c15_186, %c0_187] : memref<16x128xf32, #tpu.memory_space<vmem>>, vector<1x128xf32>
    tpu.vector_store %arg9[%c15_186, %c0_187], %0 {strides = array<i32>} : memref<16x128xf32, #tpu.memory_space<vmem>>, vector<1x128xf32>,
    %c0_188 = arith.constant 0 : index
    %c0_189 = arith.constant 0 : index
    %170 = vector.load %arg9[%c0_188, %c0_189] : memref<16x128xf32, #tpu.memory_space<vmem>>, vector<14x128xf32>
    %c1_190 = arith.constant 1 : index
    %c0_191 = arith.constant 0 : index
    %171 = vector.load %arg9[%c1_190, %c0_191] : memref<16x128xf32, #tpu.memory_space<vmem>>, vector<14x128xf32>
    %c2_192 = arith.constant 2 : index
    %c0_193 = arith.constant 0 : index
    %172 = vector.load %arg9[%c2_192, %c0_193] : memref<16x128xf32, #tpu.memory_space<vmem>>, vector<14x128xf32>
    %173 = tpu.concatenate %170, %171, %172 in 1 : vector<14x128xf32>, vector<14x128xf32>, vector<14x128xf32> -> vector<14x384xf32>
    %174 = arith.truncf %173 : vector<14x384xf32> to vector<14x384xbf16>
    %c0_194 = arith.constant 0 : index
    %c0_195 = arith.constant 0 : index
    %175 = vector.load %arg4[%c0_194, %c0_195] : memref<384x128xbf16, #tpu.memory_space<vmem>>, vector<384x128xbf16>
    %cst_196 = arith.constant dense<0.000000e+00> : vector<14x128xf32>
    %176 = tpu.matmul %174, %175, %cst_196 {dimension_numbers = #tpu.dot_dimension_numbers<[1], [0], [0], [1], [0, 0, 1, 1], [], []>} : vector<14x384xbf16>, vector<384x128xbf16>, vector<14x128xf32> -> vector<14x128xf32>
    %c0_197 = arith.constant 0 : index
    %c0_198 = arith.constant 0 : index
    %177 = vector.load %arg5[%c0_197, %c0_198] : memref<1x128xf32, #tpu.memory_space<vmem>>, vector<1x128xf32>
    %178 = vector.broadcast %177 : vector<1x128xf32> to vector<14x128xf32>
    %179 = arith.addf %176, %178 : vector<14x128xf32>
    %cst_199 = arith.constant 0.000000e+00 : f32
    %180 = vector.broadcast %cst_199 : f32 to vector<14x128xf32>
    %181 = arith.maximumf %179, %180 : vector<14x128xf32>
    %c0_200 = arith.constant 0 : index
    %c0_201 = arith.constant 0 : index
    %182 = vector.load %arg9[%c0_200, %c0_201] : memref<16x128xf32, #tpu.memory_space<vmem>>, vector<1x128xf32>
    tpu.vector_store %arg9[%c0_200, %c0_201], %0 {strides = array<i32>} : memref<16x128xf32, #tpu.memory_space<vmem>>, vector<1x128xf32>,
    %c1_202 = arith.constant 1 : index
    %c0_203 = arith.constant 0 : index
    %183 = vector.load %arg9[%c1_202, %c0_203] : memref<16x128xf32, #tpu.memory_space<vmem>>, vector<14x128xf32>
    tpu.vector_store %arg9[%c1_202, %c0_203], %181 {strides = array<i32>} : memref<16x128xf32, #tpu.memory_space<vmem>>, vector<14x128xf32>,
    %c15_204 = arith.constant 15 : index
    %c0_205 = arith.constant 0 : index
    %184 = vector.load %arg9[%c15_204, %c0_205] : memref<16x128xf32, #tpu.memory_space<vmem>>, vector<1x128xf32>
    tpu.vector_store %arg9[%c15_204, %c0_205], %0 {strides = array<i32>} : memref<16x128xf32, #tpu.memory_space<vmem>>, vector<1x128xf32>,
    %c0_206 = arith.constant 0 : index
    %c0_207 = arith.constant 0 : index
    %185 = vector.load %arg9[%c0_206, %c0_207] : memref<16x128xf32, #tpu.memory_space<vmem>>, vector<14x128xf32>
    %c1_208 = arith.constant 1 : index
    %c0_209 = arith.constant 0 : index
    %186 = vector.load %arg9[%c1_208, %c0_209] : memref<16x128xf32, #tpu.memory_space<vmem>>, vector<14x128xf32>
    %c2_210 = arith.constant 2 : index
    %c0_211 = arith.constant 0 : index
    %187 = vector.load %arg9[%c2_210, %c0_211] : memref<16x128xf32, #tpu.memory_space<vmem>>, vector<14x128xf32>
    %188 = tpu.concatenate %185, %186, %187 in 1 : vector<14x128xf32>, vector<14x128xf32>, vector<14x128xf32> -> vector<14x384xf32>
    %189 = arith.truncf %188 : vector<14x384xf32> to vector<14x384xbf16>
    %c0_212 = arith.constant 0 : index
    %c0_213 = arith.constant 0 : index
    %190 = vector.load %arg4[%c0_212, %c0_213] : memref<384x128xbf16, #tpu.memory_space<vmem>>, vector<384x128xbf16>
    %cst_214 = arith.constant dense<0.000000e+00> : vector<14x128xf32>
    %191 = tpu.matmul %189, %190, %cst_214 {dimension_numbers = #tpu.dot_dimension_numbers<[1], [0], [0], [1], [0, 0, 1, 1], [], []>} : vector<14x384xbf16>, vector<384x128xbf16>, vector<14x128xf32> -> vector<14x128xf32>
    %c0_215 = arith.constant 0 : index
    %c0_216 = arith.constant 0 : index
    %192 = vector.load %arg5[%c0_215, %c0_216] : memref<1x128xf32, #tpu.memory_space<vmem>>, vector<1x128xf32>
    %193 = vector.broadcast %192 : vector<1x128xf32> to vector<14x128xf32>
    %194 = arith.addf %191, %193 : vector<14x128xf32>
    %c0_217 = arith.constant 0 : index
    %c0_218 = arith.constant 0 : index
    %195 = vector.load %arg9[%c0_217, %c0_218] : memref<16x128xf32, #tpu.memory_space<vmem>>, vector<14x128xf32>
    tpu.vector_store %arg9[%c0_217, %c0_218], %194 {strides = array<i32>} : memref<16x128xf32, #tpu.memory_space<vmem>>, vector<14x128xf32>,
    %c14_219 = arith.constant 14 : index
    %c0_220 = arith.constant 0 : index
    %196 = vector.load %arg9[%c14_219, %c0_220] : memref<16x128xf32, #tpu.memory_space<vmem>>, vector<1x128xf32>
    tpu.vector_store %arg9[%c14_219, %c0_220], %0 {strides = array<i32>} : memref<16x128xf32, #tpu.memory_space<vmem>>, vector<1x128xf32>,
    %c0_221 = arith.constant 0 : index
    %c0_222 = arith.constant 0 : index
    %197 = tpu.strided_load %arg9[%c0_221, %c0_222] {strides = array<i32: 2, 1>} : memref<16x128xf32, #tpu.memory_space<vmem>>, vector<7x128xf32>
    %c1_223 = arith.constant 1 : index
    %c0_224 = arith.constant 0 : index
    %198 = tpu.strided_load %arg9[%c1_223, %c0_224] {strides = array<i32: 2, 1>} : memref<16x128xf32, #tpu.memory_space<vmem>>, vector<7x128xf32>
    %199 = arith.maximumf %197, %198 : vector<7x128xf32>
    %c2_225 = arith.constant 2 : index
    %c0_226 = arith.constant 0 : index
    %200 = tpu.strided_load %arg9[%c2_225, %c0_226] {strides = array<i32: 2, 1>} : memref<16x128xf32, #tpu.memory_space<vmem>>, vector<7x128xf32>
    %201 = arith.maximumf %199, %200 : vector<7x128xf32>
    %cst_227 = arith.constant 0.000000e+00 : f32
    %202 = vector.broadcast %cst_227 : f32 to vector<7x128xf32>
    %203 = arith.maximumf %201, %202 : vector<7x128xf32>
    %c0_228 = arith.constant 0 : index
    %c0_229 = arith.constant 0 : index
    %204 = vector.load %arg9[%c0_228, %c0_229] : memref<16x128xf32, #tpu.memory_space<vmem>>, vector<1x128xf32>
    tpu.vector_store %arg9[%c0_228, %c0_229], %0 {strides = array<i32>} : memref<16x128xf32, #tpu.memory_space<vmem>>, vector<1x128xf32>,
    %c1_230 = arith.constant 1 : index
    %c0_231 = arith.constant 0 : index
    %205 = vector.load %arg9[%c1_230, %c0_231] : memref<16x128xf32, #tpu.memory_space<vmem>>, vector<7x128xf32>
    tpu.vector_store %arg9[%c1_230, %c0_231], %203 {strides = array<i32>} : memref<16x128xf32, #tpu.memory_space<vmem>>, vector<7x128xf32>,
    %c8_232 = arith.constant 8 : index
    %c0_233 = arith.constant 0 : index
    %206 = vector.load %arg9[%c8_232, %c0_233] : memref<16x128xf32, #tpu.memory_space<vmem>>, vector<1x128xf32>
    tpu.vector_store %arg9[%c8_232, %c0_233], %0 {strides = array<i32>} : memref<16x128xf32, #tpu.memory_space<vmem>>, vector<1x128xf32>,
    %c0_234 = arith.constant 0 : index
    %c0_235 = arith.constant 0 : index
    %207 = vector.load %arg9[%c0_234, %c0_235] : memref<16x128xf32, #tpu.memory_space<vmem>>, vector<7x128xf32>
    %c1_236 = arith.constant 1 : index
    %c0_237 = arith.constant 0 : index
    %208 = vector.load %arg9[%c1_236, %c0_237] : memref<16x128xf32, #tpu.memory_space<vmem>>, vector<7x128xf32>
    %c2_238 = arith.constant 2 : index
    %c0_239 = arith.constant 0 : index
    %209 = vector.load %arg9[%c2_238, %c0_239] : memref<16x128xf32, #tpu.memory_space<vmem>>, vector<7x128xf32>
    %210 = tpu.concatenate %207, %208, %209 in 1 : vector<7x128xf32>, vector<7x128xf32>, vector<7x128xf32> -> vector<7x384xf32>
    %211 = arith.truncf %210 : vector<7x384xf32> to vector<7x384xbf16>
    %c0_240 = arith.constant 0 : index
    %c0_241 = arith.constant 0 : index
    %212 = vector.load %arg4[%c0_240, %c0_241] : memref<384x128xbf16, #tpu.memory_space<vmem>>, vector<384x128xbf16>
    %cst_242 = arith.constant dense<0.000000e+00> : vector<7x128xf32>
    %213 = tpu.matmul %211, %212, %cst_242 {dimension_numbers = #tpu.dot_dimension_numbers<[1], [0], [0], [1], [0, 0, 1, 1], [], []>} : vector<7x384xbf16>, vector<384x128xbf16>, vector<7x128xf32> -> vector<7x128xf32>
    %c0_243 = arith.constant 0 : index
    %c0_244 = arith.constant 0 : index
    %214 = vector.load %arg5[%c0_243, %c0_244] : memref<1x128xf32, #tpu.memory_space<vmem>>, vector<1x128xf32>
    %215 = vector.broadcast %214 : vector<1x128xf32> to vector<7x128xf32>
    %216 = arith.addf %213, %215 : vector<7x128xf32>
    %cst_245 = arith.constant 0.000000e+00 : f32
    %217 = vector.broadcast %cst_245 : f32 to vector<7x128xf32>
    %218 = arith.maximumf %216, %217 : vector<7x128xf32>
    %c0_246 = arith.constant 0 : index
    %c0_247 = arith.constant 0 : index
    %219 = vector.load %arg9[%c0_246, %c0_247] : memref<16x128xf32, #tpu.memory_space<vmem>>, vector<1x128xf32>
    tpu.vector_store %arg9[%c0_246, %c0_247], %0 {strides = array<i32>} : memref<16x128xf32, #tpu.memory_space<vmem>>, vector<1x128xf32>,
    %c1_248 = arith.constant 1 : index
    %c0_249 = arith.constant 0 : index
    %220 = vector.load %arg9[%c1_248, %c0_249] : memref<16x128xf32, #tpu.memory_space<vmem>>, vector<7x128xf32>
    tpu.vector_store %arg9[%c1_248, %c0_249], %218 {strides = array<i32>} : memref<16x128xf32, #tpu.memory_space<vmem>>, vector<7x128xf32>,
    %c8_250 = arith.constant 8 : index
    %c0_251 = arith.constant 0 : index
    %221 = vector.load %arg9[%c8_250, %c0_251] : memref<16x128xf32, #tpu.memory_space<vmem>>, vector<1x128xf32>
    tpu.vector_store %arg9[%c8_250, %c0_251], %0 {strides = array<i32>} : memref<16x128xf32, #tpu.memory_space<vmem>>, vector<1x128xf32>,
    %c0_252 = arith.constant 0 : index
    %c0_253 = arith.constant 0 : index
    %222 = vector.load %arg9[%c0_252, %c0_253] : memref<16x128xf32, #tpu.memory_space<vmem>>, vector<7x128xf32>
    %c1_254 = arith.constant 1 : index
    %c0_255 = arith.constant 0 : index
    %223 = vector.load %arg9[%c1_254, %c0_255] : memref<16x128xf32, #tpu.memory_space<vmem>>, vector<7x128xf32>
    %c2_256 = arith.constant 2 : index
    %c0_257 = arith.constant 0 : index
    %224 = vector.load %arg9[%c2_256, %c0_257] : memref<16x128xf32, #tpu.memory_space<vmem>>, vector<7x128xf32>
    %225 = tpu.concatenate %222, %223, %224 in 1 : vector<7x128xf32>, vector<7x128xf32>, vector<7x128xf32> -> vector<7x384xf32>
    %226 = arith.truncf %225 : vector<7x384xf32> to vector<7x384xbf16>
    %c0_258 = arith.constant 0 : index
    %c0_259 = arith.constant 0 : index
    %227 = vector.load %arg4[%c0_258, %c0_259] : memref<384x128xbf16, #tpu.memory_space<vmem>>, vector<384x128xbf16>
    %cst_260 = arith.constant dense<0.000000e+00> : vector<7x128xf32>
    %228 = tpu.matmul %226, %227, %cst_260 {dimension_numbers = #tpu.dot_dimension_numbers<[1], [0], [0], [1], [0, 0, 1, 1], [], []>} : vector<7x384xbf16>, vector<384x128xbf16>, vector<7x128xf32> -> vector<7x128xf32>
    %c0_261 = arith.constant 0 : index
    %c0_262 = arith.constant 0 : index
    %229 = vector.load %arg5[%c0_261, %c0_262] : memref<1x128xf32, #tpu.memory_space<vmem>>, vector<1x128xf32>
    %230 = vector.broadcast %229 : vector<1x128xf32> to vector<7x128xf32>
    %231 = arith.addf %228, %230 : vector<7x128xf32>
    %232 = arith.addf %231, %201 : vector<7x128xf32>
    %c0_263 = arith.constant 0 : index
    %c0_264 = arith.constant 0 : index
    %233 = vector.load %arg9[%c0_263, %c0_264] : memref<16x128xf32, #tpu.memory_space<vmem>>, vector<7x128xf32>
    tpu.vector_store %arg9[%c0_263, %c0_264], %232 {strides = array<i32>} : memref<16x128xf32, #tpu.memory_space<vmem>>, vector<7x128xf32>,
    %c7_265 = arith.constant 7 : index
    %c0_266 = arith.constant 0 : index
    %234 = vector.load %arg9[%c7_265, %c0_266] : memref<16x128xf32, #tpu.memory_space<vmem>>, vector<1x128xf32>
    tpu.vector_store %arg9[%c7_265, %c0_266], %0 {strides = array<i32>} : memref<16x128xf32, #tpu.memory_space<vmem>>, vector<1x128xf32>,
    %c0_267 = arith.constant 0 : index
    %c0_268 = arith.constant 0 : index
    %235 = tpu.strided_load %arg9[%c0_267, %c0_268] {strides = array<i32: 2, 1>} : memref<16x128xf32, #tpu.memory_space<vmem>>, vector<3x128xf32>
    %c1_269 = arith.constant 1 : index
    %c0_270 = arith.constant 0 : index
    %236 = tpu.strided_load %arg9[%c1_269, %c0_270] {strides = array<i32: 2, 1>} : memref<16x128xf32, #tpu.memory_space<vmem>>, vector<3x128xf32>
    %237 = arith.maximumf %235, %236 : vector<3x128xf32>
    %c2_271 = arith.constant 2 : index
    %c0_272 = arith.constant 0 : index
    %238 = tpu.strided_load %arg9[%c2_271, %c0_272] {strides = array<i32: 2, 1>} : memref<16x128xf32, #tpu.memory_space<vmem>>, vector<3x128xf32>
    %239 = arith.maximumf %237, %238 : vector<3x128xf32>
    %cst_273 = arith.constant 0.000000e+00 : f32
    %240 = vector.broadcast %cst_273 : f32 to vector<3x128xf32>
    %241 = arith.maximumf %239, %240 : vector<3x128xf32>
    %c0_274 = arith.constant 0 : index
    %c0_275 = arith.constant 0 : index
    %242 = vector.load %arg9[%c0_274, %c0_275] : memref<16x128xf32, #tpu.memory_space<vmem>>, vector<1x128xf32>
    tpu.vector_store %arg9[%c0_274, %c0_275], %0 {strides = array<i32>} : memref<16x128xf32, #tpu.memory_space<vmem>>, vector<1x128xf32>,
    %c1_276 = arith.constant 1 : index
    %c0_277 = arith.constant 0 : index
    %243 = vector.load %arg9[%c1_276, %c0_277] : memref<16x128xf32, #tpu.memory_space<vmem>>, vector<3x128xf32>
    tpu.vector_store %arg9[%c1_276, %c0_277], %241 {strides = array<i32>} : memref<16x128xf32, #tpu.memory_space<vmem>>, vector<3x128xf32>,
    %c4_278 = arith.constant 4 : index
    %c0_279 = arith.constant 0 : index
    %244 = vector.load %arg9[%c4_278, %c0_279] : memref<16x128xf32, #tpu.memory_space<vmem>>, vector<1x128xf32>
    tpu.vector_store %arg9[%c4_278, %c0_279], %0 {strides = array<i32>} : memref<16x128xf32, #tpu.memory_space<vmem>>, vector<1x128xf32>,
    %c0_280 = arith.constant 0 : index
    %c0_281 = arith.constant 0 : index
    %245 = vector.load %arg9[%c0_280, %c0_281] : memref<16x128xf32, #tpu.memory_space<vmem>>, vector<3x128xf32>
    %c1_282 = arith.constant 1 : index
    %c0_283 = arith.constant 0 : index
    %246 = vector.load %arg9[%c1_282, %c0_283] : memref<16x128xf32, #tpu.memory_space<vmem>>, vector<3x128xf32>
    %c2_284 = arith.constant 2 : index
    %c0_285 = arith.constant 0 : index
    %247 = vector.load %arg9[%c2_284, %c0_285] : memref<16x128xf32, #tpu.memory_space<vmem>>, vector<3x128xf32>
    %248 = tpu.concatenate %245, %246, %247 in 1 : vector<3x128xf32>, vector<3x128xf32>, vector<3x128xf32> -> vector<3x384xf32>
    %249 = arith.truncf %248 : vector<3x384xf32> to vector<3x384xbf16>
    %c0_286 = arith.constant 0 : index
    %c0_287 = arith.constant 0 : index
    %250 = vector.load %arg4[%c0_286, %c0_287] : memref<384x128xbf16, #tpu.memory_space<vmem>>, vector<384x128xbf16>
    %cst_288 = arith.constant dense<0.000000e+00> : vector<3x128xf32>
    %251 = tpu.matmul %249, %250, %cst_288 {dimension_numbers = #tpu.dot_dimension_numbers<[1], [0], [0], [1], [0, 0, 1, 1], [], []>} : vector<3x384xbf16>, vector<384x128xbf16>, vector<3x128xf32> -> vector<3x128xf32>
    %c0_289 = arith.constant 0 : index
    %c0_290 = arith.constant 0 : index
    %252 = vector.load %arg5[%c0_289, %c0_290] : memref<1x128xf32, #tpu.memory_space<vmem>>, vector<1x128xf32>
    %253 = vector.broadcast %252 : vector<1x128xf32> to vector<3x128xf32>
    %254 = arith.addf %251, %253 : vector<3x128xf32>
    %cst_291 = arith.constant 0.000000e+00 : f32
    %255 = vector.broadcast %cst_291 : f32 to vector<3x128xf32>
    %256 = arith.maximumf %254, %255 : vector<3x128xf32>
    %c0_292 = arith.constant 0 : index
    %c0_293 = arith.constant 0 : index
    %257 = vector.load %arg9[%c0_292, %c0_293] : memref<16x128xf32, #tpu.memory_space<vmem>>, vector<1x128xf32>
    tpu.vector_store %arg9[%c0_292, %c0_293], %0 {strides = array<i32>} : memref<16x128xf32, #tpu.memory_space<vmem>>, vector<1x128xf32>,
    %c1_294 = arith.constant 1 : index
    %c0_295 = arith.constant 0 : index
    %258 = vector.load %arg9[%c1_294, %c0_295] : memref<16x128xf32, #tpu.memory_space<vmem>>, vector<3x128xf32>
    tpu.vector_store %arg9[%c1_294, %c0_295], %256 {strides = array<i32>} : memref<16x128xf32, #tpu.memory_space<vmem>>, vector<3x128xf32>,
    %c4_296 = arith.constant 4 : index
    %c0_297 = arith.constant 0 : index
    %259 = vector.load %arg9[%c4_296, %c0_297] : memref<16x128xf32, #tpu.memory_space<vmem>>, vector<1x128xf32>
    tpu.vector_store %arg9[%c4_296, %c0_297], %0 {strides = array<i32>} : memref<16x128xf32, #tpu.memory_space<vmem>>, vector<1x128xf32>,
    %c0_298 = arith.constant 0 : index
    %c0_299 = arith.constant 0 : index
    %260 = vector.load %arg9[%c0_298, %c0_299] : memref<16x128xf32, #tpu.memory_space<vmem>>, vector<3x128xf32>
    %c1_300 = arith.constant 1 : index
    %c0_301 = arith.constant 0 : index
    %261 = vector.load %arg9[%c1_300, %c0_301] : memref<16x128xf32, #tpu.memory_space<vmem>>, vector<3x128xf32>
    %c2_302 = arith.constant 2 : index
    %c0_303 = arith.constant 0 : index
    %262 = vector.load %arg9[%c2_302, %c0_303] : memref<16x128xf32, #tpu.memory_space<vmem>>, vector<3x128xf32>
    %263 = tpu.concatenate %260, %261, %262 in 1 : vector<3x128xf32>, vector<3x128xf32>, vector<3x128xf32> -> vector<3x384xf32>
    %264 = arith.truncf %263 : vector<3x384xf32> to vector<3x384xbf16>
    %c0_304 = arith.constant 0 : index
    %c0_305 = arith.constant 0 : index
    %265 = vector.load %arg4[%c0_304, %c0_305] : memref<384x128xbf16, #tpu.memory_space<vmem>>, vector<384x128xbf16>
    %cst_306 = arith.constant dense<0.000000e+00> : vector<3x128xf32>
    %266 = tpu.matmul %264, %265, %cst_306 {dimension_numbers = #tpu.dot_dimension_numbers<[1], [0], [0], [1], [0, 0, 1, 1], [], []>} : vector<3x384xbf16>, vector<384x128xbf16>, vector<3x128xf32> -> vector<3x128xf32>
    %c0_307 = arith.constant 0 : index
    %c0_308 = arith.constant 0 : index
    %267 = vector.load %arg5[%c0_307, %c0_308] : memref<1x128xf32, #tpu.memory_space<vmem>>, vector<1x128xf32>
    %268 = vector.broadcast %267 : vector<1x128xf32> to vector<3x128xf32>
    %269 = arith.addf %266, %268 : vector<3x128xf32>
    %270 = arith.addf %269, %239 : vector<3x128xf32>
    %c0_309 = arith.constant 0 : index
    %c0_310 = arith.constant 0 : index
    %271 = vector.load %arg9[%c0_309, %c0_310] : memref<16x128xf32, #tpu.memory_space<vmem>>, vector<3x128xf32>
    tpu.vector_store %arg9[%c0_309, %c0_310], %270 {strides = array<i32>} : memref<16x128xf32, #tpu.memory_space<vmem>>, vector<3x128xf32>,
    %c3_311 = arith.constant 3 : index
    %c0_312 = arith.constant 0 : index
    %272 = vector.load %arg9[%c3_311, %c0_312] : memref<16x128xf32, #tpu.memory_space<vmem>>, vector<1x128xf32>
    tpu.vector_store %arg9[%c3_311, %c0_312], %0 {strides = array<i32>} : memref<16x128xf32, #tpu.memory_space<vmem>>, vector<1x128xf32>,
    %c0_313 = arith.constant 0 : index
    %c0_314 = arith.constant 0 : index
    %273 = tpu.strided_load %arg9[%c0_313, %c0_314] {strides = array<i32: 2, 1>} : memref<16x128xf32, #tpu.memory_space<vmem>>, vector<1x128xf32>
    %c1_315 = arith.constant 1 : index
    %c0_316 = arith.constant 0 : index
    %274 = tpu.strided_load %arg9[%c1_315, %c0_316] {strides = array<i32: 2, 1>} : memref<16x128xf32, #tpu.memory_space<vmem>>, vector<1x128xf32>
    %275 = arith.maximumf %273, %274 : vector<1x128xf32>
    %c2_317 = arith.constant 2 : index
    %c0_318 = arith.constant 0 : index
    %276 = tpu.strided_load %arg9[%c2_317, %c0_318] {strides = array<i32: 2, 1>} : memref<16x128xf32, #tpu.memory_space<vmem>>, vector<1x128xf32>
    %277 = arith.maximumf %275, %276 : vector<1x128xf32>
    %cst_319 = arith.constant 0.000000e+00 : f32
    %278 = vector.broadcast %cst_319 : f32 to vector<1x128xf32>
    %279 = arith.maximumf %277, %278 : vector<1x128xf32>
    %c0_320 = arith.constant 0 : index
    %c0_321 = arith.constant 0 : index
    %280 = vector.load %arg9[%c0_320, %c0_321] : memref<16x128xf32, #tpu.memory_space<vmem>>, vector<1x128xf32>
    tpu.vector_store %arg9[%c0_320, %c0_321], %0 {strides = array<i32>} : memref<16x128xf32, #tpu.memory_space<vmem>>, vector<1x128xf32>,
    %c1_322 = arith.constant 1 : index
    %c0_323 = arith.constant 0 : index
    %281 = vector.load %arg9[%c1_322, %c0_323] : memref<16x128xf32, #tpu.memory_space<vmem>>, vector<1x128xf32>
    tpu.vector_store %arg9[%c1_322, %c0_323], %279 {strides = array<i32>} : memref<16x128xf32, #tpu.memory_space<vmem>>, vector<1x128xf32>,
    %c2_324 = arith.constant 2 : index
    %c0_325 = arith.constant 0 : index
    %282 = vector.load %arg9[%c2_324, %c0_325] : memref<16x128xf32, #tpu.memory_space<vmem>>, vector<1x128xf32>
    tpu.vector_store %arg9[%c2_324, %c0_325], %0 {strides = array<i32>} : memref<16x128xf32, #tpu.memory_space<vmem>>, vector<1x128xf32>,
    %c0_326 = arith.constant 0 : index
    %c0_327 = arith.constant 0 : index
    %283 = vector.load %arg9[%c0_326, %c0_327] : memref<16x128xf32, #tpu.memory_space<vmem>>, vector<1x128xf32>
    %c1_328 = arith.constant 1 : index
    %c0_329 = arith.constant 0 : index
    %284 = vector.load %arg9[%c1_328, %c0_329] : memref<16x128xf32, #tpu.memory_space<vmem>>, vector<1x128xf32>
    %c2_330 = arith.constant 2 : index
    %c0_331 = arith.constant 0 : index
    %285 = vector.load %arg9[%c2_330, %c0_331] : memref<16x128xf32, #tpu.memory_space<vmem>>, vector<1x128xf32>
    %286 = tpu.concatenate %283, %284, %285 in 1 : vector<1x128xf32>, vector<1x128xf32>, vector<1x128xf32> -> vector<1x384xf32>
    %287 = arith.truncf %286 : vector<1x384xf32> to vector<1x384xbf16>
    %c0_332 = arith.constant 0 : index
    %c0_333 = arith.constant 0 : index
    %288 = vector.load %arg4[%c0_332, %c0_333] : memref<384x128xbf16, #tpu.memory_space<vmem>>, vector<384x128xbf16>
    %cst_334 = arith.constant dense<0.000000e+00> : vector<1x128xf32>
    %289 = tpu.matmul %287, %288, %cst_334 {dimension_numbers = #tpu.dot_dimension_numbers<[1], [0], [0], [1], [0, 0, 1, 1], [], []>} : vector<1x384xbf16>, vector<384x128xbf16>, vector<1x128xf32> -> vector<1x128xf32>
    %c0_335 = arith.constant 0 : index
    %c0_336 = arith.constant 0 : index
    %290 = vector.load %arg5[%c0_335, %c0_336] : memref<1x128xf32, #tpu.memory_space<vmem>>, vector<1x128xf32>
    %291 = arith.addf %289, %290 : vector<1x128xf32>
    %cst_337 = arith.constant 0.000000e+00 : f32
    %292 = vector.broadcast %cst_337 : f32 to vector<1x128xf32>
    %293 = arith.maximumf %291, %292 : vector<1x128xf32>
    %c0_338 = arith.constant 0 : index
    %c0_339 = arith.constant 0 : index
    %294 = vector.load %arg9[%c0_338, %c0_339] : memref<16x128xf32, #tpu.memory_space<vmem>>, vector<1x128xf32>
    tpu.vector_store %arg9[%c0_338, %c0_339], %0 {strides = array<i32>} : memref<16x128xf32, #tpu.memory_space<vmem>>, vector<1x128xf32>,
    %c1_340 = arith.constant 1 : index
    %c0_341 = arith.constant 0 : index
    %295 = vector.load %arg9[%c1_340, %c0_341] : memref<16x128xf32, #tpu.memory_space<vmem>>, vector<1x128xf32>
    tpu.vector_store %arg9[%c1_340, %c0_341], %293 {strides = array<i32>} : memref<16x128xf32, #tpu.memory_space<vmem>>, vector<1x128xf32>,
    %c2_342 = arith.constant 2 : index
    %c0_343 = arith.constant 0 : index
    %296 = vector.load %arg9[%c2_342, %c0_343] : memref<16x128xf32, #tpu.memory_space<vmem>>, vector<1x128xf32>
    tpu.vector_store %arg9[%c2_342, %c0_343], %0 {strides = array<i32>} : memref<16x128xf32, #tpu.memory_space<vmem>>, vector<1x128xf32>,
    %c0_344 = arith.constant 0 : index
    %c0_345 = arith.constant 0 : index
    %297 = vector.load %arg9[%c0_344, %c0_345] : memref<16x128xf32, #tpu.memory_space<vmem>>, vector<1x128xf32>
    %c1_346 = arith.constant 1 : index
    %c0_347 = arith.constant 0 : index
    %298 = vector.load %arg9[%c1_346, %c0_347] : memref<16x128xf32, #tpu.memory_space<vmem>>, vector<1x128xf32>
    %c2_348 = arith.constant 2 : index
    %c0_349 = arith.constant 0 : index
    %299 = vector.load %arg9[%c2_348, %c0_349] : memref<16x128xf32, #tpu.memory_space<vmem>>, vector<1x128xf32>
    %300 = tpu.concatenate %297, %298, %299 in 1 : vector<1x128xf32>, vector<1x128xf32>, vector<1x128xf32> -> vector<1x384xf32>
    %301 = arith.truncf %300 : vector<1x384xf32> to vector<1x384xbf16>
    %c0_350 = arith.constant 0 : index
    %c0_351 = arith.constant 0 : index
    %302 = vector.load %arg4[%c0_350, %c0_351] : memref<384x128xbf16, #tpu.memory_space<vmem>>, vector<384x128xbf16>
    %cst_352 = arith.constant dense<0.000000e+00> : vector<1x128xf32>
    %303 = tpu.matmul %301, %302, %cst_352 {dimension_numbers = #tpu.dot_dimension_numbers<[1], [0], [0], [1], [0, 0, 1, 1], [], []>} : vector<1x384xbf16>, vector<384x128xbf16>, vector<1x128xf32> -> vector<1x128xf32>
    %c0_353 = arith.constant 0 : index
    %c0_354 = arith.constant 0 : index
    %304 = vector.load %arg5[%c0_353, %c0_354] : memref<1x128xf32, #tpu.memory_space<vmem>>, vector<1x128xf32>
    %305 = arith.addf %303, %304 : vector<1x128xf32>
    %306 = arith.addf %305, %277 : vector<1x128xf32>
    %307 = tpu.concatenate %153, %306 in 0 : vector<1x128xf32>, vector<1x128xf32> -> vector<2x128xf32>
    %308 = arith.truncf %307 : vector<2x128xf32> to vector<2x128xbf16>
    %c0_355 = arith.constant 0 : index
    %c0_356 = arith.constant 0 : index
    %309 = vector.load %arg6[%c0_355, %c0_356] : memref<128x128xbf16, #tpu.memory_space<vmem>>, vector<128x128xbf16>
    %cst_357 = arith.constant dense<0.000000e+00> : vector<2x128xf32>
    %310 = tpu.matmul %308, %309, %cst_357 {dimension_numbers = #tpu.dot_dimension_numbers<[1], [0], [0], [1], [0, 0, 1, 1], [], []>} : vector<2x128xbf16>, vector<128x128xbf16>, vector<2x128xf32> -> vector<2x128xf32>
    %c0_358 = arith.constant 0 : index
    %c0_359 = arith.constant 0 : index
    %311 = vector.load %arg7[%c0_358, %c0_359] : memref<1x128xf32, #tpu.memory_space<vmem>>, vector<1x128xf32>
    %312 = vector.broadcast %311 : vector<1x128xf32> to vector<2x128xf32>
    %313 = arith.addf %310, %312 : vector<2x128xf32>
    %c0_360 = arith.constant 0 : index
    %c0_361 = arith.constant 0 : index
    %314 = vector.load %arg8[%c0_360, %c0_361] : memref<2x128xf32, #tpu.memory_space<vmem>>, vector<2x128xf32>
    tpu.vector_store %arg8[%c0_360, %c0_361], %313 {strides = array<i32>} : memref<2x128xf32, #tpu.memory_space<vmem>>, vector<2x128xf32>,
    return
  }
  func.func @transform_0(%arg0: i32) -> (i32, i32, i32) {
    %c0_i32 = arith.constant 0 : i32
    %c0_i32_0 = arith.constant 0 : i32
    %c0_i32_1 = arith.constant 0 : i32
    return %arg0, %c0_i32, %c0_i32_0 : i32, i32, i32
  }
  func.func @transform_1(%arg0: i32) -> (i32, i32) {
    %c0_i32 = arith.constant 0 : i32
    %c0_i32_0 = arith.constant 0 : i32
    %c0_i32_1 = arith.constant 0 : i32
    return %c0_i32, %c0_i32_0 : i32, i32
  }
  func.func @transform_2(%arg0: i32) -> (i32, i32) {
    %c0_i32 = arith.constant 0 : i32
    %c0_i32_0 = arith.constant 0 : i32
    %c0_i32_1 = arith.constant 0 : i32
    return %c0_i32, %c0_i32_0 : i32, i32
  }
  func.func @transform_3(%arg0: i32) -> (i32, i32) {
    %c0_i32 = arith.constant 0 : i32
    %c0_i32_0 = arith.constant 0 : i32
    %c0_i32_1 = arith.constant 0 : i32
    return %c0_i32, %c0_i32_0 : i32, i32
  }
  func.func @transform_4(%arg0: i32) -> (i32, i32) {
    %c0_i32 = arith.constant 0 : i32
    %c0_i32_0 = arith.constant 0 : i32
    %c0_i32_1 = arith.constant 0 : i32
    return %c0_i32, %c0_i32_0 : i32, i32
  }
  func.func @transform_5(%arg0: i32) -> (i32, i32) {
    %c0_i32 = arith.constant 0 : i32
    %c0_i32_0 = arith.constant 0 : i32
    %c0_i32_1 = arith.constant 0 : i32
    return %c0_i32, %c0_i32_0 : i32, i32
  }
  func.func @transform_6(%arg0: i32) -> (i32, i32) {
    %c0_i32 = arith.constant 0 : i32
    %c0_i32_0 = arith.constant 0 : i32
    %c0_i32_1 = arith.constant 0 : i32
    return %c0_i32, %c0_i32_0 : i32, i32
  }
  func.func @transform_7(%arg0: i32) -> (i32, i32) {
    %c0_i32 = arith.constant 0 : i32
    %c0_i32_0 = arith.constant 0 : i32
    return %arg0, %c0_i32 : i32, i32
  }
}

</mosaic_0001>

<bundles_post_ra>
// kernel: dpcnn_forward.1
= control target key start
LH: loop header
LB: loop body
LE: loop exit
PB: predicated region body
PF: predicated region fallthrough
CT: control target
= control target key end

     0   :  { %v6836_v3 = vmov 0.0   ;;  %vm6837_vm0 = vmmov 0   ;;  %s6838_s30 = smov 32   ;;  %s6839_s14 = smov 64   ;;  %vm47_vm1 = vcmask 261120   ;;  %vm50_vm2 = vcmask 523264   ;;  %s8429_s0 = inlined_call_operand.vmem [shape: bf16[2,16,32], index: 0, kind: input, shape index: {}]   ;;  %s8430_s1 = inlined_call_operand.vmem [shape: bf16[96,128], index: 1, kind: input, shape index: {}]   ;;  %s8431_s2 = inlined_call_operand.vmem [shape: f32[1,128], index: 2, kind: input, shape index: {}]   ;;  %s8432_s3 = inlined_call_operand.vmem [shape: bf16[384,128], index: 3, kind: input, shape index: {}]   ;;  %s8433_s4 = inlined_call_operand.vmem [shape: f32[1,128], index: 4, kind: input, shape index: {}]   ;;  %s8434_s5 = inlined_call_operand.vmem [shape: bf16[128,128], index: 5, kind: input, shape index: {}]   ;;  %s8435_s6 = inlined_call_operand.vmem [shape: f32[1,128], index: 6, kind: input, shape index: {}]   ;;  %s8436_s7 = inlined_call_operand.hbm [shape: f32[2,128], index: 7, kind: output, shape index: {}]  }
   0x1   :  { %v6408_v0 = vld [vmem:[%s8429_s0] sm:$0xff]   ;;  %6031 = vmatprep.subr.bf16.mxu1 %v6836_v3  ;;  %154 = vst [vmem:[#allocation2] sm:$0x1] %v6836_v3  ;;  %157 = vst [vmem:[#allocation2 + $0xf] sm:$0x1] %v6836_v3  ;;  %v6409_v4 = vld [vmem:[%s8430_s1 + $0x28] sm:$0xff]   ;;  %6047 = vmatprep.subr.bf16.mxu0 %v6836_v3 }
   0x2   :  { %v36_v1 = vshrl.u32 %v6408_v0, 16  ;;  %v38_v2 = vshll.u32 %v6408_v0, 16  ;;  %6032 = vmatpush3.bf16.msra.mxu1 %v6409_v4  ;;  %v6410_v6 = vld [vmem:[%s8430_s1 + $0x20] sm:$0xff]   ;;  %6043 = vmatprep.mubr.msk.bf16.mxu1 %vm6837_vm0, %v6836_v3  ;;  %v44_v8 = vrot.slane %v6408_v0, 1  ;;  %v6411_v9 = vld [vmem:[%s8430_s1 + $0x18] sm:$0xff]   ;;  %v6412_v11 = vld [vmem:[%s8430_s1 + $0x10] sm:$0xff]  }
   0x3   :  { %6033 = vmatprep.subr.bf16.mxu1 %v6836_v3  ;;  %6063 = vmatprep.mubr.msk.bf16.mxu0 %vm6837_vm0, %v6836_v3  ;;  %v6416_v10 = vld [vmem:[%s8432_s3 + $0xb8] sm:$0xff]   ;;  %v6419_v12 = vld [vmem:[%s8432_s3 + $0xb0] sm:$0xff]   ;;  %v6422_v13 = vld [vmem:[%s8432_s3 + $0xa8] sm:$0xff]   ;;  %vm108_vm3 = vcmask 785408  }
   0x4   :  { %v40_v5 = vrot.slane %v38_v2, 1  ;;  %6048 = vmatpush3.bf16.msra.mxu0 %v6416_v10  ;;  %v6413_v14 = vld [vmem:[%s8430_s1 + $0x8] sm:$0xff]   ;;  %v6414_v15 = vld [vmem:[%s8430_s1] sm:$0xff]   ;;  %v6415_v16 = vld [vmem:[%s8432_s3 + $0x78] sm:$0xff]  }
   0x5   :  { %6049 = vmatprep.subr.bf16.mxu0 %v6836_v3  ;;  %v6417_v18 = vld [vmem:[%s8432_s3 + $0x38] sm:$0xff]   ;;  %v6418_v19 = vld [vmem:[%s8432_s3 + $0x70] sm:$0xff]   ;;  %v6421_v24 = vld [vmem:[%s8432_s3 + $0x68] sm:$0xff]  }
   0x6   :  { %v41_v7 = vor.u32 %v40_v5, %v36_v1  ;;  %6034 = vmatpush3.bf16.msra.mxu1 %v6410_v6  ;;  %v6420_v23 = vld [vmem:[%s8432_s3 + $0x30] sm:$0xff]   ;;  %v6423_v25 = vld [vmem:[%s8432_s3 + $0x28] sm:$0xff]   ;;  %v6424_v26 = vld [vmem:[%s8432_s3 + $0x60] sm:$0xff]  }
   0x7   :  { %6035 = vmatprep.subr.bf16.mxu1 %v6836_v3  ;;  %v6425_v27 = vld [vmem:[%s8432_s3 + $0xa0] sm:$0xff]   ;;  %v6427_v29 = vld [vmem:[%s8432_s3 + $0x58] sm:$0xff]   ;;  %v6430_v32 = vld [vmem:[%s8432_s3 + $0x50] sm:$0xff]  }
   0x8   :  { %42 = vrot.lane.b32.xlu0 %v41_v7, %s6838_s30  ;;  %6050 = vmatpush3.bf16.msra.mxu0 %v6419_v12  ;;  %v6426_v28 = vld [vmem:[%s8432_s3 + $0x20] sm:$0xff]   ;;  %v6428_v30 = vld [vmem:[%s8432_s3 + $0x98] sm:$0xff]   ;;  %v6431_v33 = vld [vmem:[%s8432_s3 + $0x90] sm:$0xff]  }
   0x9   :  { %6051 = vmatprep.subr.bf16.mxu0 %v6836_v3  ;;  %v6429_v31 = vld [vmem:[%s8432_s3 + $0x18] sm:$0xff]   ;;  %v6432_v34 = vld [vmem:[%s8432_s3 + $0x10] sm:$0xff]   ;;  %v6433_v35 = vld [vmem:[%s8432_s3 + $0x48] sm:$0xff]  }
   0xa   :  { %6036 = vmatpush3.bf16.msra.mxu1 %v6411_v9  ;;  %v6434_v36 = vld [vmem:[%s8432_s3 + $0x88] sm:$0xff]   ;;  %v6436_v38 = vld [vmem:[%s8432_s3 + $0x40] sm:$0xff]   ;;  %v6439_v41 = vld [vmem:[%s8432_s3 + $0x78] sm:$0xff]  }
   0xb   :  { %6037 = vmatprep.subr.bf16.mxu1 %v6836_v3  ;;  %v6435_v37 = vld [vmem:[%s8432_s3 + $0x8] sm:$0xff]   ;;  %v6437_v39 = vld [vmem:[%s8432_s3 + $0x80] sm:$0xff]  }
   0xc   :  { %45 = vrot.lane.b32.xlu0 %v44_v8, %s6839_s14  ;;  %6052 = vmatpush3.bf16.msra.mxu0 %v6422_v13  ;;  %v6438_v40 = vld [vmem:[%s8432_s3] sm:$0xff]  }
   0xd   :  { %6053 = vmatprep.subr.bf16.mxu0 %v6836_v3 }
   0xe   :  { %6038 = vmatpush3.bf16.msra.mxu1 %v6412_v11 }
   0xf   :  { %6039 = vmatprep.subr.bf16.mxu1 %v6836_v3 }
  0x10   :  { %6054 = vmatpush3.bf16.msra.mxu0 %v6425_v27 }
  0x11   :  { %6055 = vmatprep.subr.bf16.mxu0 %v6836_v3 }
  0x12   :  { %6040 = vmatpush3.bf16.msra.mxu1 %v6413_v14 }
  0x13   :  { %6041 = vmatprep.subr.bf16.mxu1 %v6836_v3 }
  0x14   :  { %6056 = vmatpush3.bf16.msra.mxu0 %v6428_v30 }
  0x15   :  { %6057 = vmatprep.subr.bf16.mxu0 %v6836_v3 }
  0x16   :  { %6042 = vmatpush3.bf16.msra.mxu1 %v6414_v15 }
  0x17   :  { %5519 = vmatprep.subr.bf16.mxu1 %v6415_v16 }
  0x18   :  { %6058 = vmatpush3.bf16.msra.mxu0 %v6431_v33 }
  0x19   :  { %6059 = vmatprep.subr.bf16.mxu0 %v6836_v3 }
  0x1c   :  { %6060 = vmatpush3.bf16.msra.mxu0 %v6434_v36 }
  0x1d   :  { %6061 = vmatprep.subr.bf16.mxu0 %v6836_v3 }
  0x20   :  { %6062 = vmatpush3.bf16.msra.mxu0 %v6437_v39 }
  0x21   :  { %6067 = vmatprep.subr.bf16.mxu0 %v6836_v3 }
  0x7a   :  { %v43_v17 = vpop.permute.xlu0 %42 }
  0x7b   :  { %v49_v20 = vsel %vm47_vm1, %v6408_v0, %v43_v17 }
  0x7e   :  { %v46_v21 = vpop.permute.xlu0 %45 }
  0x7f   :  { %v52_v22 = vsel %vm50_vm2, %v49_v20, %v46_v21 }
  0x80   :  { %6044 = vmatmul.mubr.msk.bf16.vlgmr.msra.gmra.mxu1 %vm108_vm3, %v52_v22 }
  0x81   :  { %5520 = vmatpush3.bf16.msra.mxu1 %v6417_v18 }
  0x82   :  { %5521 = vmatprep.subr.bf16.mxu1 %v6418_v19 }
  0x85   :  { %5522 = vmatpush3.bf16.msra.mxu1 %v6420_v23 }
  0x86   :  { %5523 = vmatprep.subr.bf16.mxu1 %v6421_v24 }
  0x89   :  { %5524 = vmatpush3.bf16.msra.mxu1 %v6423_v25 }
  0x8a   :  { %5525 = vmatprep.subr.bf16.mxu1 %v6424_v26 }
  0x8d   :  { %5526 = vmatpush3.bf16.msra.mxu1 %v6426_v28 }
  0x8e   :  { %5527 = vmatprep.subr.bf16.mxu1 %v6427_v29 }
  0x91   :  { %5528 = vmatpush3.bf16.msra.mxu1 %v6429_v31 }
  0x92   :  { %5529 = vmatprep.subr.bf16.mxu1 %v6430_v32 }
  0x95   :  { %5530 = vmatpush3.bf16.msra.mxu1 %v6432_v34 }
  0x96   :  { %5531 = vmatprep.subr.bf16.mxu1 %v6433_v35 }
  0x99   :  { %5532 = vmatpush3.bf16.msra.mxu1 %v6435_v37 }
  0x9a   :  { %5533 = vmatprep.subr.bf16.mxu1 %v6436_v38 }
  0x9d   :  { %5534 = vmatpush3.bf16.msra.mxu1 %v6438_v40 }
  0x9e   :  { %5550 = vmatprep.subr.bf16.mxu1 %v6439_v41 }
  0x9f   :  { %12 = vsyncpa [#allocation4], 0  ;;  %v5088_v42 = vld [vmem:[%s8431_s2] ss:$0 sm:$0xff]  ;;  %v6440_v52 = vld [vmem:[%s8432_s3 + $0xb8] sm:$0xff]   ;;  %vm4958_vm4 = vcmask 1040384  }
  0xa0   :  { %v6441_v60 = vld [vmem:[%s8432_s3 + $0x38] sm:$0xff]   ;;  %v6442_v61 = vld [vmem:[%s8432_s3 + $0x70] sm:$0xff]   ;;  %v6445_v0 = vld [vmem:[%s8432_s3 + $0x68] sm:$0xff]   ;;  %s6840_s11 = smov [#allocation3]  }
  0xa1   :  { %v6443_v62 = vld [vmem:[%s8432_s3 + $0xb0] sm:$0xff]   ;;  %v6446_v1 = vld [vmem:[%s8432_s3 + $0xa8] sm:$0xff]   ;;  %v6448_v4 = vld [vmem:[%s8432_s3 + $0x60] sm:$0xff]   ;;  %s5079_s12 = sshll.u32 %s6840_s11, 4  ;;  %s5080_s12 = int_to_ptr.vmem [resolvable:$true] %s5079_s12 }
  0xa2   :  { %v6444_v63 = vld [vmem:[%s8432_s3 + $0x30] sm:$0xff]   ;;  %v6447_v2 = vld [vmem:[%s8432_s3 + $0x28] sm:$0xff]   ;;  %v6449_v5 = vld [vmem:[%s8432_s3 + $0xa0] sm:$0xff]   ;;  %s6814_s13 = scalar_lea.vmem %s5080_s12, 32  ;;  %p6819_p1 = scmp.lt.s32.totalorder %s5080_s12, %s5080_s12 }
  0xa3   :  { %v6450_v6 = vld [vmem:[%s8432_s3 + $0x20] sm:$0xff]   ;;  %v6451_v7 = vld [vmem:[%s8432_s3 + $0x58] sm:$0xff]   ;;  %v6454_v10 = vld [vmem:[%s8432_s3 + $0x50] sm:$0xff]   ;;  %p6815_p0 = scmp.ne.s32.totalorder %s5080_s12, %s6814_s13  ;;  %p6820_p2 = scmp.lt.s32.totalorder %s6814_s13, %s6814_s13 }
  0xa4   :  { %v6452_v8 = vld [vmem:[%s8432_s3 + $0x98] sm:$0xff]   ;;  %v6455_v11 = vld [vmem:[%s8432_s3 + $0x90] sm:$0xff]   ;;  %v6457_v13 = vld [vmem:[%s8432_s3 + $0x48] sm:$0xff]  }
  0xa5   :  { %v6453_v9 = vld [vmem:[%s8432_s3 + $0x18] sm:$0xff]   ;;  %v6456_v12 = vld [vmem:[%s8432_s3 + $0x10] sm:$0xff]   ;;  %v6458_v14 = vld [vmem:[%s8432_s3 + $0x88] sm:$0xff]   ;;  %p6821_p3 = por %p6820_p2, %p6819_p1 }
  0xa6   :  { %v6459_v15 = vld [vmem:[%s8432_s3 + $0x8] sm:$0xff]   ;;  %v6460_v16 = vld [vmem:[%s8432_s3 + $0x40] sm:$0xff]  }
  0xa7   :  { %v6461_v17 = vld [vmem:[%s8432_s3 + $0x80] sm:$0xff]   ;;  %p6822_p4 = pnand %p6821_p3, %p6815_p0 }
  0xa8   :  { %v6462_v18 = vld [vmem:[%s8432_s3] sm:$0xff]  }
  0xa9   :  { %v7090_v22 = vld [vmem:[%s8433_s4] ss:$0 sm:$0xff] }
 0x140   :  { %v145_v43 = vpop.f32.mrf.mxu1 }
 0x141   :  { %v146_v44 = vadd.f32 %v5088_v42, %v145_v43 }
 0x142   :  { %v6045_v45 = vpop.f32.mrf.mxu1 }
 0x143   :  { %v152_v46 = vmax.f32 %v146_v44, 0.0  ;;  %v6463_v44 = vld [vmem:[%s8432_s3 + $0x78] sm:$0xff]  }
 0x144   :  { %v148_v47 = vpop.f32.mrf.mxu1  ;;  %v6464_v45 = vld [vmem:[%s8432_s3 + $0xb8] sm:$0xff]  }
 0x145   :  { %155 = vst [vmem:[#allocation2 + $0x1] sm:$0xff] %v152_v46  ;;  %v149_v48 = vadd.f32 %v5088_v42, %v148_v47  ;;  %v6466_v47 = vld [vmem:[%s8432_s3 + $0x70] sm:$0xff]  }
 0x146   :  { %v6046_v49 = vpop.f32.mrf.mxu1 }
 0x147   :  { %v153_v50 = vmax.f32 %v149_v48, 0.0  ;;  %v6467_v48 = vld [vmem:[%s8432_s3 + $0xb0] sm:$0xff]  }
 0x148   :  { %v6468_v49 = vld [vmem:[%s8432_s3 + $0x30] sm:$0xff]  }
 0x149   :  { %156 = vst [vmem:[#allocation2 + $0x9] sm:$0x3f] %v153_v50  ;;  %v6469_v50 = vld [vmem:[%s8432_s3 + $0x68] sm:$0xff]  }
 0x14c   :  { %v158_v51 = vld [vmem:[#allocation2] sm:$0xff] }
 0x14d   :  { %450 = vst [vmem:[#allocation2] sm:$0x1] %v6836_v3 }
 0x150   :  { %v159_v53 = vld [vmem:[#allocation2 + $0x8] sm:$0x3f] }
 0x151   :  { %v162_v54 = vld [vmem:[#allocation2 + $0x2] sm:$0xff]  ;;  %v163_v55 = vld [vmem:[#allocation2 + $0xa] sm:$0x3f]  ;;  %v164_v58 = vpack.c.bf16 %v159_v53, %v158_v51 }
 0x152   :  { %453 = vst [vmem:[#allocation2 + $0xf] sm:$0x1] %v6836_v3  ;;  %v161_v56 = vld [vmem:[#allocation2 + $0x9] sm:$0x3f]  ;;  %v166_v57 = vpack.c.bf16 %v163_v55, %v162_v54  ;;  %v6472_v53 = vld [vmem:[%s8432_s3 + $0x60] sm:$0xff]  }
 0x153   :  { %v165_v59 = vpack.c.bf16 %v161_v56, %v152_v46  ;;  %v6465_v46 = vld [vmem:[%s8432_s3 + $0x38] sm:$0xff]   ;;  %v6470_v51 = vld [vmem:[%s8432_s3 + $0xa8] sm:$0xff]   ;;  %v6473_v54 = vld [vmem:[%s8432_s3 + $0xa0] sm:$0xff]  }
 0x154   :  { %6064 = vmatmul.mubr.bf16.vlgmr.msra.gmra.mxu0 %v166_v57  ;;  %v6474_v55 = vld [vmem:[%s8432_s3 + $0x20] sm:$0xff]   ;;  %v6475_v56 = vld [vmem:[%s8432_s3 + $0x58] sm:$0xff]  }
 0x155   :  { %398 = vmatprep.mubr.bf16.mxu1 %v165_v59  ;;  %6068 = vmatpush3.bf16.msra.mxu0 %v6440_v52  ;;  %v6471_v52 = vld [vmem:[%s8432_s3 + $0x28] sm:$0xff]   ;;  %v6476_v57 = vld [vmem:[%s8432_s3 + $0x98] sm:$0xff]   ;;  %v6478_v59 = vld [vmem:[%s8432_s3 + $0x50] sm:$0xff]  }
 0x156   :  { %399 = vmatmul.mubr.bf16.vlgmr.msra.gmra.mxu1 %v164_v58  ;;  %6069 = vmatprep.subr.bf16.mxu0 %v6836_v3  ;;  %v6477_v58 = vld [vmem:[%s8432_s3 + $0x18] sm:$0xff]  }
 0x157   :  { %5551 = vmatpush3.bf16.msra.mxu1 %v6441_v60  ;;  %6083 = vmatprep.mubr.msk.bf16.mxu0 %vm6837_vm0, %v6836_v3  ;;  %v6479_v60 = vld [vmem:[%s8432_s3 + $0x90] sm:$0xff]  }
 0x158   :  { %5552 = vmatprep.subr.bf16.mxu1 %v6442_v61  ;;  %v6480_v61 = vld [vmem:[%s8432_s3 + $0x10] sm:$0xff]  }
 0x159   :  { %6070 = vmatpush3.bf16.msra.mxu0 %v6443_v62  ;;  %v6481_v62 = vld [vmem:[%s8432_s3 + $0x48] sm:$0xff]  }
 0x15a   :  { %6071 = vmatprep.subr.bf16.mxu0 %v6836_v3 }
 0x15b   :  { %5553 = vmatpush3.bf16.msra.mxu1 %v6444_v63  ;;  %v6482_v63 = vld [vmem:[%s8432_s3 + $0x88] sm:$0xff]  }
 0x15c   :  { %5554 = vmatprep.subr.bf16.mxu1 %v6445_v0  ;;  %v6483_v0 = vld [vmem:[%s8432_s3 + $0x8] sm:$0xff]  }
 0x15d   :  { %6072 = vmatpush3.bf16.msra.mxu0 %v6446_v1  ;;  %v6484_v1 = vld [vmem:[%s8432_s3 + $0x40] sm:$0xff]  }
 0x15e   :  { %6073 = vmatprep.subr.bf16.mxu0 %v6836_v3 }
 0x15f   :  { %5555 = vmatpush3.bf16.msra.mxu1 %v6447_v2  ;;  %v6485_v2 = vld [vmem:[%s8432_s3 + $0x80] sm:$0xff]  }
 0x160   :  { %5556 = vmatprep.subr.bf16.mxu1 %v6448_v4  ;;  %v6486_v4 = vld [vmem:[%s8432_s3] sm:$0xff]  }
 0x161   :  { %6074 = vmatpush3.bf16.msra.mxu0 %v6449_v5  ;;  %v6487_v5 = vld [vmem:[%s8432_s3 + $0x78] sm:$0xff]  }
 0x162   :  { %6075 = vmatprep.subr.bf16.mxu0 %v6836_v3 }
 0x163   :  { %5557 = vmatpush3.bf16.msra.mxu1 %v6450_v6 }
 0x164   :  { %5558 = vmatprep.subr.bf16.mxu1 %v6451_v7 }
 0x165   :  { %6076 = vmatpush3.bf16.msra.mxu0 %v6452_v8 }
 0x166   :  { %6077 = vmatprep.subr.bf16.mxu0 %v6836_v3 }
 0x167   :  { %5559 = vmatpush3.bf16.msra.mxu1 %v6453_v9 }
 0x168   :  { %5560 = vmatprep.subr.bf16.mxu1 %v6454_v10 }
 0x169   :  { %6078 = vmatpush3.bf16.msra.mxu0 %v6455_v11 }
 0x16a   :  { %6079 = vmatprep.subr.bf16.mxu0 %v6836_v3 }
 0x16b   :  { %5561 = vmatpush3.bf16.msra.mxu1 %v6456_v12 }
 0x16c   :  { %5562 = vmatprep.subr.bf16.mxu1 %v6457_v13 }
 0x16d   :  { %6080 = vmatpush3.bf16.msra.mxu0 %v6458_v14 }
 0x16e   :  { %6081 = vmatprep.subr.bf16.mxu0 %v6836_v3 }
 0x16f   :  { %5563 = vmatpush3.bf16.msra.mxu1 %v6459_v15 }
 0x170   :  { %5564 = vmatprep.subr.bf16.mxu1 %v6460_v16 }
 0x171   :  { %6082 = vmatpush3.bf16.msra.mxu0 %v6461_v17 }
 0x172   :  { %6087 = vmatprep.subr.bf16.mxu0 %v6836_v3 }
 0x173   :  { %5565 = vmatpush3.bf16.msra.mxu1 %v6462_v18 }
 0x174   :  { %5581 = vmatprep.subr.bf16.mxu1 %v6463_v44  ;;  %v6499_v44 = vld [vmem:[%s8432_s3 + $0x58] sm:$0xff]  }
 0x214   :  { %v441_v19 = vpop.f32.mrf.mxu0 }
 0x216   :  { %v5535_v20 = vpop.f32.mrf.mxu1  ;;  %v6065_v21 = vpop.f32.mrf.mxu0 }
 0x218   :  { %v5536_v23 = vpop.f32.mrf.mxu1  ;;  %v444_v24 = vpop.f32.mrf.mxu0 }
 0x219   :  { %v5537_v25 = vadd.f32 %v5536_v23, %v5535_v20 }
 0x21a   :  { %v5538_v26 = vpop.f32.mrf.mxu1  ;;  %v6066_v27 = vpop.f32.mrf.mxu0 }
 0x21b   :  { %v401_v28 = vadd.f32 %v5537_v25, %v7090_v22  ;;  %v6488_v27 = vld [vmem:[%s8432_s3 + $0xb8] sm:$0xff]  }
 0x21c   :  { %v5539_v29 = vpop.f32.mrf.mxu1 }
 0x21d   :  { %v442_v30 = vadd.f32 %v441_v19, %v401_v28  ;;  %v5540_v31 = vadd.f32 %v5539_v29, %v5538_v26 }
 0x21f   :  { %v448_v32 = vmax.f32 %v442_v30, 0.0  ;;  %v404_v33 = vadd.f32 %v5540_v31, %v7090_v22 }
 0x221   :  { %451 = vst [vmem:[#allocation2 + $0x1] sm:$0xff] %v448_v32  ;;  %v445_v34 = vadd.f32 %v444_v24, %v404_v33 }
 0x223   :  { %v449_v35 = vmax.f32 %v445_v34, 0.0  ;;  %v6489_v34 = vld [vmem:[%s8432_s3 + $0x38] sm:$0xff]  }
 0x225   :  { %452 = vst [vmem:[#allocation2 + $0x9] sm:$0x3f] %v449_v35  ;;  %v6490_v35 = vld [vmem:[%s8432_s3 + $0x70] sm:$0xff]  }
 0x228   :  { %v454_v41 = vld [vmem:[#allocation2] sm:$0xff] }
 0x22c   :  { %v458_v36 = vld [vmem:[#allocation2 + $0x2] sm:$0xff]  ;;  %v459_v38 = vld [vmem:[#allocation2 + $0xa] sm:$0x3f] }
 0x22d   :  { %v457_v37 = vld [vmem:[#allocation2 + $0x9] sm:$0x3f]  ;;  %v462_v40 = vpack.c.bf16 %v459_v38, %v458_v36  ;;  %2621 = vst [vmem:[#allocation2 + $0xf] sm:$0x1] %v6836_v3  ;;  %v6491_v36 = vld [vmem:[%s8432_s3 + $0xb0] sm:$0xff]  }
 0x22e   :  { %v461_v39 = vpack.c.bf16 %v457_v37, %v448_v32  ;;  %746 = vst [vmem:[#allocation2 + $0xe] sm:$0x1] %v6836_v3  ;;  %v455_v42 = vld [vmem:[#allocation2 + $0x8] sm:$0x3f]  ;;  %v6492_v37 = vld [vmem:[%s8432_s3 + $0x30] sm:$0xff]  }
 0x22f   :  { %v460_v43 = vpack.c.bf16 %v455_v42, %v454_v41  ;;  %6084 = vmatmul.mubr.bf16.vlgmr.msra.gmra.mxu0 %v462_v40  ;;  %v6493_v38 = vld [vmem:[%s8432_s3 + $0x68] sm:$0xff]   ;;  %v6496_v41 = vld [vmem:[%s8432_s3 + $0x60] sm:$0xff]  }
 0x230   :  { %694 = vmatprep.mubr.bf16.mxu1 %v461_v39  ;;  %6103 = vmatprep.mubr.msk.bf16.mxu0 %vm6837_vm0, %v6836_v3  ;;  %v6494_v39 = vld [vmem:[%s8432_s3 + $0xa8] sm:$0xff]   ;;  %v6497_v42 = vld [vmem:[%s8432_s3 + $0xa0] sm:$0xff]  }
 0x231   :  { %695 = vmatmul.mubr.bf16.vlgmr.msra.gmra.mxu1 %v460_v43  ;;  %6088 = vmatpush3.bf16.msra.mxu0 %v6464_v45  ;;  %v6495_v40 = vld [vmem:[%s8432_s3 + $0x28] sm:$0xff]   ;;  %v6498_v43 = vld [vmem:[%s8432_s3 + $0x20] sm:$0xff]   ;;  %v6500_v45 = vld [vmem:[%s8432_s3 + $0x98] sm:$0xff]  }
 0x232   :  { %5582 = vmatpush3.bf16.msra.mxu1 %v6465_v46  ;;  %6089 = vmatprep.subr.bf16.mxu0 %v6836_v3  ;;  %v6501_v46 = vld [vmem:[%s8432_s3 + $0x18] sm:$0xff]  }
 0x233   :  { %5583 = vmatprep.subr.bf16.mxu1 %v6466_v47  ;;  %v6502_v47 = vld [vmem:[%s8432_s3 + $0x50] sm:$0xff]  }
 0x235   :  { %6090 = vmatpush3.bf16.msra.mxu0 %v6467_v48  ;;  %v6503_v48 = vld [vmem:[%s8432_s3 + $0x90] sm:$0xff]  }
 0x236   :  { %5584 = vmatpush3.bf16.msra.mxu1 %v6468_v49  ;;  %6091 = vmatprep.subr.bf16.mxu0 %v6836_v3  ;;  %v6504_v49 = vld [vmem:[%s8432_s3 + $0x10] sm:$0xff]  }
 0x237   :  { %5585 = vmatprep.subr.bf16.mxu1 %v6469_v50  ;;  %v6505_v50 = vld [vmem:[%s8432_s3 + $0x48] sm:$0xff]  }
 0x239   :  { %6092 = vmatpush3.bf16.msra.mxu0 %v6470_v51  ;;  %v6506_v51 = vld [vmem:[%s8432_s3 + $0x88] sm:$0xff]  }
 0x23a   :  { %5586 = vmatpush3.bf16.msra.mxu1 %v6471_v52  ;;  %6093 = vmatprep.subr.bf16.mxu0 %v6836_v3  ;;  %v6507_v52 = vld [vmem:[%s8432_s3 + $0x8] sm:$0xff]  }
 0x23b   :  { %5587 = vmatprep.subr.bf16.mxu1 %v6472_v53  ;;  %v6508_v53 = vld [vmem:[%s8432_s3 + $0x40] sm:$0xff]  }
 0x23d   :  { %6094 = vmatpush3.bf16.msra.mxu0 %v6473_v54  ;;  %v6509_v54 = vld [vmem:[%s8432_s3 + $0x80] sm:$0xff]  }
 0x23e   :  { %5588 = vmatpush3.bf16.msra.mxu1 %v6474_v55  ;;  %6095 = vmatprep.subr.bf16.mxu0 %v6836_v3  ;;  %v6510_v55 = vld [vmem:[%s8432_s3] sm:$0xff]  }
 0x23f   :  { %5589 = vmatprep.subr.bf16.mxu1 %v6475_v56 }
 0x241   :  { %6096 = vmatpush3.bf16.msra.mxu0 %v6476_v57 }
 0x242   :  { %5590 = vmatpush3.bf16.msra.mxu1 %v6477_v58  ;;  %6097 = vmatprep.subr.bf16.mxu0 %v6836_v3 }
 0x243   :  { %5591 = vmatprep.subr.bf16.mxu1 %v6478_v59 }
 0x245   :  { %6098 = vmatpush3.bf16.msra.mxu0 %v6479_v60 }
 0x246   :  { %5592 = vmatpush3.bf16.msra.mxu1 %v6480_v61  ;;  %6099 = vmatprep.subr.bf16.mxu0 %v6836_v3 }
 0x247   :  { %5593 = vmatprep.subr.bf16.mxu1 %v6481_v62 }
 0x249   :  { %6100 = vmatpush3.bf16.msra.mxu0 %v6482_v63 }
 0x24a   :  { %5594 = vmatpush3.bf16.msra.mxu1 %v6483_v0  ;;  %6101 = vmatprep.subr.bf16.mxu0 %v6836_v3 }
 0x24b   :  { %5595 = vmatprep.subr.bf16.mxu1 %v6484_v1 }
 0x24d   :  { %6102 = vmatpush3.bf16.msra.mxu0 %v6485_v2 }
 0x24e   :  { %5596 = vmatpush3.bf16.msra.mxu1 %v6486_v4  ;;  %6107 = vmatprep.subr.bf16.mxu0 %v6836_v3 }
 0x24f   :  { %5612 = vmatprep.subr.bf16.mxu1 %v6487_v5 }
 0x2ef   :  { %v737_v6 = vpop.f32.mrf.mxu0 }
 0x2f1   :  { %v5566_v7 = vpop.f32.mrf.mxu1  ;;  %v6085_v8 = vpop.f32.mrf.mxu0 }
 0x2f3   :  { %v5567_v9 = vpop.f32.mrf.mxu1  ;;  %v740_v11 = vpop.f32.mrf.mxu0 }
 0x2f4   :  { %v5568_v10 = vadd.f32 %v5567_v9, %v5566_v7 }
 0x2f5   :  { %v5569_v12 = vpop.f32.mrf.mxu1  ;;  %v6086_v14 = vpop.f32.mrf.mxu0 }
 0x2f6   :  { %v697_v13 = vadd.f32 %v5568_v10, %v7090_v22  ;;  %v6514_v14 = vld [vmem:[%s8432_s3 + $0x70] sm:$0xff]  }
 0x2f7   :  { %v5570_v15 = vpop.f32.mrf.mxu1 }
 0x2f8   :  { %v738_v16 = vadd.f32 %v737_v6, %v697_v13  ;;  %v5571_v17 = vadd.f32 %v5570_v15, %v5569_v12  ;;  %v6512_v12 = vld [vmem:[%s8432_s3 + $0xb8] sm:$0xff]   ;;  %v6515_v15 = vld [vmem:[%s8432_s3 + $0xb0] sm:$0xff]  }
 0x2f9   :  { %v6513_v13 = vld [vmem:[%s8432_s3 + $0x38] sm:$0xff]  }
 0x2fa   :  { %744 = vst [vmem:[#allocation2] sm:$0xff] %v738_v16  ;;  %v700_v18 = vadd.f32 %v5571_v17, %v7090_v22  ;;  %v6516_v16 = vld [vmem:[%s8432_s3 + $0x30] sm:$0xff]   ;;  %v6517_v17 = vld [vmem:[%s8432_s3 + $0x68] sm:$0xff]  }
 0x2fc   :  { %v741_v19 = vadd.f32 %v740_v11, %v700_v18  ;;  %v6511_v11 = vld [vmem:[%s8432_s3 + $0x78] sm:$0xff]   ;;  %v6518_v18 = vld [vmem:[%s8432_s3 + $0xa8] sm:$0xff]  }
 0x2fe   :  { %745 = vst [vmem:[#allocation2 + $0x8] sm:$0x3f] %v741_v19  ;;  %v6519_v19 = vld [vmem:[%s8432_s3 + $0x28] sm:$0xff]  }
 0x305   :  { %v747_v20 = vld [vmem:[#allocation2] ss:$2 sm:$0x7f]  ;;  %v749_v21 = vld [vmem:[#allocation2 + $0x1] ss:$2 sm:$0x7f] }
 0x306   :  { %v750_v23 = vmax.f32 %v747_v20, %v749_v21  ;;  %v752_v24 = vld [vmem:[#allocation2 + $0x2] ss:$2 sm:$0x7f]  ;;  %755 = vst [vmem:[#allocation2] sm:$0x1] %v6836_v3 }
 0x307   :  { %757 = vst [vmem:[#allocation2 + $0x8] sm:$0x1] %v6836_v3  ;;  %v6520_v20 = vld [vmem:[%s8432_s3 + $0x60] sm:$0xff]  }
 0x308   :  { %v7185_v25 = vmax.f32 %v750_v23, %v752_v24  ;;  %v6521_v21 = vld [vmem:[%s8432_s3 + $0xa0] sm:$0xff]   ;;  %v6523_v24 = vld [vmem:[%s8432_s3 + $0x58] sm:$0xff]  }
 0x309   :  { %v6522_v23 = vld [vmem:[%s8432_s3 + $0x20] sm:$0xff]  }
 0x30a   :  { %v754_v26 = vmax.f32 %v7185_v25, 0.0 }
 0x30c   :  { %756 = vst [vmem:[#allocation2 + $0x1] sm:$0x7f] %v754_v26  ;;  %v6524_v26 = vld [vmem:[%s8432_s3 + $0x98] sm:$0xff]  }
 0x313   :  { %v760_v28 = vld [vmem:[#allocation2 + $0x2] sm:$0x7f] }
 0x314   :  { %v758_v29 = vld [vmem:[#allocation2] sm:$0x7f]  ;;  %1046 = vst [vmem:[#allocation2 + $0x8] sm:$0x1] %v6836_v3  ;;  %v763_v32 = vpack.c.bf16 %v760_v28, %v760_v28  ;;  %v6526_v28 = vld [vmem:[%s8432_s3 + $0x50] sm:$0xff]  }
 0x315   :  { %v759_v30 = vld [vmem:[#allocation2 + $0x1] sm:$0x7f]  ;;  %1044 = vst [vmem:[#allocation2] sm:$0x1] %v6836_v3  ;;  %v761_v33 = vpack.c.bf16 %v758_v29, %v758_v29  ;;  %v6527_v29 = vld [vmem:[%s8432_s3 + $0x90] sm:$0xff]  }
 0x316   :  { %v762_v31 = vpack.c.bf16 %v759_v30, %v759_v30  ;;  %6104 = vmatmul.mubr.bf16.vlgmr.msra.gmra.mxu0 %v763_v32  ;;  %v6528_v30 = vld [vmem:[%s8432_s3 + $0x10] sm:$0xff]   ;;  %v6530_v32 = vld [vmem:[%s8432_s3 + $0x88] sm:$0xff]  }
 0x317   :  { %6108 = vmatpush3.bf16.msra.mxu0 %v6488_v27  ;;  %6123 = vmatprep.mubr.msk.bf16.mxu0 %vm6837_vm0, %v6836_v3  ;;  %v6525_v27 = vld [vmem:[%s8432_s3 + $0x18] sm:$0xff]  }
 0x318   :  { %995 = vmatprep.mubr.bf16.mxu1 %v762_v31  ;;  %6109 = vmatprep.subr.bf16.mxu0 %v6836_v3  ;;  %v6529_v31 = vld [vmem:[%s8432_s3 + $0x48] sm:$0xff]  }
 0x319   :  { %996 = vmatmul.mubr.bf16.vlgmr.msra.gmra.mxu1 %v761_v33  ;;  %v6531_v33 = vld [vmem:[%s8432_s3 + $0x8] sm:$0xff]  }
 0x31a   :  { %5613 = vmatpush3.bf16.msra.mxu1 %v6489_v34  ;;  %v6532_v34 = vld [vmem:[%s8432_s3 + $0x40] sm:$0xff]  }
 0x31b   :  { %5614 = vmatprep.subr.bf16.mxu1 %v6490_v35  ;;  %6110 = vmatpush3.bf16.msra.mxu0 %v6491_v36  ;;  %v6533_v35 = vld [vmem:[%s8432_s3 + $0x80] sm:$0xff]  }
 0x31c   :  { %6111 = vmatprep.subr.bf16.mxu0 %v6836_v3  ;;  %v6534_v36 = vld [vmem:[%s8432_s3] sm:$0xff]  }
 0x31e   :  { %5615 = vmatpush3.bf16.msra.mxu1 %v6492_v37  ;;  %v6535_v37 = vld [vmem:[%s8432_s3 + $0x78] sm:$0xff]  }
 0x31f   :  { %5616 = vmatprep.subr.bf16.mxu1 %v6493_v38  ;;  %6112 = vmatpush3.bf16.msra.mxu0 %v6494_v39 }
 0x320   :  { %6113 = vmatprep.subr.bf16.mxu0 %v6836_v3 }
 0x322   :  { %5617 = vmatpush3.bf16.msra.mxu1 %v6495_v40 }
 0x323   :  { %5618 = vmatprep.subr.bf16.mxu1 %v6496_v41  ;;  %6114 = vmatpush3.bf16.msra.mxu0 %v6497_v42 }
 0x324   :  { %6115 = vmatprep.subr.bf16.mxu0 %v6836_v3 }
 0x326   :  { %5619 = vmatpush3.bf16.msra.mxu1 %v6498_v43 }
 0x327   :  { %5620 = vmatprep.subr.bf16.mxu1 %v6499_v44  ;;  %6116 = vmatpush3.bf16.msra.mxu0 %v6500_v45 }
 0x328   :  { %6117 = vmatprep.subr.bf16.mxu0 %v6836_v3 }
 0x32a   :  { %5621 = vmatpush3.bf16.msra.mxu1 %v6501_v46 }
 0x32b   :  { %5622 = vmatprep.subr.bf16.mxu1 %v6502_v47  ;;  %6118 = vmatpush3.bf16.msra.mxu0 %v6503_v48 }
 0x32c   :  { %6119 = vmatprep.subr.bf16.mxu0 %v6836_v3 }
 0x32e   :  { %5623 = vmatpush3.bf16.msra.mxu1 %v6504_v49 }
 0x32f   :  { %5624 = vmatprep.subr.bf16.mxu1 %v6505_v50  ;;  %6120 = vmatpush3.bf16.msra.mxu0 %v6506_v51 }
 0x330   :  { %6121 = vmatprep.subr.bf16.mxu0 %v6836_v3 }
 0x332   :  { %5625 = vmatpush3.bf16.msra.mxu1 %v6507_v52 }
 0x333   :  { %5626 = vmatprep.subr.bf16.mxu1 %v6508_v53  ;;  %6122 = vmatpush3.bf16.msra.mxu0 %v6509_v54 }
 0x334   :  { %6127 = vmatprep.subr.bf16.mxu0 %v6836_v3 }
 0x336   :  { %5627 = vmatpush3.bf16.msra.mxu1 %v6510_v55 }
 0x337   :  { %5643 = vmatprep.subr.bf16.mxu1 %v6511_v11  ;;  %v6550_v11 = vld [vmem:[%s8432_s3 + $0x50] sm:$0xff]  }
 0x3d6   :  { %v1037_v56 = vpop.f32.mrf.mxu0 }
 0x3d8   :  { %v6105_v58 = vpop.f32.mrf.mxu0 }
 0x3d9   :  { %v5597_v57 = vpop.f32.mrf.mxu1 }
 0x3da   :  { %v1040_v61 = vpop.f32.mrf.mxu0 }
 0x3db   :  { %v5598_v59 = vpop.f32.mrf.mxu1  ;;  %v6537_v61 = vld [vmem:[%s8432_s3 + $0x38] sm:$0xff]  }
 0x3dc   :  { %v5599_v60 = vadd.f32 %v5598_v59, %v5597_v57  ;;  %v6106_v0 = vpop.f32.mrf.mxu0 }
 0x3dd   :  { %v5600_v62 = vpop.f32.mrf.mxu1  ;;  %v6540_v0 = vld [vmem:[%s8432_s3 + $0x30] sm:$0xff]  }
 0x3de   :  { %v998_v63 = vadd.f32 %v5599_v60, %v7090_v22  ;;  %v6538_v62 = vld [vmem:[%s8432_s3 + $0x70] sm:$0xff]  }
 0x3df   :  { %v5601_v1 = vpop.f32.mrf.mxu1 }
 0x3e0   :  { %v1038_v2 = vadd.f32 %v1037_v56, %v998_v63  ;;  %v6539_v63 = vld [vmem:[%s8432_s3 + $0xb0] sm:$0xff]   ;;  %v6541_v1 = vld [vmem:[%s8432_s3 + $0x68] sm:$0xff]  }
 0x3e2   :  { %v1043_v4 = vmax.f32 %v1038_v2, 0.0  ;;  %v6542_v2 = vld [vmem:[%s8432_s3 + $0xa8] sm:$0xff]  }
 0x3e4   :  { %1045 = vst [vmem:[#allocation2 + $0x1] sm:$0x7f] %v1043_v4  ;;  %v6543_v4 = vld [vmem:[%s8432_s3 + $0x28] sm:$0xff]  }
 0x3eb   :  { %v1047_v5 = vld [vmem:[#allocation2] sm:$0x7f] }
 0x3ec   :  { %v1049_v6 = vld [vmem:[#allocation2 + $0x2] sm:$0x7f]  ;;  %v1050_v10 = vpack.c.bf16 %v1047_v5, %v1047_v5 }
 0x3ed   :  { %v1048_v7 = vld [vmem:[#allocation2 + $0x1] sm:$0x7f]  ;;  %v1052_v9 = vpack.c.bf16 %v1049_v6, %v1049_v6 }
 0x3ee   :  { %v1051_v8 = vpack.c.bf16 %v1048_v7, %v1048_v7  ;;  %1334 = vst [vmem:[#allocation2 + $0x7] sm:$0x1] %v6836_v3  ;;  %v6544_v5 = vld [vmem:[%s8432_s3 + $0x60] sm:$0xff]  }
 0x3ef   :  { %6124 = vmatmul.mubr.bf16.vlgmr.msra.gmra.mxu0 %v1052_v9  ;;  %v6545_v6 = vld [vmem:[%s8432_s3 + $0xa0] sm:$0xff]   ;;  %v6548_v9 = vld [vmem:[%s8432_s3 + $0x98] sm:$0xff]  }
 0x3f0   :  { %1284 = vmatprep.mubr.bf16.mxu1 %v1051_v8  ;;  %6143 = vmatprep.mubr.msk.bf16.mxu0 %vm6837_vm0, %v6836_v3  ;;  %v6546_v7 = vld [vmem:[%s8432_s3 + $0x20] sm:$0xff]   ;;  %v6547_v8 = vld [vmem:[%s8432_s3 + $0x58] sm:$0xff]  }
 0x3f1   :  { %1285 = vmatmul.mubr.bf16.vlgmr.msra.gmra.mxu1 %v1050_v10  ;;  %6128 = vmatpush3.bf16.msra.mxu0 %v6512_v12  ;;  %v6549_v10 = vld [vmem:[%s8432_s3 + $0x18] sm:$0xff]   ;;  %v6551_v12 = vld [vmem:[%s8432_s3 + $0x90] sm:$0xff]  }
 0x3f2   :  { %5644 = vmatpush3.bf16.msra.mxu1 %v6513_v13  ;;  %6129 = vmatprep.subr.bf16.mxu0 %v6836_v3  ;;  %v6552_v13 = vld [vmem:[%s8432_s3 + $0x10] sm:$0xff]  }
 0x3f3   :  { %5645 = vmatprep.subr.bf16.mxu1 %v6514_v14  ;;  %v6553_v14 = vld [vmem:[%s8432_s3 + $0x48] sm:$0xff]  }
 0x3f5   :  { %6130 = vmatpush3.bf16.msra.mxu0 %v6515_v15  ;;  %v6554_v15 = vld [vmem:[%s8432_s3 + $0x88] sm:$0xff]  }
 0x3f6   :  { %5646 = vmatpush3.bf16.msra.mxu1 %v6516_v16  ;;  %6131 = vmatprep.subr.bf16.mxu0 %v6836_v3  ;;  %v6555_v16 = vld [vmem:[%s8432_s3 + $0x8] sm:$0xff]  }
 0x3f7   :  { %5647 = vmatprep.subr.bf16.mxu1 %v6517_v17  ;;  %v6556_v17 = vld [vmem:[%s8432_s3 + $0x40] sm:$0xff]  }
 0x3f9   :  { %6132 = vmatpush3.bf16.msra.mxu0 %v6518_v18  ;;  %v6557_v18 = vld [vmem:[%s8432_s3 + $0x80] sm:$0xff]  }
 0x3fa   :  { %5648 = vmatpush3.bf16.msra.mxu1 %v6519_v19  ;;  %6133 = vmatprep.subr.bf16.mxu0 %v6836_v3  ;;  %v6558_v19 = vld [vmem:[%s8432_s3] sm:$0xff]  }
 0x3fb   :  { %5649 = vmatprep.subr.bf16.mxu1 %v6520_v20 }
 0x3fd   :  { %6134 = vmatpush3.bf16.msra.mxu0 %v6521_v21 }
 0x3fe   :  { %5650 = vmatpush3.bf16.msra.mxu1 %v6522_v23  ;;  %6135 = vmatprep.subr.bf16.mxu0 %v6836_v3 }
 0x3ff   :  { %5651 = vmatprep.subr.bf16.mxu1 %v6523_v24  ;;  %v7447_v24 = vld [vmem:[%s8433_s4] ss:$0 sm:$0xff] }
 0x401   :  { %6136 = vmatpush3.bf16.msra.mxu0 %v6524_v26 }
 0x402   :  { %5652 = vmatpush3.bf16.msra.mxu1 %v6525_v27  ;;  %6137 = vmatprep.subr.bf16.mxu0 %v6836_v3 }
 0x403   :  { %5653 = vmatprep.subr.bf16.mxu1 %v6526_v28 }
 0x405   :  { %6138 = vmatpush3.bf16.msra.mxu0 %v6527_v29 }
 0x406   :  { %5654 = vmatpush3.bf16.msra.mxu1 %v6528_v30  ;;  %6139 = vmatprep.subr.bf16.mxu0 %v6836_v3 }
 0x407   :  { %5655 = vmatprep.subr.bf16.mxu1 %v6529_v31 }
 0x409   :  { %6140 = vmatpush3.bf16.msra.mxu0 %v6530_v32 }
 0x40a   :  { %5656 = vmatpush3.bf16.msra.mxu1 %v6531_v33  ;;  %6141 = vmatprep.subr.bf16.mxu0 %v6836_v3 }
 0x40b   :  { %5657 = vmatprep.subr.bf16.mxu1 %v6532_v34 }
 0x40d   :  { %6142 = vmatpush3.bf16.msra.mxu0 %v6533_v35 }
 0x40e   :  { %5658 = vmatpush3.bf16.msra.mxu1 %v6534_v36  ;;  %6147 = vmatprep.subr.bf16.mxu0 %v6836_v3 }
 0x40f   :  { %5674 = vmatprep.subr.bf16.mxu1 %v6535_v37 }
 0x4af   :  { %v1326_v38 = vpop.f32.mrf.mxu0 }
 0x4b1   :  { %v5628_v39 = vpop.f32.mrf.mxu1  ;;  %v6125_v40 = vpop.f32.mrf.mxu0 }
 0x4b3   :  { %v5629_v41 = vpop.f32.mrf.mxu1  ;;  %v1329_v43 = vpop.f32.mrf.mxu0 }
 0x4b4   :  { %v5630_v42 = vadd.f32 %v5629_v41, %v5628_v39  ;;  %v6559_v41 = vld [vmem:[%s8432_s3 + $0x78] sm:$0xff]  }
 0x4b5   :  { %v5631_v44 = vpop.f32.mrf.mxu1  ;;  %v6126_v46 = vpop.f32.mrf.mxu0  ;;  %v6561_v43 = vld [vmem:[%s8432_s3 + $0xb8] sm:$0xff]  }
 0x4b6   :  { %v1287_v45 = vadd.f32 %v5630_v42, %v7090_v22  ;;  %v6536_v22 = vld [vmem:[%s8432_s3 + $0xb8] sm:$0xff]   ;;  %v6562_v44 = vld [vmem:[%s8432_s3 + $0x70] sm:$0xff]  }
 0x4b7   :  { %v5632_v47 = vpop.f32.mrf.mxu1  ;;  %v6560_v42 = vld [vmem:[%s8432_s3 + $0x38] sm:$0xff]   ;;  %v6564_v46 = vld [vmem:[%s8432_s3 + $0xb0] sm:$0xff]  }
 0x4b8   :  { %v1327_v48 = vadd.f32 %v1326_v38, %v1287_v45  ;;  %v6563_v45 = vld [vmem:[%s8432_s3 + $0x30] sm:$0xff]   ;;  %v6565_v47 = vld [vmem:[%s8432_s3 + $0x68] sm:$0xff]  }
 0x4ba   :  { %v1332_v49 = vadd.f32 %v1327_v48, %v7185_v25  ;;  %v6566_v48 = vld [vmem:[%s8432_s3 + $0x28] sm:$0xff]  }
 0x4bc   :  { %1333 = vst [vmem:[#allocation2] sm:$0x7f] %v1332_v49  ;;  %v6567_v49 = vld [vmem:[%s8432_s3 + $0xa8] sm:$0xff]  }
 0x4c3   :  { %v1335_v50 = vld [vmem:[#allocation2] ss:$2 sm:$0x7]  ;;  %v1336_v52 = vld [vmem:[#allocation2 + $0x1] ss:$2 sm:$0x7] }
 0x4c4   :  { %v1339_v51 = vld [vmem:[#allocation2 + $0x2] ss:$2 sm:$0x7]  ;;  %1342 = vst [vmem:[#allocation2] sm:$0x1] %v6836_v3  ;;  %v1337_v53 = vmax.f32 %v1335_v50, %v1336_v52 }
 0x4c5   :  { %1344 = vst [vmem:[#allocation2 + $0x4] sm:$0x1] %v6836_v3  ;;  %v6568_v50 = vld [vmem:[%s8432_s3 + $0x60] sm:$0xff]  }
 0x4c6   :  { %v7360_v54 = vmax.f32 %v1337_v53, %v1339_v51  ;;  %v6569_v51 = vld [vmem:[%s8432_s3 + $0x20] sm:$0xff]   ;;  %v6571_v53 = vld [vmem:[%s8432_s3 + $0x58] sm:$0xff]  }
 0x4c7   :  { %v6570_v52 = vld [vmem:[%s8432_s3 + $0xa0] sm:$0xff]  }
 0x4c8   :  { %v1341_v55 = vmax.f32 %v7360_v54, 0.0 }
 0x4ca   :  { %1343 = vst [vmem:[#allocation2 + $0x1] sm:$0x7] %v1341_v55  ;;  %v6572_v55 = vld [vmem:[%s8432_s3 + $0x18] sm:$0xff]  }
 0x4d1   :  { %v1346_v56 = vld [vmem:[#allocation2 + $0x1] sm:$0x7] }
 0x4d2   :  { %v1347_v25 = vld [vmem:[#allocation2 + $0x2] sm:$0x7]  ;;  %v1349_v58 = vpack.c.bf16 %v1346_v56, %v1346_v56  ;;  %v6574_v56 = vld [vmem:[%s8432_s3 + $0x50] sm:$0xff]  }
 0x4d3   :  { %v1345_v57 = vld [vmem:[#allocation2] sm:$0x7]  ;;  %1633 = vst [vmem:[#allocation2 + $0x4] sm:$0x1] %v6836_v3  ;;  %v1350_v59 = vpack.c.bf16 %v1347_v25, %v1347_v25  ;;  %v6575_v25 = vld [vmem:[%s8432_s3 + $0x10] sm:$0xff]  }
 0x4d4   :  { %v1348_v60 = vpack.c.bf16 %v1345_v57, %v1345_v57  ;;  %1631 = vst [vmem:[#allocation2] sm:$0x1] %v6836_v3  ;;  %1582 = vmatprep.mubr.bf16.mxu1 %v1349_v58  ;;  %v6576_v57 = vld [vmem:[%s8432_s3 + $0x90] sm:$0xff]   ;;  %v6577_v58 = vld [vmem:[%s8432_s3 + $0x48] sm:$0xff]  }
 0x4d5   :  { %6144 = vmatmul.mubr.bf16.vlgmr.msra.gmra.mxu0 %v1350_v59  ;;  %v6578_v59 = vld [vmem:[%s8432_s3 + $0x8] sm:$0xff]  }
 0x4d6   :  { %1583 = vmatmul.mubr.bf16.vlgmr.msra.gmra.mxu1 %v1348_v60  ;;  %6148 = vmatpush3.bf16.msra.mxu0 %v6536_v22  ;;  %v6573_v22 = vld [vmem:[%s8432_s3 + $0x98] sm:$0xff]   ;;  %v6579_v60 = vld [vmem:[%s8432_s3 + $0x88] sm:$0xff]  }
 0x4d7   :  { %5675 = vmatpush3.bf16.msra.mxu1 %v6537_v61  ;;  %6149 = vmatprep.subr.bf16.mxu0 %v6836_v3  ;;  %v6580_v61 = vld [vmem:[%s8432_s3 + $0x40] sm:$0xff]  }
 0x4d8   :  { %5676 = vmatprep.subr.bf16.mxu1 %v6538_v62  ;;  %6163 = vmatprep.mubr.msk.bf16.mxu0 %vm6837_vm0, %v6836_v3  ;;  %v6581_v62 = vld [vmem:[%s8432_s3] sm:$0xff]  }
 0x4da   :  { %6150 = vmatpush3.bf16.msra.mxu0 %v6539_v63  ;;  %v6582_v63 = vld [vmem:[%s8432_s3 + $0x80] sm:$0xff]  }
 0x4db   :  { %5677 = vmatpush3.bf16.msra.mxu1 %v6540_v0  ;;  %6151 = vmatprep.subr.bf16.mxu0 %v6836_v3  ;;  %v7536_v0 = vld [vmem:[%s8429_s0 + $0x8] sm:$0xff]  }
 0x4dc   :  { %5678 = vmatprep.subr.bf16.mxu1 %v6541_v1  ;;  %v6584_v1 = vld [vmem:[%s8432_s3 + $0x78] sm:$0xff]  }
 0x4de   :  { %6152 = vmatpush3.bf16.msra.mxu0 %v6542_v2  ;;  %v2503_v2 = vshrl.u32 %v7536_v0, 16 }
 0x4df   :  { %6153 = vmatprep.subr.bf16.mxu0 %v6836_v3  ;;  %5679 = vmatpush3.bf16.msra.mxu1 %v6543_v4  ;;  %v2505_v4 = vshll.u32 %v7536_v0, 16 }
 0x4e0   :  { %5680 = vmatprep.subr.bf16.mxu1 %v6544_v5 }
 0x4e1   :  { %v2507_v5 = vrot.slane %v2505_v4, 1 }
 0x4e2   :  { %6154 = vmatpush3.bf16.msra.mxu0 %v6545_v6 }
 0x4e3   :  { %5681 = vmatpush3.bf16.msra.mxu1 %v6546_v7  ;;  %6155 = vmatprep.subr.bf16.mxu0 %v6836_v3  ;;  %v2508_v6 = vor.u32 %v2507_v5, %v2503_v2  ;;  %v2511_v7 = vrot.slane %v7536_v0, 1 }
 0x4e4   :  { %5682 = vmatprep.subr.bf16.mxu1 %v6547_v8 }
 0x4e5   :  { %2509 = vrot.lane.b32.xlu1 %v2508_v6, %s6838_s30 }
 0x4e6   :  { %6156 = vmatpush3.bf16.msra.mxu0 %v6548_v9 }
 0x4e7   :  { %5683 = vmatpush3.bf16.msra.mxu1 %v6549_v10  ;;  %6157 = vmatprep.subr.bf16.mxu0 %v6836_v3 }
 0x4e8   :  { %5684 = vmatprep.subr.bf16.mxu1 %v6550_v11 }
 0x4e9   :  { %2512 = vrot.lane.b32.xlu1 %v2511_v7, %s6839_s14 }
 0x4ea   :  { %6158 = vmatpush3.bf16.msra.mxu0 %v6551_v12 }
 0x4eb   :  { %5685 = vmatpush3.bf16.msra.mxu1 %v6552_v13  ;;  %6159 = vmatprep.subr.bf16.mxu0 %v6836_v3 }
 0x4ec   :  { %5686 = vmatprep.subr.bf16.mxu1 %v6553_v14 }
 0x4ee   :  { %6160 = vmatpush3.bf16.msra.mxu0 %v6554_v15 }
 0x4ef   :  { %5687 = vmatpush3.bf16.msra.mxu1 %v6555_v16  ;;  %6161 = vmatprep.subr.bf16.mxu0 %v6836_v3 }
 0x4f0   :  { %5688 = vmatprep.subr.bf16.mxu1 %v6556_v17 }
 0x4f2   :  { %6162 = vmatpush3.bf16.msra.mxu0 %v6557_v18 }
 0x4f3   :  { %5689 = vmatpush3.bf16.msra.mxu1 %v6558_v19  ;;  %6167 = vmatprep.subr.bf16.mxu0 %v6836_v3 }
 0x4f4   :  { %5705 = vmatprep.subr.bf16.mxu1 %v6559_v41  ;;  %v6593_v41 = vld [vmem:[%s8432_s3 + $0x20] sm:$0xff]  }
 0x595   :  { %v1624_v20 = vpop.f32.mrf.mxu0 }
 0x596   :  { %v5659_v21 = vpop.f32.mrf.mxu1 }
 0x597   :  { %v6145_v23 = vpop.f32.mrf.mxu0 }
 0x598   :  { %v5660_v26 = vpop.f32.mrf.mxu1 }
 0x599   :  { %v5661_v27 = vadd.f32 %v5660_v26, %v5659_v21  ;;  %v1627_v28 = vpop.f32.mrf.mxu0 }
 0x59a   :  { %v5662_v29 = vpop.f32.mrf.mxu1 }
 0x59b   :  { %v1585_v30 = vadd.f32 %v5661_v27, %v7447_v24  ;;  %v6146_v31 = vpop.f32.mrf.mxu0 }
 0x59c   :  { %v5663_v32 = vpop.f32.mrf.mxu1 }
 0x59d   :  { %v1625_v33 = vadd.f32 %v1624_v20, %v1585_v30 }
 0x59f   :  { %v1630_v34 = vmax.f32 %v1625_v33, 0.0 }
 0x5a1   :  { %1632 = vst [vmem:[#allocation2 + $0x1] sm:$0x7] %v1630_v34  ;;  %v6585_v34 = vld [vmem:[%s8432_s3 + $0x38] sm:$0xff]  }
 0x5a8   :  { %v1635_v35 = vld [vmem:[#allocation2 + $0x1] sm:$0x7] }
 0x5a9   :  { %v1636_v36 = vld [vmem:[#allocation2 + $0x2] sm:$0x7]  ;;  %v1638_v38 = vpack.c.bf16 %v1635_v35, %v1635_v35  ;;  %v6586_v35 = vld [vmem:[%s8432_s3 + $0x70] sm:$0xff]  }
 0x5aa   :  { %v1634_v37 = vld [vmem:[#allocation2] sm:$0x7]  ;;  %1921 = vst [vmem:[#allocation2 + $0x3] sm:$0x1] %v6836_v3  ;;  %v1639_v39 = vpack.c.bf16 %v1636_v36, %v1636_v36  ;;  %v6587_v36 = vld [vmem:[%s8432_s3 + $0x30] sm:$0xff]  }
 0x5ab   :  { %v1637_v40 = vpack.c.bf16 %v1634_v37, %v1634_v37  ;;  %1871 = vmatprep.mubr.bf16.mxu1 %v1638_v38  ;;  %v6588_v37 = vld [vmem:[%s8432_s3 + $0x68] sm:$0xff]  }
 0x5ac   :  { %6164 = vmatmul.mubr.bf16.vlgmr.msra.gmra.mxu0 %v1639_v39  ;;  %v6590_v38 = vld [vmem:[%s8432_s3 + $0x28] sm:$0xff]   ;;  %v6591_v39 = vld [vmem:[%s8432_s3 + $0x60] sm:$0xff]  }
 0x5ad   :  { %1872 = vmatmul.mubr.bf16.vlgmr.msra.gmra.mxu1 %v1637_v40  ;;  %6183 = vmatprep.mubr.msk.bf16.mxu0 %vm6837_vm0, %v6836_v3  ;;  %v6592_v40 = vld [vmem:[%s8432_s3 + $0xb0] sm:$0xff]  }
 0x5ae   :  { %5706 = vmatpush3.bf16.msra.mxu1 %v6560_v42  ;;  %6168 = vmatpush3.bf16.msra.mxu0 %v6561_v43  ;;  %v6594_v42 = vld [vmem:[%s8432_s3 + $0x58] sm:$0xff]   ;;  %v6595_v43 = vld [vmem:[%s8432_s3 + $0xa8] sm:$0xff]  }
 0x5af   :  { %6169 = vmatprep.subr.bf16.mxu0 %v6836_v3  ;;  %5707 = vmatprep.subr.bf16.mxu1 %v6562_v44  ;;  %v6596_v44 = vld [vmem:[%s8432_s3 + $0x18] sm:$0xff]  }
 0x5b2   :  { %5708 = vmatpush3.bf16.msra.mxu1 %v6563_v45  ;;  %6170 = vmatpush3.bf16.msra.mxu0 %v6564_v46  ;;  %v6597_v45 = vld [vmem:[%s8432_s3 + $0x50] sm:$0xff]   ;;  %v6598_v46 = vld [vmem:[%s8432_s3 + $0xa0] sm:$0xff]  }
 0x5b3   :  { %6171 = vmatprep.subr.bf16.mxu0 %v6836_v3  ;;  %5709 = vmatprep.subr.bf16.mxu1 %v6565_v47  ;;  %v6599_v47 = vld [vmem:[%s8432_s3 + $0x10] sm:$0xff]  }
 0x5b6   :  { %5710 = vmatpush3.bf16.msra.mxu1 %v6566_v48  ;;  %6172 = vmatpush3.bf16.msra.mxu0 %v6567_v49  ;;  %v6600_v48 = vld [vmem:[%s8432_s3 + $0x48] sm:$0xff]   ;;  %v6601_v49 = vld [vmem:[%s8432_s3 + $0x98] sm:$0xff]  }
 0x5b7   :  { %5711 = vmatprep.subr.bf16.mxu1 %v6568_v50  ;;  %6173 = vmatprep.subr.bf16.mxu0 %v6836_v3  ;;  %v6602_v50 = vld [vmem:[%s8432_s3 + $0x8] sm:$0xff]  }
 0x5ba   :  { %5712 = vmatpush3.bf16.msra.mxu1 %v6569_v51  ;;  %6174 = vmatpush3.bf16.msra.mxu0 %v6570_v52  ;;  %v6603_v51 = vld [vmem:[%s8432_s3 + $0x40] sm:$0xff]   ;;  %v6604_v52 = vld [vmem:[%s8432_s3 + $0x90] sm:$0xff]  }
 0x5bb   :  { %5713 = vmatprep.subr.bf16.mxu1 %v6571_v53  ;;  %6175 = vmatprep.subr.bf16.mxu0 %v6836_v3  ;;  %v6605_v53 = vld [vmem:[%s8432_s3] sm:$0xff]  }
 0x5be   :  { %5714 = vmatpush3.bf16.msra.mxu1 %v6572_v55  ;;  %6176 = vmatpush3.bf16.msra.mxu0 %v6573_v22  ;;  %v6606_v55 = vld [vmem:[%s8432_s3 + $0x88] sm:$0xff]  }
 0x5bf   :  { %5715 = vmatprep.subr.bf16.mxu1 %v6574_v56  ;;  %6177 = vmatprep.subr.bf16.mxu0 %v6836_v3  ;;  %v6608_v56 = vld [vmem:[%s8432_s3 + $0x80] sm:$0xff]  }
 0x5c2   :  { %5716 = vmatpush3.bf16.msra.mxu1 %v6575_v25  ;;  %6178 = vmatpush3.bf16.msra.mxu0 %v6576_v57 }
 0x5c3   :  { %5717 = vmatprep.subr.bf16.mxu1 %v6577_v58  ;;  %6179 = vmatprep.subr.bf16.mxu0 %v6836_v3 }
 0x5c6   :  { %5718 = vmatpush3.bf16.msra.mxu1 %v6578_v59  ;;  %6180 = vmatpush3.bf16.msra.mxu0 %v6579_v60 }
 0x5c7   :  { %5719 = vmatprep.subr.bf16.mxu1 %v6580_v61  ;;  %6181 = vmatprep.subr.bf16.mxu0 %v6836_v3 }
 0x5ca   :  { %5720 = vmatpush3.bf16.msra.mxu1 %v6581_v62  ;;  %6182 = vmatpush3.bf16.msra.mxu0 %v6582_v63  ;;  %v1985_v63 = vld [vmem:[%s8433_s4] sm:$0x1] }
 0x5cb   :  { %6187 = vmatprep.subr.bf16.mxu0 %v6836_v3  ;;  %5736 = vmatprep.subr.bf16.mxu1 %v6584_v1 }
 0x66c   :  { %v1913_v8 = vpop.f32.mrf.mxu0 }
 0x66d   :  { %v5690_v9 = vpop.f32.mrf.mxu1 }
 0x66e   :  { %v6165_v10 = vpop.f32.mrf.mxu0 }
 0x66f   :  { %v5691_v11 = vpop.f32.mrf.mxu1 }
 0x670   :  { %v5692_v12 = vadd.f32 %v5691_v11, %v5690_v9  ;;  %v1916_v13 = vpop.f32.mrf.mxu0 }
 0x671   :  { %v5693_v14 = vpop.f32.mrf.mxu1  ;;  %v6609_v13 = vld [vmem:[%s8430_s1 + $0x20] sm:$0xff]  }
 0x672   :  { %v1874_v15 = vadd.f32 %v5692_v12, %v7447_v24  ;;  %v6166_v16 = vpop.f32.mrf.mxu0  ;;  %v6607_v12 = vld [vmem:[%s8430_s1 + $0x28] sm:$0xff]   ;;  %v6610_v14 = vld [vmem:[%s8430_s1 + $0x18] sm:$0xff]  }
 0x673   :  { %v5694_v17 = vpop.f32.mrf.mxu1  ;;  %v6612_v16 = vld [vmem:[%s8430_s1 + $0x8] sm:$0xff]  }
 0x674   :  { %v1914_v18 = vadd.f32 %v1913_v8, %v1874_v15  ;;  %v6611_v15 = vld [vmem:[%s8430_s1 + $0x10] sm:$0xff]   ;;  %v2510_v17 = vpop.permute.xlu1 %2509 }
 0x676   :  { %v1919_v19 = vadd.f32 %v1914_v18, %v7360_v54  ;;  %v6589_v54 = vld [vmem:[%s8432_s3 + $0xb8] sm:$0xff]   ;;  %v6613_v18 = vld [vmem:[%s8430_s1] sm:$0xff]  }
 0x678   :  { %1920 = vst [vmem:[#allocation2] sm:$0x7] %v1919_v19  ;;  %v2515_v19 = vsel %vm47_vm1, %v7536_v0, %v2510_v17  ;;  %v6615_v0 = vld [vmem:[%s8432_s3 + $0xb8] sm:$0xff]   ;;  %v6645_v17 = vld [vmem:[%s8432_s3 + $0xa8] sm:$0xff]  }
 0x67f   :  { %v1922_v20 = vld [vmem:[#allocation2] ss:$2 sm:$0x1]  ;;  %v1923_v21 = vld [vmem:[#allocation2 + $0x1] ss:$2 sm:$0x1] }
 0x680   :  { %v1924_v23 = vmax.f32 %v1922_v20, %v1923_v21  ;;  %v1925_v26 = vld [vmem:[#allocation2 + $0x2] ss:$2 sm:$0x1]  ;;  %1928 = vst [vmem:[#allocation2] sm:$0x1] %v6836_v3  ;;  %v2513_v20 = vpop.permute.xlu1 %2512 }
 0x681   :  { %1930 = vst [vmem:[#allocation2 + $0x2] sm:$0x1] %v6836_v3  ;;  %v2517_v21 = vsel %vm50_vm2, %v2515_v19, %v2513_v20  ;;  %v6647_v19 = vld [vmem:[%s8432_s3 + $0x60] sm:$0xff]  }
 0x682   :  { %v7550_v27 = vmax.f32 %v1924_v23, %v1925_v26  ;;  %v6614_v26 = vld [vmem:[%s8432_s3 + $0x78] sm:$0xff]   ;;  %v6648_v20 = vld [vmem:[%s8432_s3 + $0xa0] sm:$0xff]  }
 0x684   :  { %v1927_v28 = vmax.f32 %v7550_v27, 0.0 }
 0x686   :  { %1929 = vst [vmem:[#allocation2 + $0x1] sm:$0x1] %v1927_v28  ;;  %v6616_v28 = vld [vmem:[%s8432_s3 + $0x38] sm:$0xff]  }
 0x687   :  { %v1931_v24 = vld [vmem:[#allocation2] sm:$0x1] }
 0x688   :  { %2211 = vst [vmem:[#allocation2] sm:$0x1] %v6836_v3  ;;  %v1933_v29 = vld [vmem:[#allocation2 + $0x2] sm:$0x1]  ;;  %v1934_v32 = vpack.c.bf16 %v1931_v24, %v1931_v24 }
 0x689   :  { %v1936_v30 = vpack.c.bf16 %v1933_v29, %v1933_v29  ;;  %2213 = vst [vmem:[#allocation2 + $0x2] sm:$0x1] %v6836_v3  ;;  %v6617_v29 = vld [vmem:[%s8432_s3 + $0x70] sm:$0xff]  }
 0x68b   :  { %6184 = vmatmul.mubr.bf16.vlgmr.msra.gmra.mxu0 %v1936_v30 }
 0x68c   :  { %6188 = vmatpush3.bf16.msra.mxu0 %v6589_v54  ;;  %6203 = vmatprep.mubr.msk.bf16.mxu0 %vm6837_vm0, %v6836_v3  ;;  %v6618_v54 = vld [vmem:[%s8432_s3 + $0xb0] sm:$0xff]  }
 0x68d   :  { %v1932_v31 = vld [vmem:[#allocation2 + $0x1] sm:$0x1]  ;;  %6189 = vmatprep.subr.bf16.mxu0 %v6836_v3 }
 0x68e   :  { %v1935_v33 = vpack.c.bf16 %v1932_v31, %v1932_v31  ;;  %v6619_v31 = vld [vmem:[%s8432_s3 + $0x30] sm:$0xff]  }
 0x68f   :  { %v2214_v22 = vld [vmem:[#allocation2] sm:$0x1] }
 0x690   :  { %2162 = vmatprep.mubr.bf16.mxu1 %v1935_v33  ;;  %6190 = vmatpush3.bf16.msra.mxu0 %v6592_v40  ;;  %2618 = vst [vmem:[#allocation2] sm:$0x1] %v6836_v3  ;;  %v2216_v25 = vld [vmem:[#allocation2 + $0x2] sm:$0x1]  ;;  %v2217_v10 = vpack.c.bf16 %v2214_v22, %v2214_v22  ;;  %v6627_v40 = vld [vmem:[%s8432_s3 + $0x98] sm:$0xff]  }
 0x691   :  { %2163 = vmatmul.mubr.bf16.vlgmr.msra.gmra.mxu1 %v1934_v32  ;;  %6191 = vmatprep.subr.bf16.mxu0 %v6836_v3  ;;  %v2219_v57 = vpack.c.bf16 %v2216_v25, %v2216_v25  ;;  %v6620_v32 = vld [vmem:[%s8432_s3 + $0x68] sm:$0xff]   ;;  %v5297_v25 = vld [vmem:[%s8431_s2] ss:$0 sm:$0xff] }
 0x692   :  { %5737 = vmatpush3.bf16.msra.mxu1 %v6585_v34  ;;  %v6621_v34 = vld [vmem:[%s8432_s3 + $0xa8] sm:$0xff]  }
 0x693   :  { %5738 = vmatprep.subr.bf16.mxu1 %v6586_v35  ;;  %v6622_v35 = vld [vmem:[%s8432_s3 + $0x28] sm:$0xff]  }
 0x694   :  { %6192 = vmatpush3.bf16.msra.mxu0 %v6595_v43  ;;  %v6630_v43 = vld [vmem:[%s8432_s3 + $0x90] sm:$0xff]  }
 0x695   :  { %6193 = vmatprep.subr.bf16.mxu0 %v6836_v3 }
 0x696   :  { %5739 = vmatpush3.bf16.msra.mxu1 %v6587_v36  ;;  %v6623_v36 = vld [vmem:[%s8432_s3 + $0x60] sm:$0xff]  }
 0x697   :  { %5740 = vmatprep.subr.bf16.mxu1 %v6588_v37  ;;  %v6624_v37 = vld [vmem:[%s8432_s3 + $0xa0] sm:$0xff]  }
 0x698   :  { %6194 = vmatpush3.bf16.msra.mxu0 %v6598_v46  ;;  %v6633_v46 = vld [vmem:[%s8432_s3 + $0x88] sm:$0xff]  }
 0x699   :  { %6195 = vmatprep.subr.bf16.mxu0 %v6836_v3 }
 0x69a   :  { %5741 = vmatpush3.bf16.msra.mxu1 %v6590_v38  ;;  %v6625_v38 = vld [vmem:[%s8432_s3 + $0x20] sm:$0xff]  }
 0x69b   :  { %5742 = vmatprep.subr.bf16.mxu1 %v6591_v39  ;;  %v6626_v39 = vld [vmem:[%s8432_s3 + $0x58] sm:$0xff]  }
 0x69c   :  { %6196 = vmatpush3.bf16.msra.mxu0 %v6601_v49  ;;  %v6636_v49 = vld [vmem:[%s8432_s3 + $0x80] sm:$0xff]  }
 0x69d   :  { %6197 = vmatprep.subr.bf16.mxu0 %v6836_v3 }
 0x69e   :  { %5743 = vmatpush3.bf16.msra.mxu1 %v6593_v41  ;;  %v6628_v41 = vld [vmem:[%s8432_s3 + $0x18] sm:$0xff]  }
 0x69f   :  { %5744 = vmatprep.subr.bf16.mxu1 %v6594_v42  ;;  %v6629_v42 = vld [vmem:[%s8432_s3 + $0x50] sm:$0xff]  }
 0x6a0   :  { %6198 = vmatpush3.bf16.msra.mxu0 %v6604_v52 }
 0x6a1   :  { %6199 = vmatprep.subr.bf16.mxu0 %v6836_v3 }
 0x6a2   :  { %5745 = vmatpush3.bf16.msra.mxu1 %v6596_v44  ;;  %v6631_v44 = vld [vmem:[%s8432_s3 + $0x10] sm:$0xff]  }
 0x6a3   :  { %5746 = vmatprep.subr.bf16.mxu1 %v6597_v45  ;;  %v6632_v45 = vld [vmem:[%s8432_s3 + $0x48] sm:$0xff]  }
 0x6a4   :  { %6200 = vmatpush3.bf16.msra.mxu0 %v6606_v55 }
 0x6a5   :  { %6201 = vmatprep.subr.bf16.mxu0 %v6836_v3 }
 0x6a6   :  { %5747 = vmatpush3.bf16.msra.mxu1 %v6599_v47  ;;  %v6634_v47 = vld [vmem:[%s8432_s3 + $0x8] sm:$0xff]  }
 0x6a7   :  { %5748 = vmatprep.subr.bf16.mxu1 %v6600_v48  ;;  %v6635_v48 = vld [vmem:[%s8432_s3 + $0x40] sm:$0xff]  }
 0x6a8   :  { %6202 = vmatpush3.bf16.msra.mxu0 %v6608_v56 }
 0x6a9   :  { %5774 = vmatprep.subr.bf16.mxu0 %v6614_v26  ;;  %v6650_v26 = vld [vmem:[%s8432_s3 + $0x58] sm:$0xff]  }
 0x6aa   :  { %5749 = vmatpush3.bf16.msra.mxu1 %v6602_v50  ;;  %v6637_v50 = vld [vmem:[%s8432_s3] sm:$0xff]  }
 0x6ab   :  { %5750 = vmatprep.subr.bf16.mxu1 %v6603_v51  ;;  %6204 = vmatmul.mubr.bf16.vlgmr.msra.gmra.mxu0 %v2219_v57  ;;  %v6638_v51 = vld [vmem:[%s8432_s3 + $0x78] sm:$0xff]  }
 0x6ac   :  { %5775 = vmatpush3.bf16.msra.mxu0 %v6616_v28  ;;  %v6652_v28 = vld [vmem:[%s8432_s3 + $0x18] sm:$0xff]  }
 0x6ad   :  { %5776 = vmatprep.subr.bf16.mxu0 %v6617_v29  ;;  %v6654_v29 = vld [vmem:[%s8432_s3 + $0x90] sm:$0xff]  }
 0x6ae   :  { %5751 = vmatpush3.bf16.msra.mxu1 %v6605_v53 }
 0x6af   :  { %6207 = vmatprep.subr.bf16.mxu1 %v6836_v3 }
 0x6b0   :  { %5777 = vmatpush3.bf16.msra.mxu0 %v6619_v31  ;;  %v6657_v31 = vld [vmem:[%s8432_s3 + $0x88] sm:$0xff]  }
 0x6b1   :  { %5778 = vmatprep.subr.bf16.mxu0 %v6620_v32  ;;  %v6658_v32 = vld [vmem:[%s8432_s3 + $0x8] sm:$0xff]  }
 0x6b4   :  { %5779 = vmatpush3.bf16.msra.mxu0 %v6622_v35  ;;  %v6661_v35 = vld [vmem:[%s8432_s3] sm:$0xff]  }
 0x6b5   :  { %5780 = vmatprep.subr.bf16.mxu0 %v6623_v36 }
 0x6b8   :  { %5781 = vmatpush3.bf16.msra.mxu0 %v6625_v38 }
 0x6b9   :  { %5782 = vmatprep.subr.bf16.mxu0 %v6626_v39  ;;  %v7844_v39 = vld [vmem:[%s8433_s4] ss:$0 sm:$0xff] }
 0x6bc   :  { %5783 = vmatpush3.bf16.msra.mxu0 %v6628_v41 }
 0x6bd   :  { %5784 = vmatprep.subr.bf16.mxu0 %v6629_v42 }
 0x6c0   :  { %5785 = vmatpush3.bf16.msra.mxu0 %v6631_v44 }
 0x6c1   :  { %5786 = vmatprep.subr.bf16.mxu0 %v6632_v45 }
 0x6c4   :  { %5787 = vmatpush3.bf16.msra.mxu0 %v6634_v47 }
 0x6c5   :  { %5788 = vmatprep.subr.bf16.mxu0 %v6635_v48 }
 0x6c8   :  { %5789 = vmatpush3.bf16.msra.mxu0 %v6637_v50 }
 0x6c9   :  { %5805 = vmatprep.subr.bf16.mxu0 %v6638_v51 }
 0x74b   :  { %v2204_v58 = vpop.f32.mrf.mxu0 }
 0x74d   :  { %v6185_v59 = vpop.f32.mrf.mxu0 }
 0x74f   :  { %v2207_v60 = vpop.f32.mrf.mxu0 }
 0x751   :  { %v5721_v61 = vpop.f32.mrf.mxu1  ;;  %v6186_v62 = vpop.f32.mrf.mxu0 }
 0x753   :  { %v5722_v1 = vpop.f32.mrf.mxu1 }
 0x754   :  { %v5723_v2 = vadd.f32 %v5722_v1, %v5721_v61 }
 0x755   :  { %v5724_v4 = vpop.f32.mrf.mxu1 }
 0x756   :  { %v2165_v5 = vadd.f32 %v5723_v2, %v1985_v63  ;;  %v6639_v4 = vld [vmem:[%s8432_s3 + $0xb8] sm:$0xff]  }
 0x757   :  { %v5725_v6 = vpop.f32.mrf.mxu1 }
 0x758   :  { %v2205_v7 = vadd.f32 %v2204_v58, %v2165_v5 }
 0x75a   :  { %v2210_v8 = vmax.f32 %v2205_v7, 0.0 }
 0x75c   :  { %2212 = vst [vmem:[#allocation2 + $0x1] sm:$0x1] %v2210_v8 }
 0x763   :  { %v2215_v9 = vld [vmem:[#allocation2 + $0x1] sm:$0x1] }
 0x764   :  { %v2218_v11 = vpack.c.bf16 %v2215_v9, %v2215_v9 }
 0x766   :  { %2445 = vmatprep.mubr.bf16.mxu1 %v2218_v11  ;;  %v6640_v11 = vld [vmem:[%s8432_s3 + $0x38] sm:$0xff]  }
 0x767   :  { %2446 = vmatmul.mubr.bf16.vlgmr.msra.gmra.mxu1 %v2217_v10 }
 0x768   :  { %6208 = vmatpush3.bf16.msra.mxu1 %v6607_v12  ;;  %6219 = vmatprep.mubr.msk.bf16.mxu1 %vm6837_vm0, %v6836_v3 }
 0x769   :  { %6209 = vmatprep.subr.bf16.mxu1 %v6836_v3 }
 0x76b   :  { %v7670_v23 = vpop.f32.mrf.mxu0 }
 0x76c   :  { %6210 = vmatpush3.bf16.msra.mxu1 %v6609_v13  ;;  %v6641_v13 = vld [vmem:[%s8432_s3 + $0x70] sm:$0xff]  }
 0x76d   :  { %6211 = vmatprep.subr.bf16.mxu1 %v6836_v3  ;;  %v6205_v24 = vpop.f32.mrf.mxu0 }
 0x76e   :  { %v6653_v24 = vld [vmem:[%s8432_s3 + $0x50] sm:$0xff]  }
 0x76f   :  { %v2490_v30 = vpop.f32.mrf.mxu0 }
 0x770   :  { %6212 = vmatpush3.bf16.msra.mxu1 %v6610_v14  ;;  %v6642_v14 = vld [vmem:[%s8432_s3 + $0xb0] sm:$0xff]   ;;  %v6656_v30 = vld [vmem:[%s8432_s3 + $0x48] sm:$0xff]  }
 0x771   :  { %6213 = vmatprep.subr.bf16.mxu1 %v6836_v3  ;;  %v6206_v33 = vpop.f32.mrf.mxu0 }
 0x772   :  { %v6659_v33 = vld [vmem:[%s8432_s3 + $0x40] sm:$0xff]  }
 0x774   :  { %6214 = vmatpush3.bf16.msra.mxu1 %v6611_v15  ;;  %v6643_v15 = vld [vmem:[%s8432_s3 + $0x30] sm:$0xff]  }
 0x775   :  { %6215 = vmatprep.subr.bf16.mxu1 %v6836_v3 }
 0x778   :  { %6216 = vmatpush3.bf16.msra.mxu1 %v6612_v16  ;;  %v6644_v16 = vld [vmem:[%s8432_s3 + $0x68] sm:$0xff]  }
 0x779   :  { %6217 = vmatprep.subr.bf16.mxu1 %v6836_v3 }
 0x77c   :  { %6218 = vmatpush3.bf16.msra.mxu1 %v6613_v18  ;;  %v6646_v18 = vld [vmem:[%s8432_s3 + $0x28] sm:$0xff]  }
 0x77d   :  { %6223 = vmatprep.subr.bf16.mxu1 %v6836_v3 }
 0x77f   :  { %6220 = vmatmul.mubr.msk.bf16.vlgmr.msra.gmra.mxu1 %vm108_vm3, %v2517_v21  ;;  %v6649_v21 = vld [vmem:[%s8432_s3 + $0x20] sm:$0xff]  }
 0x780   :  { %6239 = vmatprep.mubr.msk.bf16.mxu1 %vm6837_vm0, %v6836_v3  ;;  %6224 = vmatpush3.bf16.msra.mxu1 %v6615_v0  ;;  %v6651_v0 = vld [vmem:[%s8432_s3 + $0x98] sm:$0xff]  }
 0x781   :  { %6225 = vmatprep.subr.bf16.mxu1 %v6836_v3 }
 0x784   :  { %6226 = vmatpush3.bf16.msra.mxu1 %v6618_v54  ;;  %v6655_v54 = vld [vmem:[%s8432_s3 + $0x10] sm:$0xff]  }
 0x785   :  { %6227 = vmatprep.subr.bf16.mxu1 %v6836_v3 }
 0x788   :  { %6228 = vmatpush3.bf16.msra.mxu1 %v6621_v34  ;;  %v6660_v34 = vld [vmem:[%s8432_s3 + $0x80] sm:$0xff]  }
 0x789   :  { %6229 = vmatprep.subr.bf16.mxu1 %v6836_v3 }
 0x78c   :  { %6230 = vmatpush3.bf16.msra.mxu1 %v6624_v37 }
 0x78d   :  { %6231 = vmatprep.subr.bf16.mxu1 %v6836_v3 }
 0x790   :  { %6232 = vmatpush3.bf16.msra.mxu1 %v6627_v40 }
 0x791   :  { %6233 = vmatprep.subr.bf16.mxu1 %v6836_v3 }
 0x794   :  { %6234 = vmatpush3.bf16.msra.mxu1 %v6630_v43 }
 0x795   :  { %6235 = vmatprep.subr.bf16.mxu1 %v6836_v3 }
 0x798   :  { %6236 = vmatpush3.bf16.msra.mxu1 %v6633_v46 }
 0x799   :  { %6237 = vmatprep.subr.bf16.mxu1 %v6836_v3 }
 0x79c   :  { %6238 = vmatpush3.bf16.msra.mxu1 %v6636_v49 }
 0x79d   :  { %6243 = vmatprep.subr.bf16.mxu1 %v6836_v3 }
 0x827   :  { %v5752_v52 = vpop.f32.mrf.mxu1 }
 0x829   :  { %v5753_v53 = vpop.f32.mrf.mxu1 }
 0x82a   :  { %v7755_v55 = vadd.f32 %v5753_v53, %v5752_v52 }
 0x82b   :  { %v5755_v22 = vpop.f32.mrf.mxu1 }
 0x82d   :  { %v5756_v56 = vpop.f32.mrf.mxu1 }
 0x83f   :  { %v2609_v57 = vpop.f32.mrf.mxu1 }
 0x840   :  { %v2610_v58 = vadd.f32 %v5297_v25, %v2609_v57 }
 0x841   :  { %v6221_v59 = vpop.f32.mrf.mxu1 }
 0x842   :  { %v2616_v60 = vmax.f32 %v2610_v58, 0.0 }
 0x843   :  { %v2612_v61 = vpop.f32.mrf.mxu1 }
 0x844   :  { %2619 = vst [vmem:[#allocation2 + $0x1] sm:$0xff] %v2616_v60  ;;  %v2613_v62 = vadd.f32 %v5297_v25, %v2612_v61  ;;  %v6662_v61 = vld [vmem:[%s8432_s3 + $0x78] sm:$0xff]  }
 0x845   :  { %v6222_v63 = vpop.f32.mrf.mxu1 }
 0x846   :  { %v2617_v1 = vmax.f32 %v2613_v62, 0.0  ;;  %v6663_v62 = vld [vmem:[%s8432_s3 + $0xb8] sm:$0xff]  }
 0x847   :  { %v6664_v63 = vld [vmem:[%s8432_s3 + $0x38] sm:$0xff]  }
 0x848   :  { %2620 = vst [vmem:[#allocation2 + $0x9] sm:$0x3f] %v2617_v1  ;;  %v6665_v1 = vld [vmem:[%s8432_s3 + $0x70] sm:$0xff]  }
 0x84b   :  { %v2622_v2 = vld [vmem:[#allocation2] sm:$0xff] }
 0x84c   :  { %2914 = vst [vmem:[#allocation2] sm:$0x1] %v6836_v3 }
 0x84f   :  { %v2625_v5 = vld [vmem:[#allocation2 + $0x9] sm:$0x3f] }
 0x850   :  { %v2626_v6 = vld [vmem:[#allocation2 + $0x2] sm:$0xff]  ;;  %v2627_v7 = vld [vmem:[#allocation2 + $0xa] sm:$0x3f]  ;;  %v2629_v8 = vpack.c.bf16 %v2625_v5, %v2616_v60 }
 0x851   :  { %v2630_v9 = vpack.c.bf16 %v2627_v7, %v2626_v6  ;;  %2917 = vst [vmem:[#allocation2 + $0xf] sm:$0x1] %v6836_v3  ;;  %v2623_v10 = vld [vmem:[#allocation2 + $0x8] sm:$0x3f] }
 0x852   :  { %v2628_v12 = vpack.c.bf16 %v2623_v10, %v2622_v2  ;;  %2862 = vmatprep.mubr.bf16.mxu0 %v2629_v8  ;;  %v6666_v2 = vld [vmem:[%s8432_s3 + $0xb0] sm:$0xff]   ;;  %v6668_v5 = vld [vmem:[%s8432_s3 + $0x68] sm:$0xff]   ;;  %v6671_v8 = vld [vmem:[%s8432_s3 + $0x60] sm:$0xff]  }
 0x853   :  { %6240 = vmatmul.mubr.bf16.vlgmr.msra.gmra.mxu1 %v2630_v9  ;;  %v6669_v6 = vld [vmem:[%s8432_s3 + $0xa8] sm:$0xff]   ;;  %v6672_v9 = vld [vmem:[%s8432_s3 + $0xa0] sm:$0xff]  }
 0x854   :  { %2863 = vmatmul.mubr.bf16.vlgmr.msra.gmra.mxu0 %v2628_v12  ;;  %6244 = vmatpush3.bf16.msra.mxu1 %v6639_v4  ;;  %v6667_v4 = vld [vmem:[%s8432_s3 + $0x30] sm:$0xff]   ;;  %v6670_v7 = vld [vmem:[%s8432_s3 + $0x28] sm:$0xff]   ;;  %v6673_v10 = vld [vmem:[%s8432_s3 + $0x20] sm:$0xff]  }
 0x855   :  { %5806 = vmatpush3.bf16.msra.mxu0 %v6640_v11  ;;  %6245 = vmatprep.subr.bf16.mxu1 %v6836_v3  ;;  %v6674_v11 = vld [vmem:[%s8432_s3 + $0x58] sm:$0xff]  }
 0x856   :  { %5807 = vmatprep.subr.bf16.mxu0 %v6641_v13  ;;  %6259 = vmatprep.mubr.msk.bf16.mxu1 %vm6837_vm0, %v6836_v3  ;;  %v6675_v12 = vld [vmem:[%s8432_s3 + $0x98] sm:$0xff]  }
 0x857   :  { %v6676_v13 = vld [vmem:[%s8432_s3 + $0x18] sm:$0xff]  }
 0x858   :  { %6246 = vmatpush3.bf16.msra.mxu1 %v6642_v14  ;;  %v6677_v14 = vld [vmem:[%s8432_s3 + $0x50] sm:$0xff]  }
 0x859   :  { %6247 = vmatprep.subr.bf16.mxu1 %v6836_v3  ;;  %5808 = vmatpush3.bf16.msra.mxu0 %v6643_v15  ;;  %v6678_v15 = vld [vmem:[%s8432_s3 + $0x90] sm:$0xff]  }
 0x85a   :  { %5809 = vmatprep.subr.bf16.mxu0 %v6644_v16  ;;  %v6679_v16 = vld [vmem:[%s8432_s3 + $0x10] sm:$0xff]  }
 0x85c   :  { %6248 = vmatpush3.bf16.msra.mxu1 %v6645_v17  ;;  %v6680_v17 = vld [vmem:[%s8432_s3 + $0x48] sm:$0xff]  }
 0x85d   :  { %5810 = vmatpush3.bf16.msra.mxu0 %v6646_v18  ;;  %6249 = vmatprep.subr.bf16.mxu1 %v6836_v3  ;;  %v6681_v18 = vld [vmem:[%s8432_s3 + $0x88] sm:$0xff]  }
 0x85e   :  { %5811 = vmatprep.subr.bf16.mxu0 %v6647_v19  ;;  %v6682_v19 = vld [vmem:[%s8432_s3 + $0x8] sm:$0xff]  }
 0x860   :  { %6250 = vmatpush3.bf16.msra.mxu1 %v6648_v20  ;;  %v6683_v20 = vld [vmem:[%s8432_s3 + $0x40] sm:$0xff]  }
 0x861   :  { %5812 = vmatpush3.bf16.msra.mxu0 %v6649_v21  ;;  %6251 = vmatprep.subr.bf16.mxu1 %v6836_v3  ;;  %v6684_v21 = vld [vmem:[%s8432_s3 + $0x80] sm:$0xff]  }
 0x862   :  { %5813 = vmatprep.subr.bf16.mxu0 %v6650_v26  ;;  %v6685_v26 = vld [vmem:[%s8432_s3] sm:$0xff]  }
 0x864   :  { %6252 = vmatpush3.bf16.msra.mxu1 %v6651_v0  ;;  %v6686_v0 = vld [vmem:[%s8432_s3 + $0x78] sm:$0xff]  }
 0x865   :  { %5814 = vmatpush3.bf16.msra.mxu0 %v6652_v28  ;;  %6253 = vmatprep.subr.bf16.mxu1 %v6836_v3 }
 0x866   :  { %5815 = vmatprep.subr.bf16.mxu0 %v6653_v24 }
 0x868   :  { %6254 = vmatpush3.bf16.msra.mxu1 %v6654_v29 }
 0x869   :  { %5816 = vmatpush3.bf16.msra.mxu0 %v6655_v54  ;;  %6255 = vmatprep.subr.bf16.mxu1 %v6836_v3 }
 0x86a   :  { %5817 = vmatprep.subr.bf16.mxu0 %v6656_v30 }
 0x86c   :  { %6256 = vmatpush3.bf16.msra.mxu1 %v6657_v31 }
 0x86d   :  { %5818 = vmatpush3.bf16.msra.mxu0 %v6658_v32  ;;  %6257 = vmatprep.subr.bf16.mxu1 %v6836_v3 }
 0x86e   :  { %5819 = vmatprep.subr.bf16.mxu0 %v6659_v33 }
 0x870   :  { %6258 = vmatpush3.bf16.msra.mxu1 %v6660_v34 }
 0x871   :  { %5820 = vmatpush3.bf16.msra.mxu0 %v6661_v35  ;;  %6263 = vmatprep.subr.bf16.mxu1 %v6836_v3 }
 0x872   :  { %5836 = vmatprep.subr.bf16.mxu0 %v6662_v61  ;;  %v6695_v61 = vld [vmem:[%s8432_s3 + $0x60] sm:$0xff]  }
 0x913   :  { %v2905_v36 = vpop.f32.mrf.mxu1 }
 0x914   :  { %v5790_v37 = vpop.f32.mrf.mxu0 }
 0x915   :  { %v6241_v38 = vpop.f32.mrf.mxu1 }
 0x916   :  { %v5791_v40 = vpop.f32.mrf.mxu0 }
 0x917   :  { %v5792_v41 = vadd.f32 %v5791_v40, %v5790_v37  ;;  %v2908_v42 = vpop.f32.mrf.mxu1 }
 0x918   :  { %v5793_v43 = vpop.f32.mrf.mxu0 }
 0x919   :  { %v2865_v44 = vadd.f32 %v5792_v41, %v7844_v39  ;;  %v6242_v45 = vpop.f32.mrf.mxu1 }
 0x91a   :  { %v5794_v46 = vpop.f32.mrf.mxu0 }
 0x91b   :  { %v2906_v47 = vadd.f32 %v2905_v36, %v2865_v44  ;;  %v5795_v48 = vadd.f32 %v5794_v46, %v5793_v43 }
 0x91d   :  { %v2912_v49 = vmax.f32 %v2906_v47, 0.0  ;;  %v2868_v50 = vadd.f32 %v5795_v48, %v7844_v39  ;;  %v6687_v47 = vld [vmem:[%s8432_s3 + $0xb8] sm:$0xff]  }
 0x91f   :  { %2915 = vst [vmem:[#allocation2 + $0x1] sm:$0xff] %v2912_v49  ;;  %v2909_v51 = vadd.f32 %v2908_v42, %v2868_v50 }
 0x921   :  { %v2913_v52 = vmax.f32 %v2909_v51, 0.0 }
 0x923   :  { %2916 = vst [vmem:[#allocation2 + $0x9] sm:$0x3f] %v2913_v52 }
 0x926   :  { %v2918_v58 = vld [vmem:[#allocation2] sm:$0xff] }
 0x92a   :  { %v2921_v53 = vld [vmem:[#allocation2 + $0x9] sm:$0x3f] }
 0x92b   :  { %v2922_v22 = vld [vmem:[#allocation2 + $0x2] sm:$0xff]  ;;  %v2923_v56 = vld [vmem:[#allocation2 + $0xa] sm:$0x3f]  ;;  %v2925_v25 = vpack.c.bf16 %v2921_v53, %v2912_v49 }
 0x92c   :  { %v2926_v57 = vpack.c.bf16 %v2923_v56, %v2922_v22  ;;  %3210 = vst [vmem:[#allocation2 + $0xe] sm:$0x1] %v6836_v3  ;;  %v2919_v59 = vld [vmem:[#allocation2 + $0x8] sm:$0x3f]  ;;  %v6688_v22 = vld [vmem:[%s8432_s3 + $0x38] sm:$0xff]   ;;  %v6689_v56 = vld [vmem:[%s8432_s3 + $0x70] sm:$0xff]  }
 0x92d   :  { %v2924_v60 = vpack.c.bf16 %v2919_v59, %v2918_v58  ;;  %3158 = vmatprep.mubr.bf16.mxu0 %v2925_v25  ;;  %v6690_v25 = vld [vmem:[%s8432_s3 + $0xb0] sm:$0xff]   ;;  %v6692_v58 = vld [vmem:[%s8432_s3 + $0x68] sm:$0xff]  }
 0x92e   :  { %6260 = vmatmul.mubr.bf16.vlgmr.msra.gmra.mxu1 %v2926_v57  ;;  %v6691_v57 = vld [vmem:[%s8432_s3 + $0x30] sm:$0xff]   ;;  %v6693_v59 = vld [vmem:[%s8432_s3 + $0xa8] sm:$0xff]  }
 0x92f   :  { %3159 = vmatmul.mubr.bf16.vlgmr.msra.gmra.mxu0 %v2924_v60  ;;  %6279 = vmatprep.mubr.msk.bf16.mxu1 %vm6837_vm0, %v6836_v3  ;;  %v6694_v60 = vld [vmem:[%s8432_s3 + $0x28] sm:$0xff]  }
 0x930   :  { %6264 = vmatpush3.bf16.msra.mxu1 %v6663_v62  ;;  %5837 = vmatpush3.bf16.msra.mxu0 %v6664_v63  ;;  %v6696_v62 = vld [vmem:[%s8432_s3 + $0xa0] sm:$0xff]  }
 0x931   :  { %6265 = vmatprep.subr.bf16.mxu1 %v6836_v3  ;;  %5838 = vmatprep.subr.bf16.mxu0 %v6665_v1  ;;  %v6697_v63 = vld [vmem:[%s8432_s3 + $0x20] sm:$0xff]   ;;  %v6698_v1 = vld [vmem:[%s8432_s3 + $0x58] sm:$0xff]  }
 0x934   :  { %6266 = vmatpush3.bf16.msra.mxu1 %v6666_v2  ;;  %5839 = vmatpush3.bf16.msra.mxu0 %v6667_v4  ;;  %v6699_v2 = vld [vmem:[%s8432_s3 + $0x98] sm:$0xff]  }
 0x935   :  { %6267 = vmatprep.subr.bf16.mxu1 %v6836_v3  ;;  %5840 = vmatprep.subr.bf16.mxu0 %v6668_v5  ;;  %v6700_v4 = vld [vmem:[%s8432_s3 + $0x18] sm:$0xff]   ;;  %v6701_v5 = vld [vmem:[%s8432_s3 + $0x50] sm:$0xff]  }
 0x938   :  { %6268 = vmatpush3.bf16.msra.mxu1 %v6669_v6  ;;  %5841 = vmatpush3.bf16.msra.mxu0 %v6670_v7  ;;  %v6702_v6 = vld [vmem:[%s8432_s3 + $0x90] sm:$0xff]  }
 0x939   :  { %6269 = vmatprep.subr.bf16.mxu1 %v6836_v3  ;;  %5842 = vmatprep.subr.bf16.mxu0 %v6671_v8  ;;  %v6703_v7 = vld [vmem:[%s8432_s3 + $0x10] sm:$0xff]   ;;  %v6704_v8 = vld [vmem:[%s8432_s3 + $0x48] sm:$0xff]  }
 0x93c   :  { %6270 = vmatpush3.bf16.msra.mxu1 %v6672_v9  ;;  %5843 = vmatpush3.bf16.msra.mxu0 %v6673_v10  ;;  %v6705_v9 = vld [vmem:[%s8432_s3 + $0x88] sm:$0xff]  }
 0x93d   :  { %6271 = vmatprep.subr.bf16.mxu1 %v6836_v3  ;;  %5844 = vmatprep.subr.bf16.mxu0 %v6674_v11  ;;  %v6706_v10 = vld [vmem:[%s8432_s3 + $0x8] sm:$0xff]   ;;  %v6707_v11 = vld [vmem:[%s8432_s3 + $0x40] sm:$0xff]  }
 0x940   :  { %6272 = vmatpush3.bf16.msra.mxu1 %v6675_v12  ;;  %5845 = vmatpush3.bf16.msra.mxu0 %v6676_v13  ;;  %v6708_v12 = vld [vmem:[%s8432_s3 + $0x80] sm:$0xff]  }
 0x941   :  { %6273 = vmatprep.subr.bf16.mxu1 %v6836_v3  ;;  %5846 = vmatprep.subr.bf16.mxu0 %v6677_v14  ;;  %v6709_v13 = vld [vmem:[%s8432_s3] sm:$0xff]  }
 0x944   :  { %6274 = vmatpush3.bf16.msra.mxu1 %v6678_v15  ;;  %5847 = vmatpush3.bf16.msra.mxu0 %v6679_v16 }
 0x945   :  { %6275 = vmatprep.subr.bf16.mxu1 %v6836_v3  ;;  %5848 = vmatprep.subr.bf16.mxu0 %v6680_v17 }
 0x948   :  { %6276 = vmatpush3.bf16.msra.mxu1 %v6681_v18  ;;  %5849 = vmatpush3.bf16.msra.mxu0 %v6682_v19 }
 0x949   :  { %6277 = vmatprep.subr.bf16.mxu1 %v6836_v3  ;;  %5850 = vmatprep.subr.bf16.mxu0 %v6683_v20 }
 0x94c   :  { %6278 = vmatpush3.bf16.msra.mxu1 %v6684_v21  ;;  %5851 = vmatpush3.bf16.msra.mxu0 %v6685_v26 }
 0x94d   :  { %6283 = vmatprep.subr.bf16.mxu1 %v6836_v3  ;;  %5867 = vmatprep.subr.bf16.mxu0 %v6686_v0 }
 0x9ee   :  { %v3201_v28 = vpop.f32.mrf.mxu1 }
 0x9ef   :  { %v5821_v24 = vpop.f32.mrf.mxu0 }
 0x9f0   :  { %v6261_v29 = vpop.f32.mrf.mxu1 }
 0x9f1   :  { %v5822_v54 = vpop.f32.mrf.mxu0 }
 0x9f2   :  { %v5823_v30 = vadd.f32 %v5822_v54, %v5821_v24  ;;  %v3204_v31 = vpop.f32.mrf.mxu1 }
 0x9f3   :  { %v5824_v32 = vpop.f32.mrf.mxu0 }
 0x9f4   :  { %v3161_v33 = vadd.f32 %v5823_v30, %v7844_v39  ;;  %v6262_v34 = vpop.f32.mrf.mxu1 }
 0x9f5   :  { %v5825_v35 = vpop.f32.mrf.mxu0  ;;  %v6710_v34 = vld [vmem:[%s8432_s3 + $0x78] sm:$0xff]  }
 0x9f6   :  { %v3202_v36 = vadd.f32 %v3201_v28, %v3161_v33  ;;  %v5826_v37 = vadd.f32 %v5825_v35, %v5824_v32  ;;  %v6711_v35 = vld [vmem:[%s8432_s3 + $0xb8] sm:$0xff]  }
 0x9f8   :  { %3208 = vst [vmem:[#allocation2] sm:$0xff] %v3202_v36  ;;  %v3164_v38 = vadd.f32 %v5826_v37, %v7844_v39  ;;  %v6712_v36 = vld [vmem:[%s8432_s3 + $0x38] sm:$0xff]   ;;  %v6713_v37 = vld [vmem:[%s8432_s3 + $0x70] sm:$0xff]  }
 0x9fa   :  { %v3205_v40 = vadd.f32 %v3204_v31, %v3164_v38  ;;  %v6714_v38 = vld [vmem:[%s8432_s3 + $0xb0] sm:$0xff]  }
 0x9fc   :  { %3209 = vst [vmem:[#allocation2 + $0x8] sm:$0x3f] %v3205_v40  ;;  %v6715_v40 = vld [vmem:[%s8432_s3 + $0x30] sm:$0xff]  }
 0xa03   :  { %v3211_v41 = vld [vmem:[#allocation2] ss:$2 sm:$0x7f]  ;;  %v3212_v42 = vld [vmem:[#allocation2 + $0x1] ss:$2 sm:$0x7f] }
 0xa04   :  { %v3213_v43 = vmax.f32 %v3211_v41, %v3212_v42  ;;  %v3214_v44 = vld [vmem:[#allocation2 + $0x2] ss:$2 sm:$0x7f]  ;;  %3217 = vst [vmem:[#allocation2] sm:$0x1] %v6836_v3 }
 0xa05   :  { %3219 = vst [vmem:[#allocation2 + $0x8] sm:$0x1] %v6836_v3  ;;  %v6716_v41 = vld [vmem:[%s8432_s3 + $0x68] sm:$0xff]  }
 0xa06   :  { %v7938_v45 = vmax.f32 %v3213_v43, %v3214_v44  ;;  %v6717_v42 = vld [vmem:[%s8432_s3 + $0xa8] sm:$0xff]   ;;  %v6719_v44 = vld [vmem:[%s8432_s3 + $0x60] sm:$0xff]  }
 0xa07   :  { %v6718_v43 = vld [vmem:[%s8432_s3 + $0x28] sm:$0xff]  }
 0xa08   :  { %v3216_v46 = vmax.f32 %v7938_v45, 0.0 }
 0xa0a   :  { %3218 = vst [vmem:[#allocation2 + $0x1] sm:$0x7f] %v3216_v46  ;;  %v6720_v46 = vld [vmem:[%s8432_s3 + $0xa0] sm:$0xff]  }
 0xa11   :  { %v3221_v48 = vld [vmem:[#allocation2 + $0x1] sm:$0x7f] }
 0xa12   :  { %v3222_v49 = vld [vmem:[#allocation2 + $0x2] sm:$0x7f]  ;;  %v3224_v51 = vpack.c.bf16 %v3221_v48, %v3221_v48  ;;  %v6722_v48 = vld [vmem:[%s8432_s3 + $0x58] sm:$0xff]  }
 0xa13   :  { %v3220_v50 = vld [vmem:[#allocation2] sm:$0x7f]  ;;  %v3225_v52 = vpack.c.bf16 %v3222_v49, %v3222_v49  ;;  %3508 = vst [vmem:[#allocation2 + $0x8] sm:$0x1] %v6836_v3  ;;  %v6723_v49 = vld [vmem:[%s8432_s3 + $0x98] sm:$0xff]  }
 0xa14   :  { %v3223_v53 = vpack.c.bf16 %v3220_v50, %v3220_v50  ;;  %3506 = vst [vmem:[#allocation2] sm:$0x1] %v6836_v3  ;;  %3457 = vmatprep.mubr.bf16.mxu0 %v3224_v51  ;;  %v6724_v50 = vld [vmem:[%s8432_s3 + $0x18] sm:$0xff]   ;;  %v6725_v51 = vld [vmem:[%s8432_s3 + $0x50] sm:$0xff]  }
 0xa15   :  { %6280 = vmatmul.mubr.bf16.vlgmr.msra.gmra.mxu1 %v3225_v52  ;;  %v6726_v52 = vld [vmem:[%s8432_s3 + $0x90] sm:$0xff]  }
 0xa16   :  { %3458 = vmatmul.mubr.bf16.vlgmr.msra.gmra.mxu0 %v3223_v53  ;;  %6284 = vmatpush3.bf16.msra.mxu1 %v6687_v47  ;;  %v6721_v47 = vld [vmem:[%s8432_s3 + $0x20] sm:$0xff]   ;;  %v6727_v53 = vld [vmem:[%s8432_s3 + $0x10] sm:$0xff]  }
 0xa17   :  { %5868 = vmatpush3.bf16.msra.mxu0 %v6688_v22  ;;  %6285 = vmatprep.subr.bf16.mxu1 %v6836_v3  ;;  %v6728_v22 = vld [vmem:[%s8432_s3 + $0x48] sm:$0xff]  }
 0xa18   :  { %5869 = vmatprep.subr.bf16.mxu0 %v6689_v56  ;;  %6299 = vmatprep.mubr.msk.bf16.mxu1 %vm6837_vm0, %v6836_v3  ;;  %v6729_v56 = vld [vmem:[%s8432_s3 + $0x88] sm:$0xff]  }
 0xa1a   :  { %6286 = vmatpush3.bf16.msra.mxu1 %v6690_v25  ;;  %v6730_v25 = vld [vmem:[%s8432_s3 + $0x8] sm:$0xff]  }
 0xa1b   :  { %5870 = vmatpush3.bf16.msra.mxu0 %v6691_v57  ;;  %6287 = vmatprep.subr.bf16.mxu1 %v6836_v3  ;;  %v6731_v57 = vld [vmem:[%s8432_s3 + $0x40] sm:$0xff]  }
 0xa1c   :  { %5871 = vmatprep.subr.bf16.mxu0 %v6692_v58  ;;  %v6732_v58 = vld [vmem:[%s8432_s3 + $0x80] sm:$0xff]  }
 0xa1e   :  { %6288 = vmatpush3.bf16.msra.mxu1 %v6693_v59  ;;  %v6733_v59 = vld [vmem:[%s8432_s3] sm:$0xff]  }
 0xa1f   :  { %6289 = vmatprep.subr.bf16.mxu1 %v6836_v3  ;;  %5872 = vmatpush3.bf16.msra.mxu0 %v6694_v60  ;;  %v6734_v60 = vld [vmem:[%s8432_s3 + $0x78] sm:$0xff]  }
 0xa20   :  { %5873 = vmatprep.subr.bf16.mxu0 %v6695_v61 }
 0xa22   :  { %6290 = vmatpush3.bf16.msra.mxu1 %v6696_v62 }
 0xa23   :  { %5874 = vmatpush3.bf16.msra.mxu0 %v6697_v63  ;;  %6291 = vmatprep.subr.bf16.mxu1 %v6836_v3 }
 0xa24   :  { %5875 = vmatprep.subr.bf16.mxu0 %v6698_v1 }
 0xa26   :  { %6292 = vmatpush3.bf16.msra.mxu1 %v6699_v2 }
 0xa27   :  { %5876 = vmatpush3.bf16.msra.mxu0 %v6700_v4  ;;  %6293 = vmatprep.subr.bf16.mxu1 %v6836_v3 }
 0xa28   :  { %5877 = vmatprep.subr.bf16.mxu0 %v6701_v5 }
 0xa2a   :  { %6294 = vmatpush3.bf16.msra.mxu1 %v6702_v6 }
 0xa2b   :  { %5878 = vmatpush3.bf16.msra.mxu0 %v6703_v7  ;;  %6295 = vmatprep.subr.bf16.mxu1 %v6836_v3 }
 0xa2c   :  { %5879 = vmatprep.subr.bf16.mxu0 %v6704_v8 }
 0xa2e   :  { %6296 = vmatpush3.bf16.msra.mxu1 %v6705_v9 }
 0xa2f   :  { %5880 = vmatpush3.bf16.msra.mxu0 %v6706_v10  ;;  %6297 = vmatprep.subr.bf16.mxu1 %v6836_v3 }
 0xa30   :  { %5881 = vmatprep.subr.bf16.mxu0 %v6707_v11 }
 0xa32   :  { %6298 = vmatpush3.bf16.msra.mxu1 %v6708_v12 }
 0xa33   :  { %5882 = vmatpush3.bf16.msra.mxu0 %v6709_v13  ;;  %6303 = vmatprep.subr.bf16.mxu1 %v6836_v3 }
 0xa34   :  { %5898 = vmatprep.subr.bf16.mxu0 %v6710_v34  ;;  %v6746_v34 = vld [vmem:[%s8432_s3 + $0x58] sm:$0xff]  }
 0xad5   :  { %v3499_v14 = vpop.f32.mrf.mxu1 }
 0xad6   :  { %v5852_v15 = vpop.f32.mrf.mxu0 }
 0xad7   :  { %v6281_v16 = vpop.f32.mrf.mxu1 }
 0xad8   :  { %v5853_v17 = vpop.f32.mrf.mxu0 }
 0xad9   :  { %v5854_v18 = vadd.f32 %v5853_v17, %v5852_v15  ;;  %v3502_v19 = vpop.f32.mrf.mxu1 }
 0xada   :  { %v5855_v20 = vpop.f32.mrf.mxu0 }
 0xadb   :  { %v3460_v21 = vadd.f32 %v5854_v18, %v7844_v39  ;;  %v6282_v26 = vpop.f32.mrf.mxu1 }
 0xadc   :  { %v5856_v0 = vpop.f32.mrf.mxu0  ;;  %v6736_v26 = vld [vmem:[%s8432_s3 + $0x38] sm:$0xff]  }
 0xadd   :  { %v3500_v28 = vadd.f32 %v3499_v14, %v3460_v21  ;;  %v6737_v0 = vld [vmem:[%s8432_s3 + $0x70] sm:$0xff]  }
 0xadf   :  { %v3505_v24 = vmax.f32 %v3500_v28, 0.0  ;;  %v6738_v28 = vld [vmem:[%s8432_s3 + $0xb0] sm:$0xff]  }
 0xae1   :  { %3507 = vst [vmem:[#allocation2 + $0x1] sm:$0x7f] %v3505_v24  ;;  %v6739_v24 = vld [vmem:[%s8432_s3 + $0x30] sm:$0xff]  }
 0xae8   :  { %v3510_v29 = vld [vmem:[#allocation2 + $0x1] sm:$0x7f] }
 0xae9   :  { %v3511_v54 = vld [vmem:[#allocation2 + $0x2] sm:$0x7f]  ;;  %v3513_v31 = vpack.c.bf16 %v3510_v29, %v3510_v29 }
 0xaea   :  { %v3509_v30 = vld [vmem:[#allocation2] sm:$0x7f]  ;;  %v3514_v32 = vpack.c.bf16 %v3511_v54, %v3511_v54  ;;  %3796 = vst [vmem:[#allocation2 + $0x7] sm:$0x1] %v6836_v3  ;;  %v6740_v29 = vld [vmem:[%s8432_s3 + $0x68] sm:$0xff]  }
 0xaeb   :  { %v3512_v33 = vpack.c.bf16 %v3509_v30, %v3509_v30  ;;  %3746 = vmatprep.mubr.bf16.mxu0 %v3513_v31  ;;  %v6741_v54 = vld [vmem:[%s8432_s3 + $0xa8] sm:$0xff]   ;;  %v6743_v31 = vld [vmem:[%s8432_s3 + $0x60] sm:$0xff]  }
 0xaec   :  { %6300 = vmatmul.mubr.bf16.vlgmr.msra.gmra.mxu1 %v3514_v32  ;;  %v6742_v30 = vld [vmem:[%s8432_s3 + $0x28] sm:$0xff]   ;;  %v6744_v32 = vld [vmem:[%s8432_s3 + $0xa0] sm:$0xff]  }
 0xaed   :  { %3747 = vmatmul.mubr.bf16.vlgmr.msra.gmra.mxu0 %v3512_v33  ;;  %6319 = vmatprep.mubr.msk.bf16.mxu1 %vm6837_vm0, %v6836_v3  ;;  %v6745_v33 = vld [vmem:[%s8432_s3 + $0x20] sm:$0xff]  }
 0xaee   :  { %6304 = vmatpush3.bf16.msra.mxu1 %v6711_v35  ;;  %5899 = vmatpush3.bf16.msra.mxu0 %v6712_v36  ;;  %v6747_v35 = vld [vmem:[%s8432_s3 + $0x98] sm:$0xff]  }
 0xaef   :  { %6305 = vmatprep.subr.bf16.mxu1 %v6836_v3  ;;  %5900 = vmatprep.subr.bf16.mxu0 %v6713_v37  ;;  %v6748_v36 = vld [vmem:[%s8432_s3 + $0x18] sm:$0xff]   ;;  %v6749_v37 = vld [vmem:[%s8432_s3 + $0x50] sm:$0xff]  }
 0xaf2   :  { %6306 = vmatpush3.bf16.msra.mxu1 %v6714_v38  ;;  %5901 = vmatpush3.bf16.msra.mxu0 %v6715_v40  ;;  %v6750_v38 = vld [vmem:[%s8432_s3 + $0x90] sm:$0xff]  }
 0xaf3   :  { %6307 = vmatprep.subr.bf16.mxu1 %v6836_v3  ;;  %5902 = vmatprep.subr.bf16.mxu0 %v6716_v41  ;;  %v6751_v40 = vld [vmem:[%s8432_s3 + $0x10] sm:$0xff]   ;;  %v6752_v41 = vld [vmem:[%s8432_s3 + $0x48] sm:$0xff]  }
 0xaf6   :  { %6308 = vmatpush3.bf16.msra.mxu1 %v6717_v42  ;;  %5903 = vmatpush3.bf16.msra.mxu0 %v6718_v43  ;;  %v6753_v42 = vld [vmem:[%s8432_s3 + $0x88] sm:$0xff]  }
 0xaf7   :  { %6309 = vmatprep.subr.bf16.mxu1 %v6836_v3  ;;  %5904 = vmatprep.subr.bf16.mxu0 %v6719_v44  ;;  %v6754_v43 = vld [vmem:[%s8432_s3 + $0x8] sm:$0xff]   ;;  %v6755_v44 = vld [vmem:[%s8432_s3 + $0x40] sm:$0xff]  }
 0xafa   :  { %6310 = vmatpush3.bf16.msra.mxu1 %v6720_v46  ;;  %5905 = vmatpush3.bf16.msra.mxu0 %v6721_v47  ;;  %v6756_v46 = vld [vmem:[%s8432_s3 + $0x80] sm:$0xff]  }
 0xafb   :  { %6311 = vmatprep.subr.bf16.mxu1 %v6836_v3  ;;  %5906 = vmatprep.subr.bf16.mxu0 %v6722_v48  ;;  %v6757_v47 = vld [vmem:[%s8432_s3] sm:$0xff]  }
 0xafe   :  { %6312 = vmatpush3.bf16.msra.mxu1 %v6723_v49  ;;  %5907 = vmatpush3.bf16.msra.mxu0 %v6724_v50 }
 0xaff   :  { %6313 = vmatprep.subr.bf16.mxu1 %v6836_v3  ;;  %5908 = vmatprep.subr.bf16.mxu0 %v6725_v51  ;;  %v8200_v51 = vld [vmem:[%s8433_s4] ss:$0 sm:$0xff] }
 0xb02   :  { %6314 = vmatpush3.bf16.msra.mxu1 %v6726_v52  ;;  %5909 = vmatpush3.bf16.msra.mxu0 %v6727_v53 }
 0xb03   :  { %6315 = vmatprep.subr.bf16.mxu1 %v6836_v3  ;;  %5910 = vmatprep.subr.bf16.mxu0 %v6728_v22 }
 0xb06   :  { %6316 = vmatpush3.bf16.msra.mxu1 %v6729_v56  ;;  %5911 = vmatpush3.bf16.msra.mxu0 %v6730_v25 }
 0xb07   :  { %6317 = vmatprep.subr.bf16.mxu1 %v6836_v3  ;;  %5912 = vmatprep.subr.bf16.mxu0 %v6731_v57 }
 0xb0a   :  { %6318 = vmatpush3.bf16.msra.mxu1 %v6732_v58  ;;  %5913 = vmatpush3.bf16.msra.mxu0 %v6733_v59 }
 0xb0b   :  { %6323 = vmatprep.subr.bf16.mxu1 %v6836_v3  ;;  %5929 = vmatprep.subr.bf16.mxu0 %v6734_v60 }
 0xbac   :  { %v3788_v61 = vpop.f32.mrf.mxu1 }
 0xbad   :  { %v5883_v62 = vpop.f32.mrf.mxu0 }
 0xbae   :  { %v6301_v63 = vpop.f32.mrf.mxu1 }
 0xbaf   :  { %v5884_v1 = vpop.f32.mrf.mxu0 }
 0xbb0   :  { %v5885_v2 = vadd.f32 %v5884_v1, %v5883_v62  ;;  %v3791_v4 = vpop.f32.mrf.mxu1 }
 0xbb1   :  { %v5886_v5 = vpop.f32.mrf.mxu0 }
 0xbb2   :  { %v3749_v6 = vadd.f32 %v5885_v2, %v7844_v39  ;;  %v6302_v7 = vpop.f32.mrf.mxu1  ;;  %v6735_v39 = vld [vmem:[%s8432_s3 + $0xb8] sm:$0xff]  }
 0xbb3   :  { %v5887_v8 = vpop.f32.mrf.mxu0  ;;  %v6758_v5 = vld [vmem:[%s8432_s3 + $0x78] sm:$0xff]  }
 0xbb4   :  { %v3789_v9 = vadd.f32 %v3788_v61, %v3749_v6  ;;  %v6759_v6 = vld [vmem:[%s8432_s3 + $0x38] sm:$0xff]   ;;  %v6761_v8 = vld [vmem:[%s8432_s3 + $0x70] sm:$0xff]  }
 0xbb5   :  { %v6760_v7 = vld [vmem:[%s8432_s3 + $0xb8] sm:$0xff]  }
 0xbb6   :  { %v3794_v10 = vadd.f32 %v3789_v9, %v7938_v45  ;;  %v6762_v9 = vld [vmem:[%s8432_s3 + $0x30] sm:$0xff]  }
 0xbb8   :  { %3795 = vst [vmem:[#allocation2] sm:$0x7f] %v3794_v10  ;;  %v6763_v10 = vld [vmem:[%s8432_s3 + $0xb0] sm:$0xff]  }
 0xbbf   :  { %v3797_v11 = vld [vmem:[#allocation2] ss:$2 sm:$0x7]  ;;  %v3798_v12 = vld [vmem:[#allocation2 + $0x1] ss:$2 sm:$0x7] }
 0xbc0   :  { %v3799_v13 = vmax.f32 %v3797_v11, %v3798_v12  ;;  %v3800_v14 = vld [vmem:[#allocation2 + $0x2] ss:$2 sm:$0x7]  ;;  %3803 = vst [vmem:[#allocation2] sm:$0x1] %v6836_v3  ;;  %v6764_v11 = vld [vmem:[%s8432_s3 + $0x68] sm:$0xff]  }
 0xbc1   :  { %3805 = vst [vmem:[#allocation2 + $0x4] sm:$0x1] %v6836_v3  ;;  %v6765_v12 = vld [vmem:[%s8432_s3 + $0x28] sm:$0xff]  }
 0xbc2   :  { %v8113_v15 = vmax.f32 %v3799_v13, %v3800_v14  ;;  %v6766_v13 = vld [vmem:[%s8432_s3 + $0xa8] sm:$0xff]   ;;  %v6767_v14 = vld [vmem:[%s8432_s3 + $0x60] sm:$0xff]  }
 0xbc4   :  { %v3802_v16 = vmax.f32 %v8113_v15, 0.0 }
 0xbc6   :  { %3804 = vst [vmem:[#allocation2 + $0x1] sm:$0x7] %v3802_v16  ;;  %v6768_v16 = vld [vmem:[%s8432_s3 + $0x20] sm:$0xff]  }
 0xbcd   :  { %v3807_v17 = vld [vmem:[#allocation2 + $0x1] sm:$0x7] }
 0xbce   :  { %v3808_v45 = vld [vmem:[#allocation2 + $0x2] sm:$0x7]  ;;  %v3810_v19 = vpack.c.bf16 %v3807_v17, %v3807_v17  ;;  %v6770_v17 = vld [vmem:[%s8432_s3 + $0x58] sm:$0xff]  }
 0xbcf   :  { %v3806_v18 = vld [vmem:[#allocation2] sm:$0x7]  ;;  %v3811_v20 = vpack.c.bf16 %v3808_v45, %v3808_v45  ;;  %4094 = vst [vmem:[#allocation2 + $0x4] sm:$0x1] %v6836_v3  ;;  %v6771_v45 = vld [vmem:[%s8432_s3 + $0x18] sm:$0xff]  }
 0xbd0   :  { %v3809_v21 = vpack.c.bf16 %v3806_v18, %v3806_v18  ;;  %4092 = vst [vmem:[#allocation2] sm:$0x1] %v6836_v3  ;;  %4043 = vmatprep.mubr.bf16.mxu0 %v3810_v19  ;;  %v6772_v18 = vld [vmem:[%s8432_s3 + $0x98] sm:$0xff]   ;;  %v6773_v19 = vld [vmem:[%s8432_s3 + $0x50] sm:$0xff]  }
 0xbd1   :  { %6320 = vmatmul.mubr.bf16.vlgmr.msra.gmra.mxu1 %v3811_v20  ;;  %v6774_v20 = vld [vmem:[%s8432_s3 + $0x10] sm:$0xff]  }
 0xbd2   :  { %4044 = vmatmul.mubr.bf16.vlgmr.msra.gmra.mxu0 %v3809_v21  ;;  %6324 = vmatpush3.bf16.msra.mxu1 %v6735_v39  ;;  %v6769_v39 = vld [vmem:[%s8432_s3 + $0xa0] sm:$0xff]   ;;  %v6775_v21 = vld [vmem:[%s8432_s3 + $0x90] sm:$0xff]  }
 0xbd3   :  { %5930 = vmatpush3.bf16.msra.mxu0 %v6736_v26  ;;  %6325 = vmatprep.subr.bf16.mxu1 %v6836_v3  ;;  %v6776_v26 = vld [vmem:[%s8432_s3 + $0x48] sm:$0xff]  }
 0xbd4   :  { %5931 = vmatprep.subr.bf16.mxu0 %v6737_v0  ;;  %6339 = vmatprep.mubr.msk.bf16.mxu1 %vm6837_vm0, %v6836_v3  ;;  %v6777_v0 = vld [vmem:[%s8432_s3 + $0x8] sm:$0xff]  }
 0xbd6   :  { %6326 = vmatpush3.bf16.msra.mxu1 %v6738_v28  ;;  %v6778_v28 = vld [vmem:[%s8432_s3 + $0x88] sm:$0xff]  }
 0xbd7   :  { %5932 = vmatpush3.bf16.msra.mxu0 %v6739_v24  ;;  %6327 = vmatprep.subr.bf16.mxu1 %v6836_v3  ;;  %v6779_v24 = vld [vmem:[%s8432_s3 + $0x40] sm:$0xff]  }
 0xbd8   :  { %5933 = vmatprep.subr.bf16.mxu0 %v6740_v29  ;;  %v6780_v29 = vld [vmem:[%s8432_s3] sm:$0xff]  }
 0xbda   :  { %6328 = vmatpush3.bf16.msra.mxu1 %v6741_v54  ;;  %v6781_v54 = vld [vmem:[%s8432_s3 + $0x80] sm:$0xff]  }
 0xbdb   :  { %6329 = vmatprep.subr.bf16.mxu1 %v6836_v3  ;;  %5934 = vmatpush3.bf16.msra.mxu0 %v6742_v30  ;;  %v6782_v30 = vld [vmem:[%s8432_s3 + $0x78] sm:$0xff]  }
 0xbdc   :  { %5935 = vmatprep.subr.bf16.mxu0 %v6743_v31 }
 0xbde   :  { %6330 = vmatpush3.bf16.msra.mxu1 %v6744_v32 }
 0xbdf   :  { %5936 = vmatpush3.bf16.msra.mxu0 %v6745_v33  ;;  %6331 = vmatprep.subr.bf16.mxu1 %v6836_v3 }
 0xbe0   :  { %5937 = vmatprep.subr.bf16.mxu0 %v6746_v34 }
 0xbe2   :  { %6332 = vmatpush3.bf16.msra.mxu1 %v6747_v35 }
 0xbe3   :  { %5938 = vmatpush3.bf16.msra.mxu0 %v6748_v36  ;;  %6333 = vmatprep.subr.bf16.mxu1 %v6836_v3 }
 0xbe4   :  { %5939 = vmatprep.subr.bf16.mxu0 %v6749_v37 }
 0xbe6   :  { %6334 = vmatpush3.bf16.msra.mxu1 %v6750_v38 }
 0xbe7   :  { %5940 = vmatpush3.bf16.msra.mxu0 %v6751_v40  ;;  %6335 = vmatprep.subr.bf16.mxu1 %v6836_v3 }
 0xbe8   :  { %5941 = vmatprep.subr.bf16.mxu0 %v6752_v41 }
 0xbea   :  { %6336 = vmatpush3.bf16.msra.mxu1 %v6753_v42 }
 0xbeb   :  { %5942 = vmatpush3.bf16.msra.mxu0 %v6754_v43  ;;  %6337 = vmatprep.subr.bf16.mxu1 %v6836_v3 }
 0xbec   :  { %5943 = vmatprep.subr.bf16.mxu0 %v6755_v44 }
 0xbee   :  { %6338 = vmatpush3.bf16.msra.mxu1 %v6756_v46 }
 0xbef   :  { %5944 = vmatpush3.bf16.msra.mxu0 %v6757_v47  ;;  %6343 = vmatprep.subr.bf16.mxu1 %v6836_v3 }
 0xbf0   :  { %5960 = vmatprep.subr.bf16.mxu0 %v6758_v5  ;;  %v6794_v5 = vld [vmem:[%s8432_s3 + $0x58] sm:$0xff]  }
 0xc91   :  { %v4085_v48 = vpop.f32.mrf.mxu1 }
 0xc92   :  { %v5914_v49 = vpop.f32.mrf.mxu0 }
 0xc93   :  { %v6321_v50 = vpop.f32.mrf.mxu1 }
 0xc94   :  { %v5915_v52 = vpop.f32.mrf.mxu0 }
 0xc95   :  { %v5916_v53 = vadd.f32 %v5915_v52, %v5914_v49  ;;  %v4088_v22 = vpop.f32.mrf.mxu1 }
 0xc96   :  { %v5917_v56 = vpop.f32.mrf.mxu0  ;;  %v6787_v22 = vld [vmem:[%s8432_s3 + $0xb0] sm:$0xff]  }
 0xc97   :  { %v4046_v25 = vadd.f32 %v5916_v53, %v8200_v51  ;;  %v6322_v57 = vpop.f32.mrf.mxu1 }
 0xc98   :  { %v5918_v58 = vpop.f32.mrf.mxu0 }
 0xc99   :  { %v4086_v59 = vadd.f32 %v4085_v48, %v4046_v25  ;;  %v6783_v58 = vld [vmem:[%s8432_s3 + $0x38] sm:$0xff]  }
 0xc9b   :  { %v4091_v60 = vmax.f32 %v4086_v59, 0.0  ;;  %v6785_v59 = vld [vmem:[%s8432_s3 + $0x70] sm:$0xff]  }
 0xc9d   :  { %4093 = vst [vmem:[#allocation2 + $0x1] sm:$0x7] %v4091_v60  ;;  %v6790_v60 = vld [vmem:[%s8432_s3 + $0xa8] sm:$0xff]  }
 0xca4   :  { %v4096_v61 = vld [vmem:[#allocation2 + $0x1] sm:$0x7] }
 0xca5   :  { %v4097_v62 = vld [vmem:[#allocation2 + $0x2] sm:$0x7]  ;;  %v4099_v1 = vpack.c.bf16 %v4096_v61, %v4096_v61  ;;  %v6786_v61 = vld [vmem:[%s8432_s3 + $0x30] sm:$0xff]  }
 0xca6   :  { %v4095_v63 = vld [vmem:[#allocation2] sm:$0x7]  ;;  %v4100_v2 = vpack.c.bf16 %v4097_v62, %v4097_v62  ;;  %4382 = vst [vmem:[#allocation2 + $0x3] sm:$0x1] %v6836_v3  ;;  %v6788_v62 = vld [vmem:[%s8432_s3 + $0x68] sm:$0xff]  }
 0xca7   :  { %v4098_v4 = vpack.c.bf16 %v4095_v63, %v4095_v63  ;;  %4332 = vmatprep.mubr.bf16.mxu0 %v4099_v1  ;;  %v6789_v63 = vld [vmem:[%s8432_s3 + $0x28] sm:$0xff]   ;;  %v6791_v1 = vld [vmem:[%s8432_s3 + $0x60] sm:$0xff]  }
 0xca8   :  { %6340 = vmatmul.mubr.bf16.vlgmr.msra.gmra.mxu1 %v4100_v2  ;;  %v6792_v2 = vld [vmem:[%s8432_s3 + $0x20] sm:$0xff]  }
 0xca9   :  { %4333 = vmatmul.mubr.bf16.vlgmr.msra.gmra.mxu0 %v4098_v4  ;;  %6359 = vmatprep.mubr.msk.bf16.mxu1 %vm6837_vm0, %v6836_v3  ;;  %v6793_v4 = vld [vmem:[%s8432_s3 + $0xa0] sm:$0xff]  }
 0xcaa   :  { %5961 = vmatpush3.bf16.msra.mxu0 %v6759_v6  ;;  %6344 = vmatpush3.bf16.msra.mxu1 %v6760_v7  ;;  %v6795_v6 = vld [vmem:[%s8432_s3 + $0x18] sm:$0xff]  }
 0xcab   :  { %6345 = vmatprep.subr.bf16.mxu1 %v6836_v3  ;;  %5962 = vmatprep.subr.bf16.mxu0 %v6761_v8  ;;  %v6796_v7 = vld [vmem:[%s8432_s3 + $0x98] sm:$0xff]   ;;  %v6797_v8 = vld [vmem:[%s8432_s3 + $0x50] sm:$0xff]  }
 0xcae   :  { %5963 = vmatpush3.bf16.msra.mxu0 %v6762_v9  ;;  %6346 = vmatpush3.bf16.msra.mxu1 %v6763_v10  ;;  %v6798_v9 = vld [vmem:[%s8432_s3 + $0x10] sm:$0xff]  }
 0xcaf   :  { %6347 = vmatprep.subr.bf16.mxu1 %v6836_v3  ;;  %5964 = vmatprep.subr.bf16.mxu0 %v6764_v11  ;;  %v6799_v10 = vld [vmem:[%s8432_s3 + $0x90] sm:$0xff]   ;;  %v6800_v11 = vld [vmem:[%s8432_s3 + $0x48] sm:$0xff]  }
 0xcb2   :  { %5965 = vmatpush3.bf16.msra.mxu0 %v6765_v12  ;;  %6348 = vmatpush3.bf16.msra.mxu1 %v6766_v13  ;;  %v6801_v12 = vld [vmem:[%s8432_s3 + $0x8] sm:$0xff]  }
 0xcb3   :  { %5966 = vmatprep.subr.bf16.mxu0 %v6767_v14  ;;  %6349 = vmatprep.subr.bf16.mxu1 %v6836_v3  ;;  %v6802_v13 = vld [vmem:[%s8432_s3 + $0x88] sm:$0xff]   ;;  %v6803_v14 = vld [vmem:[%s8432_s3 + $0x40] sm:$0xff]  }
 0xcb6   :  { %5967 = vmatpush3.bf16.msra.mxu0 %v6768_v16  ;;  %6350 = vmatpush3.bf16.msra.mxu1 %v6769_v39  ;;  %v6804_v16 = vld [vmem:[%s8432_s3] sm:$0xff]  }
 0xcb7   :  { %5968 = vmatprep.subr.bf16.mxu0 %v6770_v17  ;;  %6351 = vmatprep.subr.bf16.mxu1 %v6836_v3  ;;  %v6805_v39 = vld [vmem:[%s8432_s3 + $0x80] sm:$0xff]  }
 0xcba   :  { %5969 = vmatpush3.bf16.msra.mxu0 %v6771_v45  ;;  %6352 = vmatpush3.bf16.msra.mxu1 %v6772_v18 }
 0xcbb   :  { %5970 = vmatprep.subr.bf16.mxu0 %v6773_v19  ;;  %6353 = vmatprep.subr.bf16.mxu1 %v6836_v3 }
 0xcbe   :  { %5971 = vmatpush3.bf16.msra.mxu0 %v6774_v20  ;;  %6354 = vmatpush3.bf16.msra.mxu1 %v6775_v21 }
 0xcbf   :  { %5972 = vmatprep.subr.bf16.mxu0 %v6776_v26  ;;  %6355 = vmatprep.subr.bf16.mxu1 %v6836_v3 }
 0xcc2   :  { %5973 = vmatpush3.bf16.msra.mxu0 %v6777_v0  ;;  %6356 = vmatpush3.bf16.msra.mxu1 %v6778_v28  ;;  %v4446_v0 = vld [vmem:[%s8433_s4] sm:$0x1] }
 0xcc3   :  { %5974 = vmatprep.subr.bf16.mxu0 %v6779_v24  ;;  %6357 = vmatprep.subr.bf16.mxu1 %v6836_v3 }
 0xcc6   :  { %5975 = vmatpush3.bf16.msra.mxu0 %v6780_v29  ;;  %6358 = vmatpush3.bf16.msra.mxu1 %v6781_v54 }
 0xcc7   :  { %6363 = vmatprep.subr.bf16.mxu1 %v6836_v3  ;;  %5991 = vmatprep.subr.bf16.mxu0 %v6782_v30 }
 0xd68   :  { %v4374_v31 = vpop.f32.mrf.mxu1 }
 0xd69   :  { %v5945_v32 = vpop.f32.mrf.mxu0 }
 0xd6a   :  { %v6341_v33 = vpop.f32.mrf.mxu1 }
 0xd6b   :  { %v5946_v34 = vpop.f32.mrf.mxu0 }
 0xd6c   :  { %v5947_v35 = vadd.f32 %v5946_v34, %v5945_v32  ;;  %v4377_v36 = vpop.f32.mrf.mxu1 }
 0xd6d   :  { %v5948_v37 = vpop.f32.mrf.mxu0 }
 0xd6e   :  { %v4335_v38 = vadd.f32 %v5947_v35, %v8200_v51  ;;  %v6342_v40 = vpop.f32.mrf.mxu1  ;;  %v6806_v37 = vld [vmem:[%s8434_s5 + $0x38] sm:$0xff]  }
 0xd6f   :  { %v5949_v41 = vpop.f32.mrf.mxu0  ;;  %v6808_v40 = vld [vmem:[%s8434_s5 + $0x28] sm:$0xff]  }
 0xd70   :  { %v4375_v42 = vadd.f32 %v4374_v31, %v4335_v38  ;;  %v6807_v38 = vld [vmem:[%s8434_s5 + $0x30] sm:$0xff]   ;;  %v6809_v41 = vld [vmem:[%s8434_s5 + $0x20] sm:$0xff]  }
 0xd72   :  { %v4380_v43 = vadd.f32 %v4375_v42, %v8113_v15  ;;  %v6784_v15 = vld [vmem:[%s8432_s3 + $0xb8] sm:$0xff]  }
 0xd73   :  { %v6810_v42 = vld [vmem:[%s8434_s5 + $0x18] sm:$0xff]  }
 0xd74   :  { %4381 = vst [vmem:[#allocation2] sm:$0x7] %v4380_v43 }
 0xd7b   :  { %v4383_v44 = vld [vmem:[#allocation2] ss:$2 sm:$0x1]  ;;  %v4384_v46 = vld [vmem:[#allocation2 + $0x1] ss:$2 sm:$0x1] }
 0xd7c   :  { %v4385_v47 = vmax.f32 %v4383_v44, %v4384_v46  ;;  %v4386_v48 = vld [vmem:[#allocation2 + $0x2] ss:$2 sm:$0x1]  ;;  %4389 = vst [vmem:[#allocation2] sm:$0x1] %v6836_v3  ;;  %v6811_v46 = vld [vmem:[%s8434_s5 + $0x10] sm:$0xff]  }
 0xd7d   :  { %4391 = vst [vmem:[#allocation2 + $0x2] sm:$0x1] %v6836_v3 }
 0xd7e   :  { %v8293_v49 = vmax.f32 %v4385_v47, %v4386_v48 }
 0xd80   :  { %v4388_v50 = vmax.f32 %v8293_v49, 0.0 }
 0xd82   :  { %4390 = vst [vmem:[#allocation2 + $0x1] sm:$0x1] %v4388_v50  ;;  %v6812_v50 = vld [vmem:[%s8434_s5 + $0x8] sm:$0xff]  }
 0xd83   :  { %v4392_v51 = vld [vmem:[#allocation2] sm:$0x1] }
 0xd84   :  { %4672 = vst [vmem:[#allocation2] sm:$0x1] %v6836_v3  ;;  %v4394_v52 = vld [vmem:[#allocation2 + $0x2] sm:$0x1]  ;;  %v4395_v25 = vpack.c.bf16 %v4392_v51, %v4392_v51 }
 0xd85   :  { %v4397_v53 = vpack.c.bf16 %v4394_v52, %v4394_v52  ;;  %4674 = vst [vmem:[#allocation2 + $0x2] sm:$0x1] %v6836_v3  ;;  %v6813_v51 = vld [vmem:[%s8434_s5] sm:$0xff]  }
 0xd86   :  { %v2268_v52 = vld [vmem:[%s8433_s4] sm:$0x1] }
 0xd87   :  { %6360 = vmatmul.mubr.bf16.vlgmr.msra.gmra.mxu1 %v4397_v53  ;;  %v4729_v53 = vld [vmem:[%s8433_s4] sm:$0x1] }
 0xd88   :  { %6364 = vmatpush3.bf16.msra.mxu1 %v6784_v15  ;;  %6379 = vmatprep.mubr.msk.bf16.mxu1 %vm6837_vm0, %v6836_v3 }
 0xd89   :  { %v4393_v56 = vld [vmem:[#allocation2 + $0x1] sm:$0x1]  ;;  %6365 = vmatprep.subr.bf16.mxu1 %v6836_v3 }
 0xd8a   :  { %v4396_v57 = vpack.c.bf16 %v4393_v56, %v4393_v56  ;;  %v2448_v56 = vadd.f32 %v7755_v55, %v2268_v52  ;;  %v5503_v55 = vld [vmem:[%s8435_s6] ss:$0 sm:$0xff] }
 0xd8b   :  { %v4675_v33 = vld [vmem:[#allocation2] sm:$0x1] }
 0xd8c   :  { %4623 = vmatprep.mubr.bf16.mxu0 %v4396_v57  ;;  %6366 = vmatpush3.bf16.msra.mxu1 %v6787_v22  ;;  %v4677_v17 = vld [vmem:[#allocation2 + $0x2] sm:$0x1]  ;;  %v4678_v35 = vpack.c.bf16 %v4675_v33, %v4675_v33 }
 0xd8d   :  { %4624 = vmatmul.mubr.bf16.vlgmr.msra.gmra.mxu0 %v4395_v25  ;;  %6367 = vmatprep.subr.bf16.mxu1 %v6836_v3  ;;  %v4680_v45 = vpack.c.bf16 %v4677_v17, %v4677_v17 }
 0xd8e   :  { %5992 = vmatpush3.bf16.msra.mxu0 %v6783_v58 }
 0xd8f   :  { %5993 = vmatprep.subr.bf16.mxu0 %v6785_v59  ;;  %v2488_v59 = vadd.f32 %v7670_v23, %v2448_v56 }
 0xd90   :  { %6368 = vmatpush3.bf16.msra.mxu1 %v6790_v60 }
 0xd91   :  { %6369 = vmatprep.subr.bf16.mxu1 %v6836_v3 }
 0xd92   :  { %5994 = vmatpush3.bf16.msra.mxu0 %v6786_v61 }
 0xd93   :  { %5995 = vmatprep.subr.bf16.mxu0 %v6788_v62  ;;  %v2493_v62 = vadd.f32 %v2488_v59, %v7550_v27 }
 0xd94   :  { %6370 = vmatpush3.bf16.msra.mxu1 %v6793_v4 }
 0xd95   :  { %6371 = vmatprep.subr.bf16.mxu1 %v6836_v3 }
 0xd96   :  { %5996 = vmatpush3.bf16.msra.mxu0 %v6789_v63 }
 0xd97   :  { %5997 = vmatprep.subr.bf16.mxu0 %v6791_v1 }
 0xd98   :  { %6372 = vmatpush3.bf16.msra.mxu1 %v6796_v7 }
 0xd99   :  { %6373 = vmatprep.subr.bf16.mxu1 %v6836_v3 }
 0xd9a   :  { %5998 = vmatpush3.bf16.msra.mxu0 %v6792_v2 }
 0xd9b   :  { %5999 = vmatprep.subr.bf16.mxu0 %v6794_v5 }
 0xd9c   :  { %6374 = vmatpush3.bf16.msra.mxu1 %v6799_v10 }
 0xd9d   :  { %6375 = vmatprep.subr.bf16.mxu1 %v6836_v3 }
 0xd9e   :  { %6000 = vmatpush3.bf16.msra.mxu0 %v6795_v6 }
 0xd9f   :  { %6001 = vmatprep.subr.bf16.mxu0 %v6797_v8 }
 0xda0   :  { %6376 = vmatpush3.bf16.msra.mxu1 %v6802_v13 }
 0xda1   :  { %6377 = vmatprep.subr.bf16.mxu1 %v6836_v3 }
 0xda2   :  { %6002 = vmatpush3.bf16.msra.mxu0 %v6798_v9 }
 0xda3   :  { %6003 = vmatprep.subr.bf16.mxu0 %v6800_v11 }
 0xda4   :  { %6378 = vmatpush3.bf16.msra.mxu1 %v6805_v39 }
 0xda6   :  { %6004 = vmatpush3.bf16.msra.mxu0 %v6801_v12 }
 0xda7   :  { %6005 = vmatprep.subr.bf16.mxu0 %v6803_v14  ;;  %6380 = vmatmul.mubr.bf16.vlgmr.msra.gmra.mxu1 %v4680_v45 }
 0xdaa   :  { %6006 = vmatpush3.bf16.msra.mxu0 %v6804_v16 }
 0xdab   :  { %6383 = vmatprep.subr.bf16.mxu0 %v6836_v3 }
 0xe47   :  { %v4665_v18 = vpop.f32.mrf.mxu1 }
 0xe49   :  { %v6361_v19 = vpop.f32.mrf.mxu1 }
 0xe4b   :  { %v4668_v20 = vpop.f32.mrf.mxu1 }
 0xe4d   :  { %v5976_v21 = vpop.f32.mrf.mxu0  ;;  %v6362_v26 = vpop.f32.mrf.mxu1 }
 0xe4f   :  { %v5977_v28 = vpop.f32.mrf.mxu0 }
 0xe50   :  { %v5978_v24 = vadd.f32 %v5977_v28, %v5976_v21 }
 0xe51   :  { %v5979_v29 = vpop.f32.mrf.mxu0 }
 0xe52   :  { %v4626_v54 = vadd.f32 %v5978_v24, %v4446_v0 }
 0xe53   :  { %v5980_v30 = vpop.f32.mrf.mxu0 }
 0xe54   :  { %v4666_v31 = vadd.f32 %v4665_v18, %v4626_v54 }
 0xe56   :  { %v4671_v32 = vmax.f32 %v4666_v31, 0.0 }
 0xe58   :  { %4673 = vst [vmem:[#allocation2 + $0x1] sm:$0x1] %v4671_v32 }
 0xe5f   :  { %v4676_v34 = vld [vmem:[#allocation2 + $0x1] sm:$0x1] }
 0xe60   :  { %v4679_v36 = vpack.c.bf16 %v4676_v34, %v4676_v34 }
 0xe62   :  { %4906 = vmatprep.mubr.bf16.mxu0 %v4679_v36 }
 0xe63   :  { %4907 = vmatmul.mubr.bf16.vlgmr.msra.gmra.mxu0 %v4678_v35 }
 0xe64   :  { %6384 = vmatpush3.bf16.msra.mxu0 %v6806_v37  ;;  %6399 = vmatprep.mubr.msk.bf16.mxu0 %vm6837_vm0, %v6836_v3 }
 0xe65   :  { %6385 = vmatprep.subr.bf16.mxu0 %v6836_v3 }
 0xe67   :  { %v4948_v43 = vpop.f32.mrf.mxu1 }
 0xe68   :  { %6386 = vmatpush3.bf16.msra.mxu0 %v6807_v38 }
 0xe69   :  { %6387 = vmatprep.subr.bf16.mxu0 %v6836_v3  ;;  %v6381_v44 = vpop.f32.mrf.mxu1 }
 0xe6b   :  { %v4951_v47 = vpop.f32.mrf.mxu1 }
 0xe6c   :  { %6388 = vmatpush3.bf16.msra.mxu0 %v6808_v40 }
 0xe6d   :  { %6389 = vmatprep.subr.bf16.mxu0 %v6836_v3  ;;  %v6382_v48 = vpop.f32.mrf.mxu1 }
 0xe70   :  { %6390 = vmatpush3.bf16.msra.mxu0 %v6809_v41 }
 0xe71   :  { %6391 = vmatprep.subr.bf16.mxu0 %v6836_v3 }
 0xe74   :  { %6392 = vmatpush3.bf16.msra.mxu0 %v6810_v42 }
 0xe75   :  { %6393 = vmatprep.subr.bf16.mxu0 %v6836_v3 }
 0xe78   :  { %6394 = vmatpush3.bf16.msra.mxu0 %v6811_v46 }
 0xe79   :  { %6395 = vmatprep.subr.bf16.mxu0 %v6836_v3 }
 0xe7c   :  { %6396 = vmatpush3.bf16.msra.mxu0 %v6812_v50 }
 0xe7d   :  { %6397 = vmatprep.subr.bf16.mxu0 %v6836_v3 }
 0xe80   :  { %6398 = vmatpush3.bf16.msra.mxu0 %v6813_v51 }
 0xf23   :  { %v6007_v15 = vpop.f32.mrf.mxu0 }
 0xf25   :  { %v6008_v22 = vpop.f32.mrf.mxu0 }
 0xf26   :  { %v6009_v25 = vadd.f32 %v6008_v22, %v6007_v15 }
 0xf27   :  { %v6010_v57 = vpop.f32.mrf.mxu0 }
 0xf28   :  { %v4909_v3 = vadd.f32 %v6009_v25, %v4729_v53 }
 0xf29   :  { %v6011_v58 = vpop.f32.mrf.mxu0 }
 0xf2a   :  { %v4949_v60 = vadd.f32 %v4948_v43, %v4909_v3 }
 0xf2c   :  { %v4954_v61 = vadd.f32 %v4949_v60, %v8293_v49 }
 0xf2e   :  { %v4956_v63 = vrot.slane %v4954_v61, 7 }
 0xf30   :  { %v4959_v1 = vsel %vm4958_vm4, %v2493_v62, %v4956_v63 }
 0xf31   :  { %v4960_v2 = vpack.c.bf16 %v4959_v1, %v4959_v1 }
 0xf33   :  { %6400 = vmatmul.mubr.bf16.vlgmr.msra.gmra.mxu0 %v4960_v2 }
 0xff3   :  { %v5066_v4 = vpop.f32.mrf.mxu0 }
 0xff4   :  { %v5067_v5 = vadd.f32 %v5503_v55, %v5066_v4 }
 0xff5   :  { %v6401_v23 = vpop.f32.mrf.mxu0 }
 0xff6   :  { %5072 = vst [vmem:[#allocation3] sm:$0x3] %v5067_v5 }
 0xff7   :  { %v5069_v6 = vpop.f32.mrf.mxu0 }
 0xff8   :  { %6825 = shalt.err (!%p6822_p4)
}
 0xff9   :  { %5082 = dma.vmem_to_hbm [thread:$0]  %s5080_s12, 32, %s8436_s7, [#allocation4]   ;;  %v6402_v27 = vpop.f32.mrf.mxu0 }
 0xffa   :  { %6834 = dma.done.wait [#allocation4], 32  }
 0xffb   :  { %6835 = vsyncadd [#allocation4], 4294967264 }
 0xffc   :  { %5086 = vsyncpa [#allocation4], 1 }

</bundles_post_ra>
